<compile_context>
chip_gen: v7x
topology: tpu7x:2x2x1
jax: 0.10.0
libtpu: 0.0.40
codegen_flags: <defaults>
</compile_context>

<pallas_src>
import jax
import jax.numpy as jnp
from jax.experimental import pallas as pl
from jax.experimental.pallas import tpu as pltpu

ORDERS = 10          # batch rows in the original module
FEAT = 43            # feature width in the original module
M_PAD = 16           # ORDERS padded to a sublane multiple
LANE = 128           # FEAT padded to one lane tile; each gate owns one slab
NGATES = 4           # i, f, g, o


# --------------------------------------------------------------------------
# Kernel: full recurrence.  One grid step == one LSTM-cell step.
#   x_ref              : (1, M_PAD, LANE)        current timestep (streamed)
#   h0_ref, c0_ref     : (M_PAD, LANE)           initial state (read at t==0)
#   wx_ref, wh_ref     : (LANE, NGATES*LANE)     VMEM-resident fused weights
#   b_ref              : (1, NGATES*LANE)        VMEM-resident fused bias
#   hseq_ref           : (1, M_PAD, LANE)        h output for this timestep
#   cfin_ref           : (M_PAD, LANE)           final c (written at last t)
#   h_sc, c_sc         : (M_PAD, LANE) VMEM      recurrent state carry
# --------------------------------------------------------------------------
def lstm_seq_kernel(x_ref, h0_ref, c0_ref, wx_ref, wh_ref, b_ref,
                    hseq_ref, cfin_ref, h_sc, c_sc):
    t = pl.program_id(0)

    @pl.when(t == 0)
    def _():
        h_sc[...] = h0_ref[...]
        c_sc[...] = c0_ref[...]

    x = x_ref[0]                      # (M_PAD, LANE)
    h = h_sc[...]
    c = c_sc[...]

    # Two MXU pushes (instead of 8 tiny matmuls) + one fused bias add.
    gates = (jnp.dot(x, wx_ref[...], preferred_element_type=jnp.float32,
                     precision=jax.lax.Precision.HIGHEST)
             + jnp.dot(h, wh_ref[...], preferred_element_type=jnp.float32,
                       precision=jax.lax.Precision.HIGHEST)
             + b_ref[...])            # (M_PAD, NGATES*LANE)

    # 128-lane-aligned gate slabs -> slices are free vreg selections.
    i = jax.nn.sigmoid(gates[:, 0 * LANE:1 * LANE])
    f = jax.nn.sigmoid(gates[:, 1 * LANE:2 * LANE])
    g = jnp.tanh(gates[:, 2 * LANE:3 * LANE])
    o = jax.nn.sigmoid(gates[:, 3 * LANE:4 * LANE])

    c_new = f * c + i * g
    h_new = o * jnp.tanh(c_new)

    h_sc[...] = h_new
    c_sc[...] = c_new
    hseq_ref[0] = h_new               # lane-dense, unmasked store

    @pl.when(t == pl.num_programs(0) - 1)
    def _():
        cfin_ref[...] = c_new


# --------------------------------------------------------------------------
# One-time parameter fusion (setup, NOT per step).
#   wx, wh : (4, 43, 43) PyTorch nn.Linear (out, in) convention, gates i,f,g,o
#   bx, bh : (4, 43)
# Emits lane-padded, gate-slab weights (128, 512) and fused bias (1, 512).
# --------------------------------------------------------------------------
def fuse_lstm_params(wx, bx, wh, bh):
    wx_f = jnp.zeros((LANE, NGATES * LANE), jnp.float32)
    wh_f = jnp.zeros((LANE, NGATES * LANE), jnp.float32)
    b_f = jnp.zeros((1, NGATES * LANE), jnp.float32)
    for k in range(NGATES):
        wx_f = wx_f.at[:FEAT, k * LANE:k * LANE + FEAT].set(wx[k].T)
        wh_f = wh_f.at[:FEAT, k * LANE:k * LANE + FEAT].set(wh[k].T)
        b_f = b_f.at[0, k * LANE:k * LANE + FEAT].set(bx[k] + bh[k])
    return wx_f, wh_f, b_f


def pad_state(a):
    """(ORDERS, FEAT) -> (M_PAD, LANE), zero padded."""
    return jnp.zeros((M_PAD, LANE), a.dtype).at[:ORDERS, :FEAT].set(a)


def pad_seq(x):
    """(T, ORDERS, FEAT) -> (T, M_PAD, LANE), zero padded."""
    t = x.shape[0]
    return jnp.zeros((t, M_PAD, LANE), x.dtype).at[:, :ORDERS, :FEAT].set(x)


# --------------------------------------------------------------------------
# Wrapper: run T recurrent steps in one pallas_call.
# Returns (h_seq_padded, c_final_padded).
# --------------------------------------------------------------------------
@jax.jit
def lstm_forward(x_seq_p, h0_p, c0_p, wx_f, wh_f, b_f):
    T = x_seq_p.shape[0]
    h_seq, c_fin = pl.pallas_call(
        lstm_seq_kernel,
        out_shape=(
            jax.ShapeDtypeStruct((T, M_PAD, LANE), jnp.float32),
            jax.ShapeDtypeStruct((M_PAD, LANE), jnp.float32),
        ),
        grid_spec=pltpu.PrefetchScalarGridSpec(
            num_scalar_prefetch=0,
            grid=(T,),
            in_specs=[
                pl.BlockSpec((1, M_PAD, LANE), lambda t: (t, 0, 0)),   # x_t
                pl.BlockSpec((M_PAD, LANE), lambda t: (0, 0)),         # h0
                pl.BlockSpec((M_PAD, LANE), lambda t: (0, 0)),         # c0
                pl.BlockSpec((LANE, NGATES * LANE), lambda t: (0, 0)),  # wx_f
                pl.BlockSpec((LANE, NGATES * LANE), lambda t: (0, 0)),  # wh_f
                pl.BlockSpec((1, NGATES * LANE), lambda t: (0, 0)),     # b_f
            ],
            out_specs=(
                pl.BlockSpec((1, M_PAD, LANE), lambda t: (t, 0, 0)),    # h_seq
                pl.BlockSpec((M_PAD, LANE), lambda t: (0, 0)),          # c_fin
            ),
            scratch_shapes=[
                pltpu.VMEM((M_PAD, LANE), jnp.float32),   # h carry
                pltpu.VMEM((M_PAD, LANE), jnp.float32),   # c carry
            ],
        ),
        compiler_params=pltpu.CompilerParams(
            dimension_semantics=("arbitrary",)),
    )(x_seq_p, h0_p, c0_p, wx_f, wh_f, b_f)
    return h_seq, c_fin


# --------------------------------------------------------------------------
# Pure-JAX reference: repeated calls of the ORIGINAL module forward, using the
# unfused PyTorch-convention params (also validates fusion / gate ordering).
# --------------------------------------------------------------------------
def lstm_ref(x_seq, h0, c0, wx, bx, wh, bh):
    mm = lambda a, b: jnp.dot(a, b, precision=jax.lax.Precision.HIGHEST)
    h, c = h0, c0
    hs = []
    for t in range(x_seq.shape[0]):
        x = x_seq[t]
        i = jax.nn.sigmoid(mm(x, wx[0].T) + bx[0] + mm(h, wh[0].T) + bh[0])
        f = jax.nn.sigmoid(mm(x, wx[1].T) + bx[1] + mm(h, wh[1].T) + bh[1])
        g = jnp.tanh(mm(x, wx[2].T) + bx[2] + mm(h, wh[2].T) + bh[2])
        o = jax.nn.sigmoid(mm(x, wx[3].T) + bx[3] + mm(h, wh[3].T) + bh[3])
        c = f * c + i * g
        h = o * jnp.tanh(c)
        hs.append(h)
    return jnp.stack(hs), c


if __name__ == "__main__":
    T = 8
    key = jax.random.PRNGKey(0)
    k_x, k_h, k_c, k_wx, k_bx, k_wh, k_bh = jax.random.split(key, 7)

    # Deterministic synthetic sequence / state / parameters.
    x_seq = jax.random.uniform(k_x, (T, ORDERS, FEAT), dtype=jnp.float32)
    h0 = jax.random.uniform(k_h, (ORDERS, FEAT), dtype=jnp.float32)  # self.h
    c0 = jax.random.uniform(k_c, (ORDERS, FEAT), dtype=jnp.float32)  # self.c

    # Stacked gate weights/biases in PyTorch nn.Linear (out, in) convention.
    # Gate order: (ii/hi, if/hf, ig/hg, io/ho).
    lim = 1.0 / jnp.sqrt(FEAT)
    wx = jax.random.uniform(k_wx, (NGATES, FEAT, FEAT), minval=-lim,
                            maxval=lim, dtype=jnp.float32)
    bx = jax.random.uniform(k_bx, (NGATES, FEAT), minval=-lim, maxval=lim,
                            dtype=jnp.float32)
    wh = jax.random.uniform(k_wh, (NGATES, FEAT, FEAT), minval=-lim,
                            maxval=lim, dtype=jnp.float32)
    bh = jax.random.uniform(k_bh, (NGATES, FEAT), minval=-lim, maxval=lim,
                            dtype=jnp.float32)

    # Reference (unfused params, per-step loop == repeated Model.forward).
    h_seq_ref, c_fin_ref = lstm_ref(x_seq, h0, c0, wx, bx, wh, bh)

    # One-time fusion + padding, then a single kernel call for all T steps.
    wx_f, wh_f, b_f = fuse_lstm_params(wx, bx, wh, bh)
    h_seq_p, c_fin_p = lstm_forward(pad_seq(x_seq), pad_state(h0),
                                    pad_state(c0), wx_f, wh_f, b_f)
    jax.block_until_ready((h_seq_p, c_fin_p))

    # Un-pad once at the end.
    h_seq = h_seq_p[:, :ORDERS, :FEAT]
    c_fin = c_fin_p[:ORDERS, :FEAT]

    assert jnp.allclose(h_seq, h_seq_ref, atol=1e-5, rtol=1e-5)
    assert jnp.allclose(c_fin, c_fin_ref, atol=1e-5, rtol=1e-5)

    print("KERNEL_OK")
</pallas_src>

<mosaic_0001>
module attributes {stable_mosaic.version = 11 : i64} {
  func.func @lstm_seq_kernel(%arg0: i32, %arg1: memref<1x16x128xf32, #tpu.memory_space<vmem>>, %arg2: memref<16x128xf32, #tpu.memory_space<vmem>>, %arg3: memref<16x128xf32, #tpu.memory_space<vmem>>, %arg4: memref<128x512xf32, #tpu.memory_space<vmem>>, %arg5: memref<128x512xf32, #tpu.memory_space<vmem>>, %arg6: memref<1x512xf32, #tpu.memory_space<vmem>>, %arg7: memref<1x16x128xf32, #tpu.memory_space<vmem>>, %arg8: memref<16x128xf32, #tpu.memory_space<vmem>>, %arg9: memref<16x128xf32, #tpu.memory_space<vmem>>, %arg10: memref<16x128xf32, #tpu.memory_space<vmem>>) attributes {dimension_semantics = [#tpu.dimension_semantics<arbitrary>], iteration_bounds = array<i64: 8>, scalar_prefetch = 0 : i64, scratch_operands = 2 : i64, tpu.core_type = #tpu.core_type<tc>, window_params = [{transform_indices = @transform_0, window_bounds = array<i64: 1, 16, 128>}, {pipeline_mode = #tpu.pipeline_mode<synchronous>, transform_indices = @transform_1, window_bounds = array<i64: 16, 128>}, {pipeline_mode = #tpu.pipeline_mode<synchronous>, transform_indices = @transform_2, window_bounds = array<i64: 16, 128>}, {pipeline_mode = #tpu.pipeline_mode<synchronous>, transform_indices = @transform_3, window_bounds = array<i64: 128, 512>}, {pipeline_mode = #tpu.pipeline_mode<synchronous>, transform_indices = @transform_4, window_bounds = array<i64: 128, 512>}, {pipeline_mode = #tpu.pipeline_mode<synchronous>, transform_indices = @transform_5, window_bounds = array<i64: 1, 512>}, {transform_indices = @transform_6, window_bounds = array<i64: 1, 16, 128>}, {pipeline_mode = #tpu.pipeline_mode<synchronous>, transform_indices = @transform_7, window_bounds = array<i64: 16, 128>}]} {
    %c0_i32 = arith.constant 0 : i32
    %0 = arith.cmpi eq, %arg0, %c0_i32 : i32
    %1 = arith.extui %0 : i1 to i32
    %c0_i32_0 = arith.constant 0 : i32
    %2 = arith.cmpi ne, %1, %c0_i32_0 : i32
    scf.if %2 {
      %c0_25 = arith.constant 0 : index
      %c0_26 = arith.constant 0 : index
      %48 = vector.load %arg2[%c0_25, %c0_26] : memref<16x128xf32, #tpu.memory_space<vmem>>, vector<16x128xf32>
      %c0_27 = arith.constant 0 : index
      %c0_28 = arith.constant 0 : index
      %49 = vector.load %arg9[%c0_27, %c0_28] : memref<16x128xf32, #tpu.memory_space<vmem>>, vector<16x128xf32>
      tpu.vector_store %arg9[%c0_27, %c0_28], %48 {strides = array<i32>} : memref<16x128xf32, #tpu.memory_space<vmem>>, vector<16x128xf32>,
      %c0_29 = arith.constant 0 : index
      %c0_30 = arith.constant 0 : index
      %50 = vector.load %arg3[%c0_29, %c0_30] : memref<16x128xf32, #tpu.memory_space<vmem>>, vector<16x128xf32>
      %c0_31 = arith.constant 0 : index
      %c0_32 = arith.constant 0 : index
      %51 = vector.load %arg10[%c0_31, %c0_32] : memref<16x128xf32, #tpu.memory_space<vmem>>, vector<16x128xf32>
      tpu.vector_store %arg10[%c0_31, %c0_32], %50 {strides = array<i32>} : memref<16x128xf32, #tpu.memory_space<vmem>>, vector<16x128xf32>,
    } else {
    }
    %c0 = arith.constant 0 : index
    %c0_1 = arith.constant 0 : index
    %c0_2 = arith.constant 0 : index
    %3 = vector.load %arg1[%c0, %c0_1, %c0_2] : memref<1x16x128xf32, #tpu.memory_space<vmem>>, vector<1x16x128xf32>
    %4 = vector.shape_cast %3 : vector<1x16x128xf32> to vector<16x128xf32>
    %c0_3 = arith.constant 0 : index
    %c0_4 = arith.constant 0 : index
    %5 = vector.load %arg9[%c0_3, %c0_4] : memref<16x128xf32, #tpu.memory_space<vmem>>, vector<16x128xf32>
    %c0_5 = arith.constant 0 : index
    %c0_6 = arith.constant 0 : index
    %6 = vector.load %arg10[%c0_5, %c0_6] : memref<16x128xf32, #tpu.memory_space<vmem>>, vector<16x128xf32>
    %c0_7 = arith.constant 0 : index
    %c0_8 = arith.constant 0 : index
    %7 = vector.load %arg4[%c0_7, %c0_8] : memref<128x512xf32, #tpu.memory_space<vmem>>, vector<128x512xf32>
    %cst = arith.constant dense<0.000000e+00> : vector<16x512xf32>
    %8 = tpu.matmul %4, %7, %cst {dimension_numbers = #tpu.dot_dimension_numbers<[1], [0], [0], [1], [0, 0, 1, 1], [], []>, precision = #tpu.contract_precision<fp32>} : vector<16x128xf32>, vector<128x512xf32>, vector<16x512xf32> -> vector<16x512xf32>
    %c0_9 = arith.constant 0 : index
    %c0_10 = arith.constant 0 : index
    %9 = vector.load %arg5[%c0_9, %c0_10] : memref<128x512xf32, #tpu.memory_space<vmem>>, vector<128x512xf32>
    %cst_11 = arith.constant dense<0.000000e+00> : vector<16x512xf32>
    %10 = tpu.matmul %5, %9, %cst_11 {dimension_numbers = #tpu.dot_dimension_numbers<[1], [0], [0], [1], [0, 0, 1, 1], [], []>, precision = #tpu.contract_precision<fp32>} : vector<16x128xf32>, vector<128x512xf32>, vector<16x512xf32> -> vector<16x512xf32>
    %11 = arith.addf %8, %10 : vector<16x512xf32>
    %c0_12 = arith.constant 0 : index
    %c0_13 = arith.constant 0 : index
    %12 = vector.load %arg6[%c0_12, %c0_13] : memref<1x512xf32, #tpu.memory_space<vmem>>, vector<1x512xf32>
    %13 = vector.broadcast %12 : vector<1x512xf32> to vector<16x512xf32>
    %14 = arith.addf %11, %13 : vector<16x512xf32>
    %15 = vector.extract_strided_slice %14 {offsets = [0, 0], sizes = [16, 128], strides = [1, 1]} : vector<16x512xf32> to vector<16x128xf32>
    %16 = arith.negf %15 : vector<16x128xf32>
    %17 = math.exp %16 : vector<16x128xf32>
    %cst_14 = arith.constant 1.000000e+00 : f32
    %18 = vector.broadcast %cst_14 : f32 to vector<16x128xf32>
    %19 = arith.addf %18, %17 : vector<16x128xf32>
    %20 = arith.divf %18, %19 : vector<16x128xf32>
    %21 = vector.extract_strided_slice %14 {offsets = [0, 128], sizes = [16, 128], strides = [1, 1]} : vector<16x512xf32> to vector<16x128xf32>
    %22 = arith.negf %21 : vector<16x128xf32>
    %23 = math.exp %22 : vector<16x128xf32>
    %cst_15 = arith.constant 1.000000e+00 : f32
    %24 = vector.broadcast %cst_15 : f32 to vector<16x128xf32>
    %25 = arith.addf %24, %23 : vector<16x128xf32>
    %26 = arith.divf %24, %25 : vector<16x128xf32>
    %27 = vector.extract_strided_slice %14 {offsets = [0, 256], sizes = [16, 128], strides = [1, 1]} : vector<16x512xf32> to vector<16x128xf32>
    %28 = math.tanh %27 : vector<16x128xf32>
    %29 = vector.extract_strided_slice %14 {offsets = [0, 384], sizes = [16, 128], strides = [1, 1]} : vector<16x512xf32> to vector<16x128xf32>
    %30 = arith.negf %29 : vector<16x128xf32>
    %31 = math.exp %30 : vector<16x128xf32>
    %cst_16 = arith.constant 1.000000e+00 : f32
    %32 = vector.broadcast %cst_16 : f32 to vector<16x128xf32>
    %33 = arith.addf %32, %31 : vector<16x128xf32>
    %34 = arith.divf %32, %33 : vector<16x128xf32>
    %35 = arith.mulf %26, %6 : vector<16x128xf32>
    %36 = arith.mulf %20, %28 : vector<16x128xf32>
    %37 = arith.addf %35, %36 : vector<16x128xf32>
    %38 = math.tanh %37 : vector<16x128xf32>
    %39 = arith.mulf %34, %38 : vector<16x128xf32>
    %c0_17 = arith.constant 0 : index
    %c0_18 = arith.constant 0 : index
    %40 = vector.load %arg9[%c0_17, %c0_18] : memref<16x128xf32, #tpu.memory_space<vmem>>, vector<16x128xf32>
    tpu.vector_store %arg9[%c0_17, %c0_18], %39 {strides = array<i32>} : memref<16x128xf32, #tpu.memory_space<vmem>>, vector<16x128xf32>,
    %c0_19 = arith.constant 0 : index
    %c0_20 = arith.constant 0 : index
    %41 = vector.load %arg10[%c0_19, %c0_20] : memref<16x128xf32, #tpu.memory_space<vmem>>, vector<16x128xf32>
    tpu.vector_store %arg10[%c0_19, %c0_20], %37 {strides = array<i32>} : memref<16x128xf32, #tpu.memory_space<vmem>>, vector<16x128xf32>,
    %c0_21 = arith.constant 0 : index
    %c0_22 = arith.constant 0 : index
    %c0_23 = arith.constant 0 : index
    %42 = vector.load %arg7[%c0_21, %c0_22, %c0_23] : memref<1x16x128xf32, #tpu.memory_space<vmem>>, vector<1x16x128xf32>
    %43 = vector.shape_cast %42 : vector<1x16x128xf32> to vector<16x128xf32>
    %44 = vector.shape_cast %39 : vector<16x128xf32> to vector<1x16x128xf32>
    tpu.vector_store %arg7[%c0_21, %c0_22, %c0_23], %44 {strides = array<i32>} : memref<1x16x128xf32, #tpu.memory_space<vmem>>, vector<1x16x128xf32>,
    %c7_i32 = arith.constant 7 : i32
    %45 = arith.cmpi eq, %arg0, %c7_i32 : i32
    %46 = arith.extui %45 : i1 to i32
    %c0_i32_24 = arith.constant 0 : i32
    %47 = arith.cmpi ne, %46, %c0_i32_24 : i32
    scf.if %47 {
      %c0_25 = arith.constant 0 : index
      %c0_26 = arith.constant 0 : index
      %48 = vector.load %arg8[%c0_25, %c0_26] : memref<16x128xf32, #tpu.memory_space<vmem>>, vector<16x128xf32>
      tpu.vector_store %arg8[%c0_25, %c0_26], %37 {strides = array<i32>} : memref<16x128xf32, #tpu.memory_space<vmem>>, vector<16x128xf32>,
    } else {
    }
    return
  }
  func.func @transform_0(%arg0: i32) -> (i32, i32, i32) {
    %c0_i32 = arith.constant 0 : i32
    %c0_i32_0 = arith.constant 0 : i32
    %c0_i32_1 = arith.constant 0 : i32
    return %arg0, %c0_i32, %c0_i32_0 : i32, i32, i32
  }
  func.func @transform_1(%arg0: i32) -> (i32, i32) {
    %c0_i32 = arith.constant 0 : i32
    %c0_i32_0 = arith.constant 0 : i32
    %c0_i32_1 = arith.constant 0 : i32
    return %c0_i32, %c0_i32_0 : i32, i32
  }
  func.func @transform_2(%arg0: i32) -> (i32, i32) {
    %c0_i32 = arith.constant 0 : i32
    %c0_i32_0 = arith.constant 0 : i32
    %c0_i32_1 = arith.constant 0 : i32
    return %c0_i32, %c0_i32_0 : i32, i32
  }
  func.func @transform_3(%arg0: i32) -> (i32, i32) {
    %c0_i32 = arith.constant 0 : i32
    %c0_i32_0 = arith.constant 0 : i32
    %c0_i32_1 = arith.constant 0 : i32
    return %c0_i32, %c0_i32_0 : i32, i32
  }
  func.func @transform_4(%arg0: i32) -> (i32, i32) {
    %c0_i32 = arith.constant 0 : i32
    %c0_i32_0 = arith.constant 0 : i32
    %c0_i32_1 = arith.constant 0 : i32
    return %c0_i32, %c0_i32_0 : i32, i32
  }
  func.func @transform_5(%arg0: i32) -> (i32, i32) {
    %c0_i32 = arith.constant 0 : i32
    %c0_i32_0 = arith.constant 0 : i32
    %c0_i32_1 = arith.constant 0 : i32
    return %c0_i32, %c0_i32_0 : i32, i32
  }
  func.func @transform_6(%arg0: i32) -> (i32, i32, i32) {
    %c0_i32 = arith.constant 0 : i32
    %c0_i32_0 = arith.constant 0 : i32
    %c0_i32_1 = arith.constant 0 : i32
    return %arg0, %c0_i32, %c0_i32_0 : i32, i32, i32
  }
  func.func @transform_7(%arg0: i32) -> (i32, i32) {
    %c0_i32 = arith.constant 0 : i32
    %c0_i32_0 = arith.constant 0 : i32
    %c0_i32_1 = arith.constant 0 : i32
    return %c0_i32, %c0_i32_0 : i32, i32
  }
}

</mosaic_0001>

<bundles_post_ra>
// kernel: lstm_forward.1
= control target key start
LH: loop header
LB: loop body
LE: loop exit
PB: predicated region body
PF: predicated region fallthrough
CT: control target
= control target key end

     0   :  { %s7833_s0 = inlined_call_operand.hbm [shape: f32[8,16,128], index: 0, kind: input, shape index: {}]   ;;  %s7834_s1 = inlined_call_operand.hbm [shape: f32[16,128], index: 1, kind: input, shape index: {}]   ;;  %s7835_s2 = inlined_call_operand.hbm [shape: f32[16,128], index: 2, kind: input, shape index: {}]   ;;  %s7836_s3 = inlined_call_operand.hbm [shape: f32[128,512], index: 3, kind: input, shape index: {}]   ;;  %s7837_s4 = inlined_call_operand.hbm [shape: f32[128,512], index: 4, kind: input, shape index: {}]   ;;  %s7838_s5 = inlined_call_operand.vmem [shape: f32[1,512], index: 5, kind: input, shape index: {}]   ;;  %s7839_s6 = inlined_call_operand.hbm [shape: f32[8,16,128], index: 6, kind: output, shape index: {0}]   ;;  %s7840_s7 = inlined_call_operand.hbm [shape: f32[16,128], index: 7, kind: output, shape index: {1}]  }
   0x1   :  { %8192 = sst [smem:[#allocation117_spill]] %s7834_s1 }
   0x2   :  { %13 = vsyncpa [#allocation5], 0 }
   0x3   :  { %15 = vsyncpa [#allocation5 + $0x1], 0 }
   0x4   :  { %16 = vsyncpa [#allocation8], 0 }
   0x5   :  { %17 = vsyncpa [#allocation11], 0 }
   0x6   :  { %18 = vsyncpa [#allocation6], 0 }
   0x7   :  { %20 = vsyncpa [#allocation6 + $0x1], 0 }
   0x8   :  { %21 = vsyncpa [#allocation15], 0  ;;  %s5680_s24 = smov 0   ;;  %s5682_s25 = smov 0  }
   0x9   :  { %s5684_s26 = smov 0   ;;  %s5686_s27 = smov 0  }
   0xa LB: > { %s5701_s28 = sadd.s32 4294967295, %s5624_s27   ;;  %s4355_s29 = sadd.s32 4294967294, %s5624_s27   ;;  %s5624_s27 = sphi %s5686_s27, %s8880_s27   ;;  %s5620_s26 = sphi %s5684_s26, %s8879_s26   ;;  %s5616_s25 = sphi %s5682_s25, %s8878_s25   ;;  %s5612_s24 = sphi %s5680_s24, %s8877_s24  }
   0xb   : > { %p47_p0 = scmp.ne.s32.totalorder %s5616_s25, %s5612_s24  ;;  %p7841_p1 = scmp.eq.s32.totalorder %s5701_s28, 0 }
   0xc   : > { %p182_p3 = scmp.eq.s32.totalorder %s4355_s29, 7  ;;  %p4356_p5 = scmp.ge.s32.totalorder %s5624_s27, 1 }
   0xd   : > { %p5710_p4 = por %p7841_p1, %p47_p0  ;;  %p210_p7 = scmp.lt.s32.totalorder %s5624_s27, 9 }
   0xe   : > { %p5715_p6 = por %p182_p3, %p47_p0  ;;  %s5626_s10 = smov [#allocation7]  }
   0xf   : > { %s8193_s30 = scalar_select %p5710_p4, 1, 0 }
  0x10   : > { %s8194_s8 = scalar_select %p5715_p6, 1, 0 }
  0x11   : > { %p5721_p9 = pnand %p4356_p5, %p210_p7  ;;  %s222_s11 = sshll.u32 %s5626_s10, 4  ;;  %s223_s11 = int_to_ptr.vmem [resolvable:$true] %s222_s11 }
  0x12   : > { %s5627_s13 = smov [#allocation10]   ;;  %s8197_s1 = sld [smem:[#allocation117_spill]] }
  0x13   : > { %s8195_s9 = scalar_select %p5721_p9, 1, 0 }
  0x14   : > { %p5269_p10 = pneg %p5721_p9  ;;  %s248_s14 = sshll.u32 %s5627_s13, 4  ;;  %s5733_s14 = int_to_ptr.vmem [resolvable:$true] %s248_s14 }
  0x16   : > { %p5729_p11 = pnand %p5269_p10, %p7841_p1 }
  0x18   : > { %s5378_s17 = scalar_lea.hbm %s8197_s1, 256  ;;  %p5743_p13 = pneg %p5729_p11 }
  0x19   : > { %p5379_p12 = scmp.ne.s32.totalorder %s8197_s1, %s5378_s17  ;;  %p5385_p5 = scmp.lt.u32.totalorder %s5378_s17, %s8197_s1 }
  0x1b   : > { %p5381_p0 = pnand %p5743_p13, %p5379_p12 }
  0x1d   : > { %p5382_p3 = pneg %p5381_p0 }
  0x1f   : > { %p5387_p7 = pnand %p5385_p5, %p5382_p3 }
  0x21   : > { %5390 = shalt.err (!%p5387_p7)
}
  0x22   : > { %s5391_s23 = scalar_lea.vmem %s223_s11, 256  ;;  %p5399_p2 = scmp.lt.s32.totalorder %s223_s11, %s223_s11 }
  0x23   : > { %p5392_p10 = scmp.ne.s32.totalorder %s223_s11, %s5391_s23  ;;  %p5400_p6 = scmp.lt.s32.totalorder %s5391_s23, %s5391_s23 }
  0x25   : > { %p5394_p8 = pnand %p5392_p10, %p5743_p13  ;;  %p5401_p4 = por %p5400_p6, %p5399_p2 }
  0x27   : > { %p5395_p1 = pneg %p5394_p8 }
  0x29   : > { %p5402_p9 = pnand %p5401_p4, %p5395_p1 }
  0x2b   : > { %5405 = shalt.err (!%p5402_p9)
}
  0x2c   : > { %s7844_s29 = smov 128   ;;  %s7846_s10 = smov 8  }
  0x2d   : > { %5272 = dma.hbm_to_vmem [thread:$0]  (!%p5729_p11), %s8197_s1, 256, %s223_s11, [#allocation8], %s7844_s29, %s7844_s29, %s7846_s10  }
  0x2e   : > { %s5406_s18 = scalar_lea.hbm %s7836_s3, 8192 }
  0x2f   : > { %p5407_p1 = scmp.ne.s32.totalorder %s7836_s3, %s5406_s18  ;;  %p5413_p6 = scmp.lt.u32.totalorder %s5406_s18, %s7836_s3 }
  0x31   : > { %p5409_p2 = pnand %p5407_p1, %p5743_p13 }
  0x33   : > { %p5410_p4 = pneg %p5409_p2 }
  0x35   : > { %p5415_p8 = pnand %p5413_p6, %p5410_p4 }
  0x37   : > { %5418 = shalt.err (!%p5415_p8)
}
  0x38   : > { %s5419_s11 = scalar_lea.vmem %s5733_s14, 8192  ;;  %p5427_p3 = scmp.lt.s32.totalorder %s5733_s14, %s5733_s14 }
  0x39   : > { %p5420_p9 = scmp.ne.s32.totalorder %s5733_s14, %s5419_s11  ;;  %p5428_p5 = scmp.lt.s32.totalorder %s5419_s11, %s5419_s11 }
  0x3b   : > { %p5422_p12 = pnand %p5420_p9, %p5743_p13  ;;  %p5429_p7 = por %p5428_p5, %p5427_p3 }
  0x3d   : > { %p5423_p0 = pneg %p5422_p12 }
  0x3f   : > { %p5430_p10 = pnand %p5429_p7, %p5423_p0 }
  0x41   : > { %5433 = shalt.err (!%p5430_p10)
}
  0x42   : > { %s7848_s13 = smov 512   ;;  %s5631_s15 = smov 32  }
  0x43   : > { %5278 = dma.hbm_to_vmem [thread:$0]  (!%p5729_p11), %s7836_s3, 8192, %s5733_s14, [#allocation11], %s7848_s13, %s7848_s13, %s5631_s15  }
  0x44   : > { %s5632_s18 = smov [#allocation9]   ;;  %s5633_s21 = smov [#allocation12]  }
  0x45   : > { %s235_s19 = sshll.u32 %s5632_s18, 4  ;;  %s261_s22 = sshll.u32 %s5633_s21, 4  ;;  %s236_s19 = int_to_ptr.vmem [resolvable:$true] %s235_s19  ;;  %s5788_s22 = int_to_ptr.vmem [resolvable:$true] %s261_s22 }
  0x46   : > { %s5434_s29 = scalar_lea.hbm %s7835_s2, 256 }
  0x47   : > { %p5435_p1 = scmp.ne.s32.totalorder %s7835_s2, %s5434_s29  ;;  %p5441_p6 = scmp.lt.u32.totalorder %s5434_s29, %s7835_s2 }
  0x49   : > { %p5437_p2 = pnand %p5435_p1, %p5743_p13 }
  0x4b   : > { %p5438_p4 = pneg %p5437_p2 }
  0x4d   : > { %p5443_p8 = pnand %p5441_p6, %p5438_p4 }
  0x4f   : > { %5446 = shalt.err (!%p5443_p8)
}
  0x50   : > { %s5447_s17 = scalar_lea.vmem %s236_s19, 256  ;;  %p5455_p3 = scmp.lt.s32.totalorder %s236_s19, %s236_s19 }
  0x51   : > { %p5448_p9 = scmp.ne.s32.totalorder %s236_s19, %s5447_s17  ;;  %p5456_p5 = scmp.lt.s32.totalorder %s5447_s17, %s5447_s17 }
  0x53   : > { %p5450_p12 = pnand %p5448_p9, %p5743_p13  ;;  %p5457_p7 = por %p5456_p5, %p5455_p3 }
  0x55   : > { %p5451_p0 = pneg %p5450_p12 }
  0x57   : > { %p5458_p10 = pnand %p5457_p7, %p5451_p0 }
  0x59   : > { %5461 = shalt.err (!%p5458_p10)
}
  0x5a   : > { %s8199_s1 = smov 8   ;;  %s8200_s10 = smov 128  }
  0x5b   : > { %5275 = dma.hbm_to_vmem [thread:$0]  (!%p5729_p11), %s7835_s2, 256, %s236_s19, [#allocation8], %s8200_s10, %s8200_s10, %s8199_s1  }
  0x5c   : > { %s5462_s11 = scalar_lea.hbm %s7837_s4, 8192 }
  0x5d   : > { %p5463_p1 = scmp.ne.s32.totalorder %s7837_s4, %s5462_s11  ;;  %p5469_p6 = scmp.lt.u32.totalorder %s5462_s11, %s7837_s4 }
  0x5f   : > { %p5465_p2 = pnand %p5463_p1, %p5743_p13 }
  0x61   : > { %p5466_p4 = pneg %p5465_p2 }
  0x63   : > { %p5471_p8 = pnand %p5469_p6, %p5466_p4 }
  0x65   : > { %5474 = shalt.err (!%p5471_p8)
}
  0x66   : > { %s5475_s19 = scalar_lea.vmem %s5788_s22, 8192  ;;  %p5483_p3 = scmp.lt.s32.totalorder %s5788_s22, %s5788_s22 }
  0x67   : > { %p5476_p9 = scmp.ne.s32.totalorder %s5788_s22, %s5475_s19  ;;  %p5484_p5 = scmp.lt.s32.totalorder %s5475_s19, %s5475_s19 }
  0x69   : > { %p5478_p12 = pnand %p5476_p9, %p5743_p13  ;;  %p5485_p7 = por %p5484_p5, %p5483_p3 }
  0x6b   : > { %p5479_p0 = pneg %p5478_p12 }
  0x6d   : > { %p5486_p10 = pnand %p5485_p7, %p5479_p0 }
  0x6f   : > { %5489 = shalt.err (!%p5486_p10)
}
  0x70   : > { %s8201_s13 = smov 512   ;;  %s5838_s12 = sadd.s32 1, %s5624_s27  }
  0x71   : > { %5281 = dma.hbm_to_vmem [thread:$0]  (!%p5729_p11), %s7837_s4, 8192, %s5788_s22, [#allocation11], %s8201_s13, %s8201_s13, %s5631_s15  }
  0x72   : > { %s31_s20 = ssub.s32 %s5624_s27, %s5838_s12  ;;  %s34_s21 = sadd.s32 1, %s5620_s26 }
  0x73   : > { %p32_p13 = scmp.eq.s32.totalorder %s31_s20, 0  ;;  %p41_p1 = scmp.ne.s32.totalorder %s5620_s26, %s5616_s25 }
  0x74   : > { %p42_p2 = scmp.eq.s32.totalorder %s5624_s27, 0  ;;  %p8202_p6 = scmp.eq.s32.totalorder %s5701_s28, 7 }
  0x75   : > { %s5847_s23 = scalar_select %p32_p13, %s5620_s26, %s34_s21  }
  0x76   : > { %p43_p4 = por %p42_p2, %p41_p1  ;;  %p5851_p8 = por %p8202_p6, %p41_p1 }
  0x77   : > { %p5294_p9 = scmp.lt.s32.totalorder %s5624_s27, 8  ;;  %s278_s16 = sand.u32 1, %s5620_s26  }
  0x78   : > { %s4362_s14 = sshll.u32 %s278_s16, 4  ;;  %s4387_s15 = sshll.u32 %s5624_s27, 8 }
  0x79   : > { %s5861_s19 = scalar_lea.hbm %s7833_s0, %s4387_s15  ;;  %s282_s13 = scalar_lea.vmem [#allocation4], %s4362_s14 }
  0x7a   : > { %s289_s18 = sshll.u32 %s282_s13, 4  ;;  %p5865_p11 = pnand %p5294_p9, %p43_p4  ;;  %s5863_s18 = int_to_ptr.vmem [resolvable:$true] %s289_s18 }
  0x7b   : > { %s5869_s20 = scalar_lea.sflag [#allocation5], %s278_s16  ;;  %s5490_s21 = scalar_lea.hbm %s5861_s19, 256 }
  0x7c   : > { %p5491_p12 = scmp.ne.s32.totalorder %s5861_s19, %s5490_s21  ;;  %p5492_p0 = pneg %p5865_p11 }
  0x7d   : > { %s5495_s22 = scalar_lea.hbm %s7833_s0, 2048  ;;  %p5496_p7 = scmp.lt.u32.totalorder %s5861_s19, %s7833_s0 }
  0x7e   : > { %p5493_p3 = pnand %p5492_p0, %p5491_p12  ;;  %p5497_p10 = scmp.lt.u32.totalorder %s5495_s22, %s5490_s21 }
  0x7f   : > { %p5499_p1 = scmp.lt.u32.totalorder %s5490_s21, %s5861_s19 }
  0x80   : > { %p5494_p5 = pneg %p5493_p3  ;;  %p5498_p13 = por %p5497_p10, %p5496_p7 }
  0x82   : > { %p5500_p2 = por %p5499_p1, %p5498_p13 }
  0x84   : > { %p5501_p4 = pnand %p5500_p2, %p5494_p5 }
  0x86   : > { %5504 = shalt.err (!%p5501_p4)
}
  0x87   : > { %s5505_s16 = scalar_lea.vmem %s5863_s18, 256  ;;  %s5634_s14 = smov [#allocation4]  }
  0x88   : > { %p5506_p6 = scmp.ne.s32.totalorder %s5863_s18, %s5505_s16  ;;  %s5510_s15 = sshll.u32 %s5634_s14, 4  ;;  %s5511_s15 = int_to_ptr.vmem [resolvable:$false] %s5510_s15 }
  0x89   : > { %s5512_s17 = scalar_lea.vmem %s5511_s15, 512  ;;  %p5513_p3 = scmp.lt.s32.totalorder %s5863_s18, %s5511_s15 }
  0x8a   : > { %p5508_p9 = pnand %p5506_p6, %p5492_p0  ;;  %p5514_p7 = scmp.lt.s32.totalorder %s5512_s17, %s5505_s16 }
  0x8c   : > { %p5509_p12 = pneg %p5508_p9  ;;  %p5515_p10 = por %p5514_p7, %p5513_p3 }
  0x8e   : > { %p5516_p13 = pnand %p5515_p10, %p5509_p12 }
  0x90   : > { %5519 = shalt.err (!%p5516_p13)
}
  0x91   : > { %5285 = dma.hbm_to_vmem [thread:$0]  (!%p5865_p11), %s5861_s19, 256, %s5863_s18, %s5869_s20, %s8200_s10, %s8200_s10, %s8199_s1  }
  0x92   : > { %p8205_p0 = scmp.ne.s32.totalorder %s8195_s9, 0 }
  0x94   : > { %301 = sbr.rel (%p8205_p0) target bundleno = 933 (0x3a5), region = 44 }
  0x9b   : > { %s5903_s21 = sand.u32 1, %s5616_s25   ;;  %p8206_p5 = scmp.ne.s32.totalorder %s8193_s30, 0 }
  0x9c   : > { %s4366_s22 = sshll.u32 %s5903_s21, 4  ;;  %s304_s13 = scalar_lea.sflag [#allocation5], %s5903_s21 }
  0x9d   : > { %s5907_s16 = scalar_lea.vmem [#allocation4], %s4366_s22 }
  0x9e   : > { %5591 = dma.done.wait (%p8206_p5), %s304_s13, 256  }
  0x9f   : > { %5593 = vsyncadd (%p8206_p5), %s304_s13, 4294967040  ;;  %p8207_p11 = scmp.eq.s32.totalorder %s5701_s28, 0 }
  0xa1   : > { %5595 = dma.done.wait (%p8207_p11), [#allocation8], 512   ;;  %p8208_p1 = pmov %p8207_p11 }
  0xa3   : > { %5597 = vsyncadd (%p8208_p1), [#allocation8], 4294966784  ;;  %p8209_p2 = pmov %p8208_p1 }
  0xa4   : > { %p8210_p4 = pmov %p8208_p1 }
  0xa5   : > { %5599 = dma.done.wait (%p8209_p2), [#allocation11], 16384  }
  0xa6   : > { %5601 = vsyncadd (%p8210_p4), [#allocation11], 4294950912  ;;  %s5921_s9 = scalar_lea.vmem [#allocation13], %s4366_s22  ;;  %p8211_p6 = scmp.ne.s32.totalorder %s5701_s28, 0 }
  0xa7   : > { %v358_v0 = vld [vmem:[#allocation7] sm:$0xff] (!%p8211_p6)  ;;  %v359_v1 = vld [vmem:[#allocation7 + $0x8] sm:$0xff] (!%p8211_p6)  ;;  %v362_v2 = vld [vmem:[#allocation9] sm:$0xff] (!%p8211_p6) }
  0xa8   : > { %357 = sbr.rel (%p8211_p6) target bundleno = 175 (0xaf), region = 68  ;;  %360 = vst [vmem:[#allocation2] sm:$0xff] (!%p8211_p6), %v358_v0  ;;  %361 = vst [vmem:[#allocation2 + $0x8] sm:$0xff] (!%p8211_p6), %v359_v1  ;;  %v363_v3 = vld [vmem:[#allocation9 + $0x8] sm:$0xff] (!%p8211_p6) }
  0xa9   : > { %364 = vst [vmem:[#allocation3] sm:$0xff] (!%p8211_p6), %v362_v2  ;;  %365 = vst [vmem:[#allocation3 + $0x8] sm:$0xff] (!%p8211_p6), %v363_v3 }
  0xaf PF: > { %v437_v4 = vld [vmem:[#allocation12 + $0x8] sm:$0xff]  ;;  %v439_v6 = vld [vmem:[#allocation12 + $0x18] sm:$0xff]  ;;  %v436_v11 = vld [vmem:[#allocation12] sm:$0xff]  ;;  %v7849_v13 = vmov 0.0   ;;  %p4379_p9 = scmp.ne.s32.totalorder %s5701_s28, 7 }
  0xb0   : > { %v441_v5 = vld [vmem:[#allocation12 + $0x28] sm:$0xff]  ;;  %v500_v7 = vand.u32 4294901760, %v437_v4  ;;  %v443_v9 = vld [vmem:[#allocation12 + $0x38] sm:$0xff]  ;;  %v1404_v10 = vand.u32 4294901760, %v439_v6  ;;  %v440_v12 = vld [vmem:[#allocation12 + $0x20] sm:$0xff]  ;;  %596 = vmatprep.mubr.f32.mxu0 %v7849_v13  ;;  %1500 = vmatprep.mubr.f32.mxu1 %v7849_v13  ;;  %v502_v15 = vand.u32 4294901760, %v436_v11 }
  0xb1   : > { %v504_v8 = vand.u32 4294901760, %v441_v5  ;;  %v1408_v14 = vand.u32 4294901760, %v443_v9  ;;  %v506_v16 = vand.u32 4294901760, %v440_v12  ;;  %v438_v17 = vld [vmem:[#allocation12 + $0x10] sm:$0xff]  ;;  %v445_v19 = vld [vmem:[#allocation12 + $0x48] sm:$0xff]  ;;  %v447_v25 = vld [vmem:[#allocation12 + $0x58] sm:$0xff] }
  0xb2   : > { %v442_v18 = vld [vmem:[#allocation12 + $0x30] sm:$0xff]  ;;  %v5929_v21 = vsub.f32 %v437_v4, %v500_v7  ;;  %v5933_v23 = vsub.f32 %v439_v6, %v1404_v10  ;;  %v449_v24 = vld [vmem:[#allocation12 + $0x68] sm:$0xff]  ;;  %v451_v26 = vld [vmem:[#allocation12 + $0x78] sm:$0xff]  ;;  %v5941_v30 = vsub.f32 %v436_v11, %v502_v15  ;;  %v1406_v33 = vand.u32 4294901760, %v438_v17 }
  0xb3   : > { %v5927_v20 = vpack.c.bf16 %v504_v8, %v500_v7  ;;  %v5931_v22 = vsub.f32 %v441_v5, %v504_v8  ;;  %v5935_v27 = vpack.c.bf16 %v1408_v14, %v1404_v10  ;;  %v5937_v28 = vsub.f32 %v443_v9, %v1408_v14  ;;  %v444_v31 = vld [vmem:[#allocation12 + $0x40] sm:$0xff]  ;;  %v446_v41 = vld [vmem:[#allocation12 + $0x50] sm:$0xff]  ;;  %v453_v47 = vld [vmem:[#allocation12 + $0x88] sm:$0xff] }
  0xb4   : > { %8213 = vst [vmem:[#allocation22_spill] sm:$0xff] %v5929_v21  ;;  %8215 = vst [vmem:[#allocation24_spill] sm:$0xff] %v5933_v23  ;;  %v5939_v29 = vpack.c.bf16 %v506_v16, %v502_v15  ;;  %v5944_v32 = vsub.f32 %v440_v12, %v506_v16  ;;  %v1410_v34 = vand.u32 4294901760, %v442_v18  ;;  %v508_v35 = vand.u32 4294901760, %v445_v19  ;;  %v448_v36 = vld [vmem:[#allocation12 + $0x60] sm:$0xff]  ;;  %v450_v42 = vld [vmem:[#allocation12 + $0x70] sm:$0xff] }
  0xb5   : > { %8212 = vst [vmem:[#allocation21_spill] sm:$0xff] %v5927_v20  ;;  %8214 = vst [vmem:[#allocation23_spill] sm:$0xff] %v5931_v22  ;;  %4390 = vmatprep.subr.bf16.mxu0 %v5927_v20  ;;  %4582 = vmatprep.subr.bf16.mxu1 %v5935_v27  ;;  %v512_v37 = vand.u32 4294901760, %v449_v24  ;;  %v1412_v38 = vand.u32 4294901760, %v447_v25  ;;  %v1416_v39 = vand.u32 4294901760, %v451_v26  ;;  %v510_v40 = vand.u32 4294901760, %v444_v31 }
  0xb6   : > { %8216 = vst [vmem:[#allocation25_spill] sm:$0xff] %v5935_v27  ;;  %8217 = vst [vmem:[#allocation26_spill] sm:$0xff] %v5937_v28  ;;  %4392 = vmatpush1.bf16.msra.mxu0 %v5939_v29  ;;  %v5948_v43 = vpack.c.bf16 %v1410_v34, %v1406_v33  ;;  %v5950_v44 = vsub.f32 %v438_v17, %v1406_v33  ;;  %v5952_v45 = vsub.f32 %v442_v18, %v1410_v34  ;;  %v457_v48 = vld [vmem:[#allocation12 + $0xa8] sm:$0xff]  ;;  %v455_v49 = vld [vmem:[#allocation12 + $0x98] sm:$0xff] }
  0xb7   : > { %8218 = vst [vmem:[#allocation27_spill] sm:$0xff] %v5939_v29  ;;  %8219 = vst [vmem:[#allocation28_spill] sm:$0xff] %v5941_v30  ;;  %v5954_v46 = vsub.f32 %v445_v19, %v508_v35  ;;  %v5956_v50 = vpack.c.bf16 %v512_v37, %v508_v35  ;;  %v5958_v51 = vsub.f32 %v449_v24, %v512_v37  ;;  %v459_v54 = vld [vmem:[#allocation12 + $0xb8] sm:$0xff]  ;;  %v514_v56 = vand.u32 4294901760, %v448_v36  ;;  %v452_v63 = vld [vmem:[#allocation12 + $0x80] sm:$0xff] }
  0xb8   : > { %8220 = vst [vmem:[#allocation29_spill] sm:$0xff] %v5944_v32  ;;  %8221 = vst [vmem:[#allocation30_spill] sm:$0xff] %v5948_v43  ;;  %v5960_v52 = vpack.c.bf16 %v1416_v39, %v1412_v38  ;;  %v5962_v53 = vsub.f32 %v447_v25, %v1412_v38  ;;  %4584 = vmatpush1.bf16.msra.mxu1 %v5948_v43  ;;  %v5965_v55 = vsub.f32 %v451_v26, %v1416_v39  ;;  %v456_v0 = vld [vmem:[#allocation12 + $0xa0] sm:$0xff]  ;;  %v454_v5 = vld [vmem:[#allocation12 + $0x90] sm:$0xff] }
  0xb9   : > { %8222 = vst [vmem:[#allocation31_spill] sm:$0xff] %v5950_v44  ;;  %8223 = vst [vmem:[#allocation32_spill] sm:$0xff] %v5952_v45  ;;  %v5967_v57 = vsub.f32 %v444_v31, %v510_v40  ;;  %v1414_v58 = vand.u32 4294901760, %v446_v41  ;;  %4394 = vmatprep.subr.bf16.mxu0 %v5956_v50  ;;  %v1418_v59 = vand.u32 4294901760, %v450_v42  ;;  %v516_v60 = vand.u32 4294901760, %v453_v47  ;;  %v458_v6 = vld [vmem:[#allocation12 + $0xb0] sm:$0xff] }
  0xba   : > { %8224 = vst [vmem:[#allocation33_spill] sm:$0xff] %v5956_v50  ;;  %8225 = vst [vmem:[#allocation34_spill] sm:$0xff] %v5960_v52  ;;  %4586 = vmatprep.subr.bf16.mxu1 %v5960_v52  ;;  %v520_v61 = vand.u32 4294901760, %v457_v48  ;;  %v1420_v62 = vand.u32 4294901760, %v455_v49  ;;  %v5971_v1 = vpack.c.bf16 %v514_v56, %v510_v40  ;;  %v5973_v2 = vsub.f32 %v448_v36, %v514_v56  ;;  %v461_v7 = vld [vmem:[#allocation12 + $0xc8] sm:$0xff]  ;;  %v463_v14 = vld [vmem:[#allocation12 + $0xd8] sm:$0xff] }
  0xbb   : > { %v5975_v3 = vsub.f32 %v446_v41, %v1414_v58  ;;  %v1424_v4 = vand.u32 4294901760, %v459_v54  ;;  %v5977_v8 = vpack.c.bf16 %v1418_v59, %v1414_v58  ;;  %v5979_v9 = vsub.f32 %v450_v42, %v1418_v59  ;;  %v465_v12 = vld [vmem:[#allocation12 + $0xe8] sm:$0xff]  ;;  %v467_v15 = vld [vmem:[#allocation12 + $0xf8] sm:$0xff]  ;;  %v460_v37 = vld [vmem:[#allocation12 + $0xc0] sm:$0xff] }
  0xbc   : > { %8226 = vst [vmem:[#allocation35_spill] sm:$0xff] %v5971_v1  ;;  %v5981_v10 = vpack.c.bf16 %v520_v61, %v516_v60  ;;  %v5983_v11 = vsub.f32 %v453_v47, %v516_v60  ;;  %4396 = vmatpush1.bf16.msra.mxu0 %v5971_v1  ;;  %v5986_v16 = vsub.f32 %v457_v48, %v520_v61  ;;  %v518_v24 = vand.u32 4294901760, %v452_v63  ;;  %v464_v42 = vld [vmem:[#allocation12 + $0xe0] sm:$0xff]  ;;  %v462_v47 = vld [vmem:[#allocation12 + $0xd0] sm:$0xff]  ;;  %v469_v59 = vld [vmem:[#allocation12 + $0x108] sm:$0xff] }
  0xbd   : > { %8227 = vst [vmem:[#allocation36_spill] sm:$0xff] %v5977_v8  ;;  %v5988_v17 = vpack.c.bf16 %v1424_v4, %v1420_v62  ;;  %v5990_v18 = vsub.f32 %v455_v49, %v1420_v62  ;;  %v5992_v19 = vsub.f32 %v459_v54, %v1424_v4  ;;  %4588 = vmatpush1.bf16.msra.mxu1 %v5977_v8  ;;  %v522_v25 = vand.u32 4294901760, %v456_v0  ;;  %v466_v48 = vld [vmem:[#allocation12 + $0xf0] sm:$0xff]  ;;  %v473_v60 = vld [vmem:[#allocation12 + $0x128] sm:$0xff]  ;;  %v471_v61 = vld [vmem:[#allocation12 + $0x118] sm:$0xff] }
  0xbe   : > { %8228 = vst [vmem:[#allocation37_spill] sm:$0xff] %v5981_v10  ;;  %4398 = vmatprep.subr.bf16.mxu0 %v5981_v10  ;;  %v1422_v26 = vand.u32 4294901760, %v454_v5  ;;  %v1426_v31 = vand.u32 4294901760, %v458_v6  ;;  %v524_v33 = vand.u32 4294901760, %v461_v7  ;;  %v528_v34 = vand.u32 4294901760, %v465_v12  ;;  %v472_v13 = vld [vmem:[#allocation12 + $0x120] sm:$0xff] }
  0xbf   : > { %8229 = vst [vmem:[#allocation38_spill] sm:$0xff] %v5988_v17  ;;  %4590 = vmatprep.subr.bf16.mxu1 %v5988_v17  ;;  %v1428_v35 = vand.u32 4294901760, %v463_v14  ;;  %v1432_v36 = vand.u32 4294901760, %v467_v15  ;;  %v5997_v38 = vpack.c.bf16 %v522_v25, %v518_v24  ;;  %v5999_v39 = vsub.f32 %v452_v63, %v518_v24  ;;  %v481_v17 = vld [vmem:[#allocation12 + $0x168] sm:$0xff]  ;;  %v479_v52 = vld [vmem:[#allocation12 + $0x158] sm:$0xff]  ;;  %v478_v50 = vld [vmem:[#allocation12 + $0x150] sm:$0xff] }
  0xc0   : > { %v6001_v40 = vsub.f32 %v456_v0, %v522_v25  ;;  %v6003_v41 = vpack.c.bf16 %v1426_v31, %v1422_v26  ;;  %v6005_v49 = vsub.f32 %v454_v5, %v1422_v26  ;;  %v6007_v54 = vsub.f32 %v458_v6, %v1426_v31  ;;  %v475_v25 = vld [vmem:[#allocation12 + $0x138] sm:$0xff]  ;;  %v482_v20 = vld [vmem:[#allocation12 + $0x170] sm:$0xff] }
  0xc1   : > { %8230 = vst [vmem:[#allocation39_spill] sm:$0xff] %v5997_v38  ;;  %v6009_v56 = vpack.c.bf16 %v528_v34, %v524_v33  ;;  %v6011_v58 = vsub.f32 %v461_v7, %v524_v33  ;;  %4400 = vmatpush1.bf16.msra.mxu0 %v5997_v38  ;;  %v6015_v62 = vsub.f32 %v465_v12, %v528_v34  ;;  %v526_v4 = vand.u32 4294901760, %v460_v37  ;;  %v468_v34 = vld [vmem:[#allocation12 + $0x100] sm:$0xff]  ;;  %v477_v38 = vld [vmem:[#allocation12 + $0x148] sm:$0xff] }
  0xc2   : > { %8231 = vst [vmem:[#allocation40_spill] sm:$0xff] %v6003_v41  ;;  %4592 = vmatpush1.bf16.msra.mxu1 %v6003_v41  ;;  %v6017_v63 = vpack.c.bf16 %v1432_v36, %v1428_v35  ;;  %v6019_v0 = vsub.f32 %v463_v14, %v1428_v35  ;;  %v6022_v5 = vsub.f32 %v467_v15, %v1432_v36  ;;  %v530_v6 = vand.u32 4294901760, %v464_v42  ;;  %v470_v14 = vld [vmem:[#allocation12 + $0x110] sm:$0xff] }
  0xc3   : > { %8232 = vst [vmem:[#allocation41_spill] sm:$0xff] %v6009_v56  ;;  %4402 = vmatprep.subr.bf16.mxu0 %v6009_v56  ;;  %v1430_v7 = vand.u32 4294901760, %v462_v47  ;;  %v1434_v24 = vand.u32 4294901760, %v466_v48  ;;  %v6025_v26 = vsub.f32 %v460_v37, %v526_v4  ;;  %v532_v31 = vand.u32 4294901760, %v469_v59  ;;  %v474_v56 = vld [vmem:[#allocation12 + $0x130] sm:$0xff] }
  0xc4   : > { %8233 = vst [vmem:[#allocation42_spill] sm:$0xff] %v6017_v63  ;;  %4594 = vmatprep.subr.bf16.mxu1 %v6017_v63  ;;  %v536_v12 = vand.u32 4294901760, %v473_v60  ;;  %v1436_v33 = vand.u32 4294901760, %v471_v61  ;;  %v6027_v35 = vpack.c.bf16 %v530_v6, %v526_v4  ;;  %v6029_v41 = vsub.f32 %v464_v42, %v530_v6 }
  0xc5   : > { %v6031_v15 = vpack.c.bf16 %v1434_v24, %v1430_v7  ;;  %v6033_v36 = vsub.f32 %v462_v47, %v1430_v7  ;;  %v6035_v63 = vsub.f32 %v466_v48, %v1434_v24  ;;  %v6039_v10 = vsub.f32 %v469_v59, %v532_v31  ;;  %v483_v59 = vld [vmem:[#allocation12 + $0x178] sm:$0xff] }
  0xc6   : > { %8234 = vst [vmem:[#allocation43_spill] sm:$0xff] %v6027_v35  ;;  %8235 = vst [vmem:[#allocation44_spill] sm:$0xff] %v6029_v41  ;;  %v6037_v37 = vpack.c.bf16 %v536_v12, %v532_v31  ;;  %v6041_v8 = vsub.f32 %v473_v60, %v536_v12  ;;  %4404 = vmatpush1.bf16.msra.mxu0 %v6027_v35  ;;  %v1440_v42 = vand.u32 4294901760, %v475_v25  ;;  %v534_v47 = vand.u32 4294901760, %v468_v34  ;;  %v480_v35 = vld [vmem:[#allocation12 + $0x160] sm:$0xff] }
  0xc7   : > { %8236 = vst [vmem:[#allocation45_spill] sm:$0xff] %v6031_v15  ;;  %8237 = vst [vmem:[#allocation46_spill] sm:$0xff] %v6033_v36  ;;  %4596 = vmatpush1.bf16.msra.mxu1 %v6031_v15  ;;  %v6045_v4 = vsub.f32 %v471_v61, %v1436_v33  ;;  %v538_v6 = vand.u32 4294901760, %v472_v13  ;;  %v1438_v7 = vand.u32 4294901760, %v470_v14  ;;  %v1442_v48 = vand.u32 4294901760, %v474_v56  ;;  %v476_v61 = vld [vmem:[#allocation12 + $0x140] sm:$0xff] }
  0xc8   : > { %8238 = vst [vmem:[#allocation47_spill] sm:$0xff] %v6035_v63  ;;  %8239 = vst [vmem:[#allocation48_spill] sm:$0xff] %v6037_v37  ;;  %4406 = vmatprep.subr.bf16.mxu0 %v6037_v37  ;;  %v540_v24 = vand.u32 4294901760, %v477_v38  ;;  %v544_v1 = vand.u32 4294901760, %v481_v17  ;;  %v6048_v31 = vpack.c.bf16 %v1440_v42, %v1436_v33  ;;  %v6050_v60 = vsub.f32 %v475_v25, %v1440_v42  ;;  %v485_v33 = vld [vmem:[#allocation12 + $0x188] sm:$0xff] }
  0xc9   : > { %8240 = vst [vmem:[#allocation49_spill] sm:$0xff] %v6039_v10  ;;  %8241 = vst [vmem:[#allocation50_spill] sm:$0xff] %v6041_v8  ;;  %v6052_v12 = vpack.c.bf16 %v538_v6, %v534_v47  ;;  %v6054_v15 = vsub.f32 %v468_v34, %v534_v47  ;;  %v6056_v43 = vsub.f32 %v472_v13, %v538_v6  ;;  %v1444_v13 = vand.u32 4294901760, %v479_v52 }
  0xca   : > { %8242 = vst [vmem:[#allocation51_spill] sm:$0xff] %v6045_v4  ;;  %8243 = vst [vmem:[#allocation52_spill] sm:$0xff] %v6048_v31  ;;  %v6058_v37 = vpack.c.bf16 %v1442_v48, %v1438_v7  ;;  %v6060_v29 = vsub.f32 %v470_v14, %v1438_v7  ;;  %v6062_v27 = vsub.f32 %v474_v56, %v1442_v48  ;;  %v489_v4 = vld [vmem:[#allocation12 + $0x1a8] sm:$0xff]  ;;  %4598 = vmatprep.subr.bf16.mxu1 %v6048_v31 }
  0xcb   : > { %8244 = vst [vmem:[#allocation53_spill] sm:$0xff] %v6050_v60  ;;  %8245 = vst [vmem:[#allocation54_spill] sm:$0xff] %v6052_v12  ;;  %4408 = vmatpush1.bf16.msra.mxu0 %v6052_v12  ;;  %v6066_v25 = vpack.c.bf16 %v544_v1, %v540_v24  ;;  %v6068_v34 = vsub.f32 %v477_v38, %v540_v24  ;;  %v6070_v42 = vsub.f32 %v481_v17, %v544_v1  ;;  %v497_v60 = vld [vmem:[#allocation12 + $0x1e8] sm:$0xff] }
  0xcc   : > { %8246 = vst [vmem:[#allocation55_spill] sm:$0xff] %v6054_v15  ;;  %8247 = vst [vmem:[#allocation56_spill] sm:$0xff] %v6056_v43  ;;  %4600 = vmatpush1.bf16.msra.mxu1 %v6058_v37  ;;  %v1448_v14 = vand.u32 4294901760, %v483_v59  ;;  %v542_v47 = vand.u32 4294901760, %v476_v61  ;;  %v546_v56 = vand.u32 4294901760, %v480_v35  ;;  %v1446_v6 = vand.u32 4294901760, %v478_v50 }
  0xcd   : > { %8248 = vst [vmem:[#allocation57_spill] sm:$0xff] %v6058_v37  ;;  %8249 = vst [vmem:[#allocation58_spill] sm:$0xff] %v6060_v29  ;;  %4410 = vmatprep.subr.bf16.mxu0 %v6066_v25  ;;  %v6074_v7 = vsub.f32 %v479_v52, %v1444_v13  ;;  %v1450_v48 = vand.u32 4294901760, %v482_v20  ;;  %v548_v31 = vand.u32 4294901760, %v485_v33  ;;  %v552_v12 = vand.u32 4294901760, %v489_v4  ;;  %v491_v29 = vld [vmem:[#allocation12 + $0x1b8] sm:$0xff] }
  0xce   : > { %8250 = vst [vmem:[#allocation59_spill] sm:$0xff] %v6062_v27  ;;  %8251 = vst [vmem:[#allocation60_spill] sm:$0xff] %v6066_v25  ;;  %v487_v27 = vld [vmem:[#allocation12 + $0x198] sm:$0xff]  ;;  %v6076_v38 = vpack.c.bf16 %v1448_v14, %v1444_v13  ;;  %v6078_v1 = vsub.f32 %v483_v59, %v1448_v14  ;;  %v6080_v17 = vpack.c.bf16 %v546_v56, %v542_v47  ;;  %v484_v37 = vld [vmem:[#allocation12 + $0x180] sm:$0xff] }
  0xcf   : > { %8252 = vst [vmem:[#allocation61_spill] sm:$0xff] %v6068_v34  ;;  %8253 = vst [vmem:[#allocation62_spill] sm:$0xff] %v6070_v42  ;;  %v6082_v24 = vsub.f32 %v476_v61, %v542_v47  ;;  %v488_v42 = vld [vmem:[#allocation12 + $0x1a0] sm:$0xff]  ;;  %v486_v34 = vld [vmem:[#allocation12 + $0x190] sm:$0xff]  ;;  %v6084_v43 = vsub.f32 %v480_v35, %v546_v56  ;;  %v6086_v52 = vpack.c.bf16 %v1450_v48, %v1446_v6  ;;  %v1452_v35 = vand.u32 4294901760, %v487_v27 }
  0xd0   : > { %8254 = vst [vmem:[#allocation63_spill] sm:$0xff] %v6074_v7  ;;  %8255 = vst [vmem:[#allocation64_spill] sm:$0xff] %v6076_v38  ;;  %v6088_v25 = vsub.f32 %v478_v50, %v1446_v6  ;;  %v6090_v7 = vsub.f32 %v482_v20, %v1450_v48  ;;  %v490_v15 = vld [vmem:[#allocation12 + $0x1b0] sm:$0xff]  ;;  %v493_v13 = vld [vmem:[#allocation12 + $0x1c8] sm:$0xff]  ;;  %4602 = vmatprep.subr.bf16.mxu1 %v6076_v38  ;;  %4412 = vmatpush1.bf16.msra.mxu0 %v6080_v17  ;;  %v1456_v50 = vand.u32 4294901760, %v491_v29 }
  0xd1   : > { %8256 = vst [vmem:[#allocation65_spill] sm:$0xff] %v6078_v1  ;;  %8257 = vst [vmem:[#allocation66_spill] sm:$0xff] %v6080_v17  ;;  %v6094_v59 = vpack.c.bf16 %v552_v12, %v548_v31  ;;  %v6096_v61 = vsub.f32 %v485_v33, %v548_v31  ;;  %v6098_v14 = vsub.f32 %v489_v4, %v552_v12  ;;  %4604 = vmatpush1.bf16.msra.mxu1 %v6086_v52 }
  0xd2   : > { %8258 = vst [vmem:[#allocation67_spill] sm:$0xff] %v6082_v24  ;;  %8259 = vst [vmem:[#allocation68_spill] sm:$0xff] %v6084_v43  ;;  %v550_v47 = vand.u32 4294901760, %v484_v37  ;;  %v554_v20 = vand.u32 4294901760, %v488_v42  ;;  %v1454_v56 = vand.u32 4294901760, %v486_v34  ;;  %v6102_v6 = vsub.f32 %v487_v27, %v1452_v35  ;;  %v498_v24 = vld [vmem:[#allocation12 + $0x1f0] sm:$0xff] }
  0xd3   : > { %8260 = vst [vmem:[#allocation69_spill] sm:$0xff] %v6086_v52  ;;  %8261 = vst [vmem:[#allocation70_spill] sm:$0xff] %v6088_v25  ;;  %4414 = vmatprep.subr.bf16.mxu0 %v6094_v59  ;;  %v1458_v48 = vand.u32 4294901760, %v490_v15  ;;  %v556_v38 = vand.u32 4294901760, %v493_v13  ;;  %v560_v17 = vand.u32 4294901760, %v497_v60  ;;  %v499_v25 = vld [vmem:[#allocation12 + $0x1f8] sm:$0xff]  ;;  %v6104_v31 = vpack.c.bf16 %v1456_v50, %v1452_v35 }
  0xd4   : > { %8262 = vst [vmem:[#allocation71_spill] sm:$0xff] %v6090_v7  ;;  %8263 = vst [vmem:[#allocation72_spill] sm:$0xff] %v6094_v59  ;;  %v495_v7 = vld [vmem:[#allocation12 + $0x1d8] sm:$0xff]  ;;  %v6106_v4 = vsub.f32 %v491_v29, %v1456_v50  ;;  %v6108_v12 = vpack.c.bf16 %v554_v20, %v550_v47  ;;  %v6110_v33 = vsub.f32 %v484_v37, %v550_v47  ;;  %v492_v52 = vld [vmem:[#allocation12 + $0x1c0] sm:$0xff] }
  0xd5   : > { %8264 = vst [vmem:[#allocation73_spill] sm:$0xff] %v6096_v61  ;;  %8265 = vst [vmem:[#allocation74_spill] sm:$0xff] %v6098_v14  ;;  %v496_v14 = vld [vmem:[#allocation12 + $0x1e0] sm:$0xff]  ;;  %v494_v61 = vld [vmem:[#allocation12 + $0x1d0] sm:$0xff]  ;;  %v6112_v43 = vsub.f32 %v488_v42, %v554_v20  ;;  %v6114_v27 = vpack.c.bf16 %v1458_v48, %v1454_v56  ;;  %v6116_v59 = vsub.f32 %v486_v34, %v1454_v56  ;;  %4606 = vmatprep.subr.bf16.mxu1 %v6104_v31 }
  0xd6   : > { %8266 = vst [vmem:[#allocation75_spill] sm:$0xff] %v6102_v6  ;;  %8267 = vst [vmem:[#allocation76_spill] sm:$0xff] %v6104_v31  ;;  %v6118_v6 = vsub.f32 %v490_v15, %v1458_v48  ;;  %4416 = vmatpush1.bf16.msra.mxu0 %v6108_v12  ;;  %v6122_v29 = vpack.c.bf16 %v560_v17, %v556_v38  ;;  %v6124_v37 = vsub.f32 %v493_v13, %v556_v38 }
  0xd7   : > { %8268 = vst [vmem:[#allocation77_spill] sm:$0xff] %v6108_v12  ;;  %8269 = vst [vmem:[#allocation78_spill] sm:$0xff] %v6114_v27  ;;  %v6126_v35 = vsub.f32 %v497_v60, %v560_v17  ;;  %v1460_v50 = vand.u32 4294901760, %v495_v7  ;;  %4608 = vmatpush1.bf16.msra.mxu1 %v6114_v27  ;;  %v1464_v42 = vand.u32 4294901760, %v499_v25  ;;  %v558_v47 = vand.u32 4294901760, %v492_v52  ;;  %v368_v27 = vld [vmem:[#allocation2] sm:$0xff] }
  0xd8   : > { %8270 = vst [vmem:[#allocation79_spill] sm:$0xff] %v6122_v29  ;;  %8271 = vst [vmem:[#allocation80_spill] sm:$0xff] %v6124_v37  ;;  %v562_v34 = vand.u32 4294901760, %v496_v14  ;;  %v1462_v20 = vand.u32 4294901760, %v494_v61  ;;  %4418 = vmatprep.subr.bf16.mxu0 %v6122_v29  ;;  %v1466_v56 = vand.u32 4294901760, %v498_v24  ;;  %v7927_v48 = vand.u32 4294901760, %v5929_v21 }
  0xd9   : > { %8272 = vst [vmem:[#allocation81_spill] sm:$0xff] %v6126_v35  ;;  %v6130_v15 = vsub.f32 %v495_v7, %v1460_v50  ;;  %v7926_v12 = vand.u32 4294901760, %v5931_v22  ;;  %v6134_v38 = vpack.c.bf16 %v1464_v42, %v1460_v50  ;;  %v6136_v60 = vsub.f32 %v499_v25, %v1464_v42 }
  0xda   : > { %v6138_v17 = vpack.c.bf16 %v562_v34, %v558_v47  ;;  %v6140_v13 = vsub.f32 %v492_v52, %v558_v47  ;;  %v6142_v31 = vsub.f32 %v496_v14, %v562_v34  ;;  %v6144_v35 = vpack.c.bf16 %v1466_v56, %v1462_v20 }
  0xdb   : > { %8273 = vst [vmem:[#allocation82_spill] sm:$0xff] %v6134_v38  ;;  %v6146_v7 = vsub.f32 %v494_v61, %v1462_v20  ;;  %v6148_v29 = vsub.f32 %v498_v24, %v1466_v56  ;;  %4610 = vmatprep.subr.bf16.mxu1 %v6134_v38  ;;  %v622_v25 = vsub.f32 %v5929_v21, %v7927_v48  ;;  %v7930_v14 = vand.u32 4294901760, %v5933_v23 }
  0xdc   : > { %8274 = vst [vmem:[#allocation83_spill] sm:$0xff] %v6138_v17  ;;  %8275 = vst [vmem:[#allocation84_spill] sm:$0xff] %v6142_v31  ;;  %4420 = vmatpush1.bf16.msra.mxu0 %v6138_v17  ;;  %v634_v52 = vsub.f32 %v5931_v22, %v7926_v12  ;;  %v7935_v50 = vand.u32 4294901760, %v5937_v28  ;;  %4612 = vmatpush1.bf16.msra.mxu1 %v6144_v35  ;;  %v6161_v24 = vand.u32 4294901760, %v368_v27  ;;  %v7942_v61 = vand.u32 4294901760, %v5941_v30 }
  0xdd   : > { %8276 = vst [vmem:[#allocation85_spill] sm:$0xff] %v6144_v35  ;;  %8277 = vst [vmem:[#allocation86_spill] sm:$0xff] %v6146_v7  ;;  %v7943_v42 = vand.u32 4294901760, %v5944_v32  ;;  %v7947_v47 = vand.u32 4294901760, %v5950_v44  ;;  %v623_v34 = vand.u32 4294901760, %v622_v25  ;;  %v1526_v56 = vsub.f32 %v5933_v23, %v7930_v14 }
  0xde   : > { %8278 = vst [vmem:[#allocation87_spill] sm:$0xff] %v6148_v29  ;;  %8279 = vst [vmem:[#allocation88_spill] sm:$0xff] %v6161_v24  ;;  %v635_v20 = vand.u32 4294901760, %v634_v52  ;;  %v1538_v12 = vsub.f32 %v5937_v28, %v7935_v50  ;;  %v6173_v48 = vsub.f32 %v368_v27, %v6161_v24  ;;  %v628_v35 = vsub.f32 %v5941_v30, %v7942_v61 }
  0xdf   : > { %v640_v25 = vsub.f32 %v5944_v32, %v7943_v42  ;;  %v1532_v52 = vsub.f32 %v5950_v44, %v7947_v47  ;;  %v1527_v17 = vand.u32 4294901760, %v1526_v56  ;;  %v7946_v50 = vand.u32 4294901760, %v5952_v45 }
  0xe0   : > { %8280 = vst [vmem:[#allocation89_spill] sm:$0xff] %v6173_v48  ;;  %v4421_v14 = vpack.c.bf16 %v635_v20, %v623_v34  ;;  %v1539_v38 = vand.u32 4294901760, %v1538_v12  ;;  %v6186_v27 = vand.u32 4294901760, %v6173_v48  ;;  %v629_v24 = vand.u32 4294901760, %v628_v35 }
  0xe1   : > { %v641_v28 = vand.u32 4294901760, %v640_v25  ;;  %v1533_v23 = vand.u32 4294901760, %v1532_v52  ;;  %v1544_v42 = vsub.f32 %v5952_v45, %v7946_v50  ;;  %v7949_v32 = vand.u32 4294901760, %v5954_v46 }
  0xe2   : > { %8281 = vst [vmem:[#allocation90_spill] sm:$0xff] %v6186_v27  ;;  %4422 = vmatprep.subr.bf16.mxu0 %v4421_v14  ;;  %v4613_v61 = vpack.c.bf16 %v1539_v38, %v1527_v17  ;;  %v7948_v34 = vand.u32 4294901760, %v5958_v51  ;;  %v600_v12 = vsub.f32 %v6173_v48, %v6186_v27  ;;  %v7950_v56 = vand.u32 4294901760, %v5962_v53 }
  0xe3   : > { %v4423_v20 = vpack.c.bf16 %v641_v28, %v629_v24  ;;  %v7953_v35 = vand.u32 4294901760, %v5965_v55  ;;  %v1545_v25 = vand.u32 4294901760, %v1544_v42  ;;  %v646_v38 = vsub.f32 %v5954_v46, %v7949_v32 }
  0xe4   : > { %4614 = vmatprep.subr.bf16.mxu1 %v4613_v61  ;;  %v658_v17 = vsub.f32 %v5958_v51, %v7948_v34  ;;  %v7954_v14 = vand.u32 4294901760, %v5967_v57  ;;  %v601_v52 = vand.u32 4294901760, %v600_v12  ;;  %v1550_v28 = vsub.f32 %v5962_v53, %v7950_v56 }
  0xe5   : > { %v1562_v24 = vsub.f32 %v5965_v55, %v7953_v35  ;;  %v7959_v61 = vand.u32 4294901760, %v5973_v2  ;;  %v4615_v42 = vpack.c.bf16 %v1545_v25, %v1533_v23  ;;  %v647_v50 = vand.u32 4294901760, %v646_v38 }
  0xe6   : > { %v659_v47 = vand.u32 4294901760, %v658_v17  ;;  %v652_v34 = vsub.f32 %v5967_v57, %v7954_v14  ;;  %602 = vmatmul.mubr.f32.vlgmr.msra.gmra.mrb[0].mxu0 %v601_v52  ;;  %1506 = vmatmul.mubr.f32.vlgmr.msra.gmra.mrb[0].mxu1 %v601_v52  ;;  %v1551_v12 = vand.u32 4294901760, %v1550_v28  ;;  %v7955_v27 = vand.u32 4294901760, %v5975_v3 }
  0xe7   : > { %v1563_v32 = vand.u32 4294901760, %v1562_v24  ;;  %v664_v56 = vsub.f32 %v5973_v2, %v7959_v61  ;;  %4424 = vmatpush1.bf16.msra.mxu0 %v4423_v20  ;;  %4616 = vmatpush1.bf16.msra.mxu1 %v4615_v42  ;;  %v7956_v25 = vand.u32 4294901760, %v5979_v9  ;;  %v7957_v38 = vand.u32 4294901760, %v5983_v11 }
  0xe8   : > { %v4425_v35 = vpack.c.bf16 %v659_v47, %v647_v50  ;;  %v653_v23 = vand.u32 4294901760, %v652_v34  ;;  %v1556_v52 = vsub.f32 %v5975_v3, %v7955_v27  ;;  %v7958_v28 = vand.u32 4294901760, %v5986_v16 }
  0xe9   : > { %v4617_v17 = vpack.c.bf16 %v1563_v32, %v1551_v12  ;;  %v665_v14 = vand.u32 4294901760, %v664_v56  ;;  %v8282_v24 = vmov 0.0   ;;  %v1568_v50 = vsub.f32 %v5979_v9, %v7956_v25 }
  0xea   : > { %607 = vmatprep.mubr.f32.mxu0 %v8282_v24  ;;  %1511 = vmatprep.mubr.f32.mxu1 %v8282_v24  ;;  %v670_v32 = vsub.f32 %v5983_v11, %v7957_v38  ;;  %v7960_v47 = vand.u32 4294901760, %v5990_v18  ;;  %v7971_v34 = vand.u32 4294901760, %v5992_v19  ;;  %v1557_v56 = vand.u32 4294901760, %v1556_v52 }
  0xeb   : > { %4426 = vmatprep.subr.bf16.mxu0 %v4425_v35  ;;  %4618 = vmatprep.subr.bf16.mxu1 %v4617_v17  ;;  %v4427_v20 = vpack.c.bf16 %v665_v14, %v653_v23  ;;  %v682_v42 = vsub.f32 %v5986_v16, %v7958_v28  ;;  %v7963_v35 = vand.u32 4294901760, %v5999_v39  ;;  %v1569_v12 = vand.u32 4294901760, %v1568_v50 }
  0xec   : > { %v671_v27 = vand.u32 4294901760, %v670_v32  ;;  %v1574_v25 = vsub.f32 %v5990_v18, %v7960_v47  ;;  %v1586_v38 = vsub.f32 %v5992_v19, %v7971_v34  ;;  %v7964_v23 = vand.u32 4294901760, %v6001_v40 }
  0xed   : > { %4428 = vmatpush1.bf16.msra.mxu0 %v4427_v20  ;;  %v683_v17 = vand.u32 4294901760, %v682_v42  ;;  %v676_v14 = vsub.f32 %v5999_v39, %v7963_v35  ;;  %v7968_v52 = vand.u32 4294901760, %v6005_v49  ;;  %v4619_v50 = vpack.c.bf16 %v1569_v12, %v1557_v56 }
  0xee   : > { %v1575_v32 = vand.u32 4294901760, %v1574_v25  ;;  %v1587_v28 = vand.u32 4294901760, %v1586_v38  ;;  %v7965_v61 = vand.u32 4294901760, %v6007_v54  ;;  %v688_v20 = vsub.f32 %v6001_v40, %v7964_v23 }
  0xef   : > { %v4429_v47 = vpack.c.bf16 %v683_v17, %v671_v27  ;;  %v677_v48 = vand.u32 4294901760, %v676_v14  ;;  %v1580_v42 = vsub.f32 %v6005_v49, %v7968_v52  ;;  %4620 = vmatpush1.bf16.msra.mxu1 %v4619_v50  ;;  %v7966_v25 = vand.u32 4294901760, %v6011_v58 }
  0xf0   : > { %v4621_v35 = vpack.c.bf16 %v1587_v28, %v1575_v32  ;;  %v1592_v56 = vsub.f32 %v6007_v54, %v7965_v61  ;;  %v7967_v38 = vand.u32 4294901760, %v6015_v62  ;;  %v689_v27 = vand.u32 4294901760, %v688_v20 }
  0xf1   : > { %4430 = vmatprep.subr.bf16.mxu0 %v4429_v47  ;;  %v1581_v12 = vand.u32 4294901760, %v1580_v42  ;;  %v7969_v17 = vand.u32 4294901760, %v6019_v0  ;;  %v7970_v14 = vand.u32 4294901760, %v6022_v5  ;;  %v694_v28 = vsub.f32 %v6011_v58, %v7966_v25 }
  0xf2   : > { %4622 = vmatprep.subr.bf16.mxu1 %v4621_v35  ;;  %v1593_v23 = vand.u32 4294901760, %v1592_v56  ;;  %v706_v50 = vsub.f32 %v6015_v62, %v7967_v38  ;;  %v7974_v32 = vand.u32 4294901760, %v6025_v26  ;;  %v4431_v61 = vpack.c.bf16 %v689_v27, %v677_v48 }
  0xf3   : > { %v1598_v47 = vsub.f32 %v6019_v0, %v7969_v17  ;;  %v1610_v35 = vsub.f32 %v6022_v5, %v7970_v14  ;;  %v7973_v20 = vand.u32 4294901760, %v6029_v41  ;;  %v695_v56 = vand.u32 4294901760, %v694_v28 }
  0xf4   : > { %v4623_v42 = vpack.c.bf16 %v1593_v23, %v1581_v12  ;;  %v707_v25 = vand.u32 4294901760, %v706_v50  ;;  %v700_v38 = vsub.f32 %v6025_v26, %v7974_v32  ;;  %4432 = vmatpush1.bf16.msra.mxu0 %v4431_v61  ;;  %v7972_v17 = vand.u32 4294901760, %v6033_v36 }
  0xf5   : > { %v1599_v52 = vand.u32 4294901760, %v1598_v47  ;;  %v1611_v48 = vand.u32 4294901760, %v1610_v35  ;;  %v712_v27 = vsub.f32 %v6029_v41, %v7973_v20  ;;  %v7977_v23 = vand.u32 4294901760, %v6035_v63 }
  0xf6   : > { %4624 = vmatpush1.bf16.msra.mxu1 %v4623_v42  ;;  %v4433_v14 = vpack.c.bf16 %v707_v25, %v695_v56  ;;  %v701_v34 = vand.u32 4294901760, %v700_v38  ;;  %v7978_v12 = vand.u32 4294901760, %v6039_v10  ;;  %v1604_v61 = vsub.f32 %v6033_v36, %v7972_v17  ;;  %v8283_v38 = vld [vmem:[#allocation51_spill] sm:$0xff]  ;;  %v8284_v56 = vld [vmem:[#allocation53_spill] sm:$0xff] }
  0xf7   : > { %v4625_v28 = vpack.c.bf16 %v1611_v48, %v1599_v52  ;;  %v713_v50 = vand.u32 4294901760, %v712_v27  ;;  %v7979_v47 = vand.u32 4294901760, %v6041_v8  ;;  %v1616_v35 = vsub.f32 %v6035_v63, %v7977_v23  ;;  %v8288_v63 = vld [vmem:[#allocation59_spill] sm:$0xff] }
  0xf8   : > { %4434 = vmatprep.subr.bf16.mxu0 %v4433_v14  ;;  %v718_v25 = vsub.f32 %v6039_v10, %v7978_v12  ;;  %v7988_v42 = vand.u32 4294901760, %v8283_v38  ;;  %v7991_v52 = vand.u32 4294901760, %v8284_v56  ;;  %v1605_v27 = vand.u32 4294901760, %v1604_v61  ;;  %v8285_v14 = vld [vmem:[#allocation55_spill] sm:$0xff] }
  0xf9   : > { %4626 = vmatprep.subr.bf16.mxu1 %v4625_v28  ;;  %v4435_v48 = vpack.c.bf16 %v713_v50, %v701_v34  ;;  %v730_v17 = vsub.f32 %v6041_v8, %v7979_v47  ;;  %v7990_v20 = vand.u32 4294901760, %v8285_v14  ;;  %v1617_v32 = vand.u32 4294901760, %v1616_v35  ;;  %v8286_v50 = vld [vmem:[#allocation56_spill] sm:$0xff]  ;;  %v8287_v47 = vld [vmem:[#allocation58_spill] sm:$0xff] }
  0xfa   : > { %v719_v36 = vand.u32 4294901760, %v718_v25  ;;  %v1622_v23 = vsub.f32 %v8283_v38, %v7988_v42  ;;  %v1634_v12 = vsub.f32 %v8284_v56, %v7991_v52  ;;  %v7993_v61 = vand.u32 4294901760, %v8286_v50 }
  0xfb   : > { %4436 = vmatpush1.bf16.msra.mxu0 %v4435_v48  ;;  %v731_v28 = vand.u32 4294901760, %v730_v17  ;;  %v724_v34 = vsub.f32 %v8285_v14, %v7990_v20  ;;  %v7996_v8 = vand.u32 4294901760, %v8287_v47  ;;  %v4627_v35 = vpack.c.bf16 %v1617_v32, %v1605_v27  ;;  %v8290_v27 = vld [vmem:[#allocation62_spill] sm:$0xff] }
  0xfc   : > { %v1623_v25 = vand.u32 4294901760, %v1622_v23  ;;  %v1635_v10 = vand.u32 4294901760, %v1634_v12  ;;  %v7995_v41 = vand.u32 4294901760, %v8288_v63  ;;  %v736_v48 = vsub.f32 %v8286_v50, %v7993_v61  ;;  %v8289_v23 = vld [vmem:[#allocation61_spill] sm:$0xff] }
  0xfd   : > { %v4437_v42 = vpack.c.bf16 %v731_v28, %v719_v36  ;;  %v725_v38 = vand.u32 4294901760, %v724_v34  ;;  %v1628_v17 = vsub.f32 %v8287_v47, %v7996_v8  ;;  %4628 = vmatpush1.bf16.msra.mxu1 %v4627_v35  ;;  %v7998_v12 = vand.u32 4294901760, %v8289_v23  ;;  %v8291_v34 = vld [vmem:[#allocation63_spill] sm:$0xff] }
  0xfe   : > { %v4629_v20 = vpack.c.bf16 %v1635_v10, %v1623_v25  ;;  %v1640_v32 = vsub.f32 %v8288_v63, %v7995_v41  ;;  %v7999_v52 = vand.u32 4294901760, %v8290_v27  ;;  %v737_v36 = vand.u32 4294901760, %v736_v48  ;;  %v8292_v25 = vld [vmem:[#allocation67_spill] sm:$0xff]  ;;  %v8293_v48 = vld [vmem:[#allocation68_spill] sm:$0xff] }
  0xff   : > { %4438 = vmatprep.subr.bf16.mxu0 %v4437_v42  ;;  %v1629_v28 = vand.u32 4294901760, %v1628_v17  ;;  %v8001_v14 = vand.u32 4294901760, %v8291_v34  ;;  %v8003_v61 = vand.u32 4294901760, %v6078_v1  ;;  %v742_v10 = vsub.f32 %v8289_v23, %v7998_v12  ;;  %v8295_v23 = vld [vmem:[#allocation71_spill] sm:$0xff] }
 0x100   : > { %4630 = vmatprep.subr.bf16.mxu1 %v4629_v20  ;;  %v1641_v50 = vand.u32 4294901760, %v1640_v32  ;;  %v754_v35 = vsub.f32 %v8290_v27, %v7999_v52  ;;  %v8010_v41 = vand.u32 4294901760, %v8292_v25  ;;  %v4439_v8 = vpack.c.bf16 %v737_v36, %v725_v38 }
 0x101   : > { %v1646_v42 = vsub.f32 %v8291_v34, %v8001_v14  ;;  %v1658_v20 = vsub.f32 %v6078_v1, %v8003_v61  ;;  %v8008_v17 = vand.u32 4294901760, %v8293_v48  ;;  %v743_v63 = vand.u32 4294901760, %v742_v10  ;;  %v8294_v14 = vld [vmem:[#allocation70_spill] sm:$0xff] }
 0x102   : > { %v4631_v32 = vpack.c.bf16 %v1641_v50, %v1629_v28  ;;  %v755_v12 = vand.u32 4294901760, %v754_v35  ;;  %v748_v52 = vsub.f32 %v8292_v25, %v8010_v41  ;;  %4440 = vmatpush1.bf16.msra.mxu0 %v4439_v8  ;;  %v8009_v34 = vand.u32 4294901760, %v8294_v14  ;;  %v8296_v28 = vld [vmem:[#allocation73_spill] sm:$0xff] }
 0x103   : > { %v1647_v27 = vand.u32 4294901760, %v1646_v42  ;;  %v1659_v38 = vand.u32 4294901760, %v1658_v20  ;;  %v760_v36 = vsub.f32 %v8293_v48, %v8008_v17  ;;  %v8011_v50 = vand.u32 4294901760, %v8295_v23  ;;  %v8297_v42 = vld [vmem:[#allocation74_spill] sm:$0xff] }
 0x104   : > { %4632 = vmatpush1.bf16.msra.mxu1 %v4631_v32  ;;  %v4441_v61 = vpack.c.bf16 %v755_v12, %v743_v63  ;;  %v749_v1 = vand.u32 4294901760, %v748_v52  ;;  %v8012_v10 = vand.u32 4294901760, %v8296_v28  ;;  %v1652_v8 = vsub.f32 %v8294_v14, %v8009_v34  ;;  %v8298_v52 = vld [vmem:[#allocation75_spill] sm:$0xff] }
 0x105   : > { %v4633_v35 = vpack.c.bf16 %v1659_v38, %v1647_v27  ;;  %v761_v47 = vand.u32 4294901760, %v760_v36  ;;  %v8013_v20 = vand.u32 4294901760, %v8297_v42  ;;  %v1664_v17 = vsub.f32 %v8295_v23, %v8011_v50 }
 0x106   : > { %4442 = vmatprep.subr.bf16.mxu0 %v4441_v61  ;;  %v766_v63 = vsub.f32 %v8296_v28, %v8012_v10  ;;  %v8015_v12 = vand.u32 4294901760, %v8298_v52  ;;  %v8018_v27 = vand.u32 4294901760, %v6106_v4  ;;  %v1653_v38 = vand.u32 4294901760, %v1652_v8 }
 0x107   : > { %4634 = vmatprep.subr.bf16.mxu1 %v4633_v35  ;;  %v4443_v32 = vpack.c.bf16 %v761_v47, %v749_v1  ;;  %v778_v36 = vsub.f32 %v8297_v42, %v8013_v20  ;;  %v8017_v61 = vand.u32 4294901760, %v6110_v33  ;;  %v1665_v34 = vand.u32 4294901760, %v1664_v17 }
 0x108   : > { %v767_v41 = vand.u32 4294901760, %v766_v63  ;;  %v1670_v50 = vsub.f32 %v8298_v52, %v8015_v12  ;;  %v1682_v10 = vsub.f32 %v6106_v4, %v8018_v27  ;;  %v8019_v47 = vand.u32 4294901760, %v6112_v43 }
 0x109   : > { %4444 = vmatpush1.bf16.msra.mxu0 %v4443_v32  ;;  %v779_v35 = vand.u32 4294901760, %v778_v36  ;;  %v772_v1 = vsub.f32 %v6110_v33, %v8017_v61  ;;  %v8020_v8 = vand.u32 4294901760, %v6116_v59  ;;  %v4635_v17 = vpack.c.bf16 %v1665_v34, %v1653_v38  ;;  %v369_v61 = vld [vmem:[#allocation2 + $0x8] sm:$0xff] }
 0x10a   : > { %v1671_v63 = vand.u32 4294901760, %v1670_v50  ;;  %v1683_v20 = vand.u32 4294901760, %v1682_v10  ;;  %v8021_v42 = vand.u32 4294901760, %v6118_v6  ;;  %v784_v32 = vsub.f32 %v6112_v43, %v8019_v47  ;;  %v8299_v10 = vld [vmem:[#allocation81_spill] sm:$0xff] }
 0x10b   : > { %v4445_v12 = vpack.c.bf16 %v779_v35, %v767_v41  ;;  %v773_v52 = vand.u32 4294901760, %v772_v1  ;;  %v1676_v36 = vsub.f32 %v6116_v59, %v8020_v8  ;;  %4636 = vmatpush1.bf16.msra.mxu1 %v4635_v17  ;;  %v8022_v50 = vand.u32 4294901760, %v6124_v37 }
 0x10c   : > { %v4637_v27 = vpack.c.bf16 %v1683_v20, %v1671_v63  ;;  %v1688_v34 = vsub.f32 %v6118_v6, %v8021_v42  ;;  %v8025_v41 = vand.u32 4294901760, %v8299_v10  ;;  %v785_v38 = vand.u32 4294901760, %v784_v32 }
 0x10d   : > { %4446 = vmatprep.subr.bf16.mxu0 %v4445_v12  ;;  %v1677_v35 = vand.u32 4294901760, %v1676_v36  ;;  %v8027_v1 = vand.u32 4294901760, %v6130_v15  ;;  %v8028_v47 = vand.u32 4294901760, %v6136_v60  ;;  %v790_v20 = vsub.f32 %v6124_v37, %v8022_v50 }
 0x10e   : > { %4638 = vmatprep.subr.bf16.mxu1 %v4637_v27  ;;  %v1689_v8 = vand.u32 4294901760, %v1688_v34  ;;  %v802_v17 = vsub.f32 %v8299_v10, %v8025_v41  ;;  %v6397_v63 = vand.u32 4294901760, %v369_v61  ;;  %v4447_v42 = vpack.c.bf16 %v785_v38, %v773_v52 }
 0x10f   : > { %v1694_v12 = vsub.f32 %v6130_v15, %v8027_v1  ;;  %v1706_v27 = vsub.f32 %v6136_v60, %v8028_v47  ;;  %v8030_v32 = vand.u32 4294901760, %v6140_v13  ;;  %v791_v34 = vand.u32 4294901760, %v790_v20 }
 0x110   : > { %8300 = vst [vmem:[#allocation53_spill] sm:$0xff] %v6397_v63  ;;  %v4639_v36 = vpack.c.bf16 %v1689_v8, %v1677_v35  ;;  %v803_v50 = vand.u32 4294901760, %v802_v17  ;;  %v6407_v37 = vsub.f32 %v369_v61, %v6397_v63  ;;  %4448 = vmatpush1.bf16.msra.mxu0 %v4447_v42  ;;  %v8029_v38 = vand.u32 4294901760, %v6142_v31 }
 0x111   : > { %v1695_v41 = vand.u32 4294901760, %v1694_v12  ;;  %v1707_v10 = vand.u32 4294901760, %v1706_v27  ;;  %v796_v52 = vsub.f32 %v6140_v13, %v8030_v32  ;;  %v8034_v8 = vand.u32 4294901760, %v6146_v7 }
 0x112   : > { %8301 = vst [vmem:[#allocation67_spill] sm:$0xff] %v6407_v37  ;;  %4640 = vmatpush1.bf16.msra.mxu1 %v4639_v36  ;;  %v4449_v1 = vpack.c.bf16 %v803_v50, %v791_v34  ;;  %v6414_v47 = vand.u32 4294901760, %v6407_v37  ;;  %v8033_v35 = vand.u32 4294901760, %v6148_v29  ;;  %v808_v42 = vsub.f32 %v6142_v31, %v8029_v38  ;;  %v8304_v38 = vld [vmem:[#allocation26_spill] sm:$0xff] }
 0x113   : > { %v4641_v61 = vpack.c.bf16 %v1707_v10, %v1695_v41  ;;  %v797_v20 = vand.u32 4294901760, %v796_v52  ;;  %v1700_v50 = vsub.f32 %v6146_v7, %v8034_v8  ;;  %v4453_v34 = vpack.c.bf16 %v5931_v22, %v5929_v21  ;;  %v8303_v52 = vld [vmem:[#allocation24_spill] sm:$0xff] }
 0x114   : > { %8302 = vst [vmem:[#allocation68_spill] sm:$0xff] %v6414_v47  ;;  %4450 = vmatprep.subr.bf16.mxu0 %v4449_v1  ;;  %v611_v17 = vsub.f32 %v6407_v37, %v6414_v47  ;;  %v1712_v12 = vsub.f32 %v6148_v29, %v8033_v35  ;;  %v809_v27 = vand.u32 4294901760, %v808_v42  ;;  %v4645_v32 = vpack.c.bf16 %v8304_v38, %v8303_v52  ;;  %v8305_v35 = vld [vmem:[#allocation29_spill] sm:$0xff] }
 0x115   : > { %4642 = vmatprep.subr.bf16.mxu1 %v4641_v61  ;;  %v1701_v41 = vand.u32 4294901760, %v1700_v50  ;;  %v4455_v61 = vpack.c.bf16 %v8305_v35, %v5941_v30  ;;  %v4647_v42 = vpack.c.bf16 %v5952_v45, %v5950_v44  ;;  %v8306_v50 = vld [vmem:[#allocation88_spill] sm:$0xff]  ;;  %v8311_v45 = vld [vmem:[#allocation50_spill] sm:$0xff]  ;;  %v8312_v35 = vld [vmem:[#allocation51_spill] sm:$0xff]  ;;  %v8313_v30 = vand.u32 4294901760, %v5954_v46 }
 0x116   : > { %v612_v10 = vand.u32 4294901760, %v611_v17  ;;  %v1713_v36 = vand.u32 4294901760, %v1712_v12  ;;  %v4451_v1 = vpack.c.bf16 %v809_v27, %v797_v20  ;;  %v4457_v20 = vpack.c.bf16 %v5958_v51, %v5954_v46 }
 0x117   : > { %v4649_v17 = vpack.c.bf16 %v5965_v55, %v5962_v53  ;;  %v4651_v12 = vpack.c.bf16 %v5979_v9, %v5975_v3  ;;  %v4461_v27 = vpack.c.bf16 %v5986_v16, %v5983_v11  ;;  %v8314_v38 = vand.u32 4294901760, %v5958_v51 }
 0x118   : > { %613 = vmatmul.mubr.f32.gmra.mrb[2].mxu0 %v612_v10  ;;  %1517 = vmatmul.mubr.f32.gmra.mrb[2].mxu1 %v612_v10  ;;  %v4643_v47 = vpack.c.bf16 %v1713_v36, %v1701_v41  ;;  %v4463_v10 = vpack.c.bf16 %v6001_v40, %v5999_v39  ;;  %v4655_v41 = vpack.c.bf16 %v6007_v54, %v6005_v49  ;;  %v8315_v22 = vand.u32 4294901760, %v5962_v53 }
 0x119   : > { %4452 = vmatpush1.bf16.msra.mxu0 %v4451_v1  ;;  %843 = vmatprep.mubr.f32.mxu0 %v8282_v24  ;;  %v4465_v36 = vpack.c.bf16 %v6015_v62, %v6011_v58  ;;  %v8307_v1 = vld [vmem:[#allocation44_spill] sm:$0xff]  ;;  %v6477_v52 = vpack.c.bf16 %v8314_v38, %v8313_v30  ;;  %v8316_v21 = vand.u32 4294901760, %v5965_v55  ;;  %v8317_v29 = vand.u32 4294901760, %v5967_v57 }
 0x11a   : > { %4644 = vmatpush1.bf16.msra.mxu1 %v4643_v47  ;;  %4454 = vmatprep.subr.bf16.mxu0 %v4453_v34  ;;  %v4459_v47 = vpack.c.bf16 %v5973_v2, %v5967_v57  ;;  %v4657_v34 = vpack.c.bf16 %v6022_v5, %v6019_v0  ;;  %v8318_v7 = vand.u32 4294901760, %v5973_v2  ;;  %v8319_v46 = vand.u32 4294901760, %v5975_v3 }
 0x11b   : > { %1747 = vmatprep.mubr.f32.mxu1 %v8282_v24  ;;  %4646 = vmatprep.subr.bf16.mxu1 %v4645_v32  ;;  %v4653_v32 = vpack.c.bf16 %v5992_v19, %v5990_v18  ;;  %v6483_v37 = vpack.c.bf16 %v8316_v21, %v8315_v22  ;;  %v8320_v51 = vand.u32 4294901760, %v5979_v9  ;;  %v8321_v53 = vand.u32 4294901760, %v5983_v11 }
 0x11c   : > { %845 = vmatmul.mubr.f32.vlgmr.msra.gmra.mrb[0].mxu0 %v8306_v50  ;;  %v6489_v31 = vpack.c.bf16 %v8318_v7, %v8317_v29  ;;  %v8322_v55 = vand.u32 4294901760, %v5986_v16  ;;  %v8323_v22 = vand.u32 4294901760, %v5990_v18  ;;  %v8324_v57 = vand.u32 4294901760, %v5992_v19 }
 0x11d   : > { %4456 = vmatpush1.bf16.msra.mxu0 %v4455_v61  ;;  %1749 = vmatmul.mubr.f32.vlgmr.msra.gmra.mrb[0].mxu1 %v8306_v50  ;;  %v4467_v61 = vpack.c.bf16 %v8307_v1, %v6025_v26  ;;  %v8310_v50 = vld [vmem:[#allocation49_spill] sm:$0xff]  ;;  %v6495_v30 = vpack.c.bf16 %v8320_v51, %v8319_v46  ;;  %v8325_v3 = vand.u32 4294901760, %v5999_v39  ;;  %v8326_v9 = vand.u32 4294901760, %v6001_v40  ;;  %v8341_v51 = vld [vmem:[#allocation55_spill] sm:$0xff] }
 0x11e   : > { %4648 = vmatpush1.bf16.msra.mxu1 %v4647_v42  ;;  %4458 = vmatprep.subr.bf16.mxu0 %v4457_v20  ;;  %v8308_v42 = vld [vmem:[#allocation46_spill] sm:$0xff]  ;;  %v8309_v20 = vld [vmem:[#allocation47_spill] sm:$0xff]  ;;  %v4469_v44 = vpack.c.bf16 %v8311_v45, %v8310_v50  ;;  %v6501_v21 = vpack.c.bf16 %v8322_v55, %v8321_v53  ;;  %v6507_v2 = vpack.c.bf16 %v8324_v57, %v8323_v22  ;;  %v8327_v11 = vand.u32 4294901760, %v6005_v49 }
 0x11f   : > { %4650 = vmatprep.subr.bf16.mxu1 %v4649_v17  ;;  %850 = vmatprep.mubr.f32.mxu0 %v8282_v24  ;;  %v4659_v8 = vpack.c.bf16 %v8309_v20, %v8308_v42  ;;  %v4661_v17 = vpack.c.bf16 %v8284_v56, %v8312_v35  ;;  %v6514_v29 = vpack.c.bf16 %v8326_v9, %v8325_v3  ;;  %v8328_v16 = vand.u32 4294901760, %v6007_v54  ;;  %v8345_v22 = vld [vmem:[#allocation58_spill] sm:$0xff]  ;;  %v8349_v9 = vld [vmem:[#allocation61_spill] sm:$0xff] }
 0x120   : > { %1754 = vmatprep.mubr.f32.mxu1 %v8282_v24  ;;  %852 = vmatmul.mubr.f32.gmra.mrb[2].mxu0 %v6397_v63  ;;  %v8329_v18 = vand.u32 4294901760, %v6011_v58  ;;  %v8330_v19 = vand.u32 4294901760, %v6015_v62  ;;  %v8331_v39 = vand.u32 4294901760, %v6019_v0  ;;  %v8332_v40 = vand.u32 4294901760, %v6022_v5 }
 0x121   : > { %4460 = vmatpush1.bf16.msra.mxu0 %v4459_v47  ;;  %1756 = vmatmul.mubr.f32.gmra.mrb[2].mxu1 %v6397_v63  ;;  %v6520_v7 = vpack.c.bf16 %v8328_v16, %v8327_v11  ;;  %v8333_v49 = vand.u32 4294901760, %v6025_v26  ;;  %v8334_v54 = vand.u32 4294901760, %v8307_v1  ;;  %v8335_v58 = vand.u32 4294901760, %v8308_v42  ;;  %v8343_v42 = vld [vmem:[#allocation56_spill] sm:$0xff]  ;;  %v8351_v11 = vld [vmem:[#allocation62_spill] sm:$0xff] }
 0x122   : > { %4652 = vmatpush1.bf16.msra.mxu1 %v4651_v12  ;;  %4462 = vmatprep.subr.bf16.mxu0 %v4461_v27  ;;  %v6526_v38 = vpack.c.bf16 %v8330_v19, %v8329_v18  ;;  %v6533_v47 = vpack.c.bf16 %v8332_v40, %v8331_v39  ;;  %v8336_v62 = vand.u32 4294901760, %v8309_v20  ;;  %v8338_v0 = vand.u32 4294901760, %v8311_v45  ;;  %v8355_v19 = vld [vmem:[#allocation65_spill] sm:$0xff] }
 0x123   : > { %4654 = vmatprep.subr.bf16.mxu1 %v4653_v32  ;;  %986 = vmatprep.mubr.f32.mxu0 %v8282_v24  ;;  %v6539_v12 = vpack.c.bf16 %v8334_v54, %v8333_v49  ;;  %v8337_v32 = vand.u32 4294901760, %v8310_v50  ;;  %v8339_v5 = vand.u32 4294901760, %v8312_v35  ;;  %v8340_v26 = vand.u32 4294901760, %v8284_v56  ;;  %v8347_v50 = vld [vmem:[#allocation59_spill] sm:$0xff] }
 0x124   : > { %1890 = vmatprep.mubr.f32.mxu1 %v8282_v24  ;;  %v6545_v27 = vpack.c.bf16 %v8336_v62, %v8335_v58  ;;  %v8342_v53 = vand.u32 4294901760, %v8341_v51  ;;  %v8344_v55 = vand.u32 4294901760, %v8343_v42  ;;  %v8346_v57 = vand.u32 4294901760, %v8345_v22  ;;  %v8353_v56 = vld [vmem:[#allocation63_spill] sm:$0xff] }
 0x125   : > { %v6551_v46 = vpack.c.bf16 %v8338_v0, %v8337_v32  ;;  %4464 = vmatpush1.bf16.msra.mxu0 %v4463_v10  ;;  %v6557_v1 = vpack.c.bf16 %v8340_v26, %v8339_v5  ;;  %v8348_v3 = vand.u32 4294901760, %v8347_v50  ;;  %v8350_v10 = vand.u32 4294901760, %v8349_v9 }
 0x126   : > { %v6563_v20 = vpack.c.bf16 %v8344_v55, %v8342_v53  ;;  %v8352_v35 = vand.u32 4294901760, %v8351_v11  ;;  %4656 = vmatpush1.bf16.msra.mxu1 %v4655_v41  ;;  %4466 = vmatprep.subr.bf16.mxu0 %v4465_v36  ;;  %v8354_v18 = vand.u32 4294901760, %v8353_v56  ;;  %v8356_v39 = vand.u32 4294901760, %v8355_v19  ;;  %v8363_v36 = vld [vmem:[#allocation74_spill] sm:$0xff]  ;;  %v8366_v53 = vld [vmem:[#allocation75_spill] sm:$0xff] }
 0x127   : > { %v6569_v45 = vpack.c.bf16 %v8348_v3, %v8346_v57  ;;  %v8357_v49 = vand.u32 4294901760, %v8292_v25  ;;  %v8358_v54 = vand.u32 4294901760, %v8293_v48  ;;  %v8359_v62 = vand.u32 4294901760, %v8294_v14  ;;  %4658 = vmatprep.subr.bf16.mxu1 %v4657_v34 }
 0x128   : > { %v6575_v16 = vpack.c.bf16 %v8352_v35, %v8350_v10  ;;  %v6581_v40 = vpack.c.bf16 %v8356_v39, %v8354_v18  ;;  %v8360_v32 = vand.u32 4294901760, %v8295_v23  ;;  %v8362_v41 = vand.u32 4294901760, %v8296_v28 }
 0x129   : > { %v6587_v58 = vpack.c.bf16 %v8358_v54, %v8357_v49  ;;  %v8364_v5 = vand.u32 4294901760, %v8363_v36  ;;  %v8367_v55 = vand.u32 4294901760, %v8366_v53  ;;  %v8368_v57 = vand.u32 4294901760, %v6106_v4  ;;  %v8376_v54 = vld [vmem:[#allocation80_spill] sm:$0xff]  ;;  %4468 = vmatpush1.bf16.msra.mxu0 %v4467_v61 }
 0x12a   : > { %v6593_v0 = vpack.c.bf16 %v8360_v32, %v8359_v62  ;;  %v8370_v10 = vand.u32 4294901760, %v6110_v33  ;;  %v8371_v35 = vand.u32 4294901760, %v6112_v43  ;;  %v8373_v34 = vand.u32 4294901760, %v6116_v59  ;;  %v8378_v32 = vld [vmem:[#allocation81_spill] sm:$0xff]  ;;  %4660 = vmatpush1.bf16.msra.mxu1 %v4659_v8  ;;  %4470 = vmatprep.subr.bf16.mxu0 %v4469_v44 }
 0x12b   : > { %v6599_v26 = vpack.c.bf16 %v8364_v5, %v8362_v41  ;;  %v6605_v3 = vpack.c.bf16 %v8368_v57, %v8367_v55  ;;  %v8374_v39 = vand.u32 4294901760, %v6118_v6  ;;  %v8377_v62 = vand.u32 4294901760, %v8376_v54  ;;  %4662 = vmatprep.subr.bf16.mxu1 %v4661_v17 }
 0x12c   : > { %8361 = vst [vmem:[#allocation70_spill] sm:$0xff] %v6593_v0  ;;  %v6611_v18 = vpack.c.bf16 %v8371_v35, %v8370_v10  ;;  %v8379_v41 = vand.u32 4294901760, %v8378_v32  ;;  %v8380_v55 = vand.u32 4294901760, %v6130_v15  ;;  %v8381_v57 = vand.u32 4294901760, %v6136_v60  ;;  %v8383_v35 = vld [vmem:[#allocation84_spill] sm:$0xff] }
 0x12d   : > { %8365 = vst [vmem:[#allocation71_spill] sm:$0xff] %v6599_v26  ;;  %8369 = vst [vmem:[#allocation73_spill] sm:$0xff] %v6605_v3  ;;  %v6617_v49 = vpack.c.bf16 %v8374_v39, %v8373_v34  ;;  %v8382_v10 = vand.u32 4294901760, %v6140_v13  ;;  %v8385_v34 = vld [vmem:[#allocation86_spill] sm:$0xff]  ;;  %v4667_v8 = vpack.c.bf16 %v8295_v23, %v8294_v14  ;;  %v4477_v44 = vpack.c.bf16 %v8363_v36, %v8296_v28  ;;  %v8392_v23 = vld [vmem:[#allocation27_spill] sm:$0xff] }
 0x12e   : > { %8372 = vst [vmem:[#allocation44_spill] sm:$0xff] %v6611_v18  ;;  %v6623_v5 = vpack.c.bf16 %v8379_v41, %v8377_v62  ;;  %v6629_v63 = vpack.c.bf16 %v8381_v57, %v8380_v55  ;;  %v8384_v18 = vand.u32 4294901760, %v8383_v35  ;;  %v8386_v39 = vand.u32 4294901760, %v8385_v34  ;;  %v8396_v28 = vld [vmem:[#allocation67_spill] sm:$0xff]  ;;  %v8410_v57 = vld [vmem:[#allocation57_spill] sm:$0xff] }
 0x12f   : > { %8375 = vst [vmem:[#allocation46_spill] sm:$0xff] %v6617_v49  ;;  %v8387_v49 = vld [vmem:[#allocation87_spill] sm:$0xff]  ;;  %v4471_v62 = vpack.c.bf16 %v8343_v42, %v8341_v51  ;;  %v4663_v41 = vpack.c.bf16 %v8347_v50, %v8345_v22  ;;  %v4473_v55 = vpack.c.bf16 %v8351_v11, %v8349_v9  ;;  %v4669_v61 = vpack.c.bf16 %v6106_v4, %v8366_v53  ;;  %v8398_v42 = vld [vmem:[#allocation36_spill] sm:$0xff]  ;;  %v8399_v22 = vld [vmem:[#allocation37_spill] sm:$0xff] }
 0x130   : > { %v6635_v3 = vpack.c.bf16 %v8384_v18, %v8382_v10  ;;  %v8388_v26 = vand.u32 4294901760, %v8387_v49  ;;  %v4665_v18 = vpack.c.bf16 %v8355_v19, %v8353_v56  ;;  %v4479_v17 = vpack.c.bf16 %v6112_v43, %v6110_v33  ;;  %v8391_v33 = vld [vmem:[#allocation89_spill] sm:$0xff]  ;;  %v8397_v51 = vld [vmem:[#allocation35_spill] sm:$0xff]  ;;  %v8400_v50 = vld [vmem:[#allocation38_spill] sm:$0xff] }
 0x131   : > { %4472 = vmatpush1.bf16.msra.mxu0 %v4471_v62  ;;  %4664 = vmatpush1.bf16.msra.mxu1 %v4663_v41  ;;  %v4673_v14 = vpack.c.bf16 %v6136_v60, %v6130_v15  ;;  %v4483_v4 = vpack.c.bf16 %v8383_v35, %v6140_v13  ;;  %v4675_v43 = vpack.c.bf16 %v8387_v49, %v8385_v34  ;;  %v8393_v15 = vld [vmem:[#allocation30_spill] sm:$0xff]  ;;  %v8394_v60 = vld [vmem:[#allocation33_spill] sm:$0xff]  ;;  %v8401_v9 = vld [vmem:[#allocation39_spill] sm:$0xff] }
 0x132   : > { %v6641_v0 = vpack.c.bf16 %v8388_v26, %v8386_v39  ;;  %v4475_v26 = vpack.c.bf16 %v8293_v48, %v8292_v25  ;;  %4474 = vmatprep.subr.bf16.mxu0 %v4473_v55  ;;  %4666 = vmatprep.subr.bf16.mxu1 %v4665_v18  ;;  %v4671_v25 = vpack.c.bf16 %v6118_v6, %v6116_v59  ;;  %v8389_v59 = vld [vmem:[#allocation21_spill] sm:$0xff]  ;;  %v8395_v13 = vld [vmem:[#allocation34_spill] sm:$0xff]  ;;  %v8402_v11 = vld [vmem:[#allocation40_spill] sm:$0xff] }
 0x133   : > { %v4481_v48 = vpack.c.bf16 %v8378_v32, %v8376_v54  ;;  %v8390_v6 = vld [vmem:[#allocation25_spill] sm:$0xff]  ;;  %v8404_v19 = vld [vmem:[#allocation42_spill] sm:$0xff]  ;;  %v8405_v36 = vld [vmem:[#allocation43_spill] sm:$0xff] }
 0x134   : > { %v8403_v56 = vld [vmem:[#allocation41_spill] sm:$0xff]  ;;  %v8407_v49 = vld [vmem:[#allocation48_spill] sm:$0xff]  ;;  %v8409_v32 = vld [vmem:[#allocation54_spill] sm:$0xff] }
 0x135   : > { %4476 = vmatpush1.bf16.msra.mxu0 %v4475_v26  ;;  %4668 = vmatpush1.bf16.msra.mxu1 %v4667_v8  ;;  %v8406_v53 = vld [vmem:[#allocation45_spill] sm:$0xff]  ;;  %v8408_v54 = vld [vmem:[#allocation52_spill] sm:$0xff]  ;;  %v8413_v34 = vld [vmem:[#allocation66_spill] sm:$0xff] }
 0x136   : > { %4478 = vmatprep.subr.bf16.mxu0 %v4477_v44  ;;  %4670 = vmatprep.subr.bf16.mxu1 %v4669_v61  ;;  %v8411_v10 = vld [vmem:[#allocation60_spill] sm:$0xff]  ;;  %v8414_v39 = vld [vmem:[#allocation69_spill] sm:$0xff]  ;;  %v8418_v18 = vld [vmem:[#allocation78_spill] sm:$0xff] }
 0x137   : > { %v8412_v35 = vld [vmem:[#allocation64_spill] sm:$0xff]  ;;  %v8417_v55 = vld [vmem:[#allocation77_spill] sm:$0xff]  ;;  %v8419_v26 = vld [vmem:[#allocation79_spill] sm:$0xff] }
 0x138   : > { %v8415_v62 = vld [vmem:[#allocation72_spill] sm:$0xff]  ;;  %v8420_v8 = vld [vmem:[#allocation22_spill] sm:$0xff]  ;;  %v8422_v61 = vld [vmem:[#allocation23_spill] sm:$0xff] }
 0x139   : > { %4480 = vmatpush1.bf16.msra.mxu0 %v4479_v17  ;;  %4672 = vmatpush1.bf16.msra.mxu1 %v4671_v25  ;;  %v8416_v41 = vld [vmem:[#allocation76_spill] sm:$0xff]  ;;  %v8421_v44 = vand.u32 4294901760, %v8420_v8  ;;  %v8423_v17 = vand.u32 4294901760, %v8422_v61  ;;  %v8435_v8 = vld [vmem:[#allocation31_spill] sm:$0xff] }
 0x13a   : > { %4482 = vmatprep.subr.bf16.mxu0 %v4481_v48  ;;  %4674 = vmatprep.subr.bf16.mxu1 %v4673_v14  ;;  %v8424_v48 = vld [vmem:[#allocation82_spill] sm:$0xff]  ;;  %v8425_v14 = vld [vmem:[#allocation24_spill] sm:$0xff]  ;;  %v8436_v61 = vand.u32 4294901760, %v8435_v8 }
 0x13b   : > { %v4517_v25 = vpack.c.bf16 %v8423_v17, %v8421_v44  ;;  %v8437_v44 = vld [vmem:[#allocation32_spill] sm:$0xff]  ;;  %v387_v8 = vld [vmem:[#allocation10 + $0x78] sm:$0xff] }
 0x13c   : > { %v8438_v17 = vand.u32 4294901760, %v8437_v44 }
 0x13d   : > { %4484 = vmatpush1.bf16.msra.mxu0 %v4483_v4  ;;  %4676 = vmatpush1.bf16.msra.mxu1 %v4675_v43  ;;  %v8426_v4 = vand.u32 4294901760, %v8425_v14  ;;  %v8427_v43 = vld [vmem:[#allocation26_spill] sm:$0xff] }
 0x13e   : > { %4486 = vmatprep.subr.bf16.mxu0 %v8389_v59  ;;  %4678 = vmatprep.subr.bf16.mxu1 %v8390_v6  ;;  %v8439_v14 = vld [vmem:[#allocation90_spill] sm:$0xff] }
 0x140   : > { %989 = vmatmul.mubr.f32.vlgmr.msra.gmra.mrb[0].mxu0 %v8391_v33  ;;  %1893 = vmatmul.mubr.f32.vlgmr.msra.gmra.mrb[0].mxu1 %v8391_v33  ;;  %v8428_v33 = vand.u32 4294901760, %v8427_v43  ;;  %v383_v43 = vld [vmem:[#allocation10 + $0x58] sm:$0xff] }
 0x141   : > { %4488 = vmatpush1.bf16.msra.mxu0 %v8392_v23  ;;  %4680 = vmatpush1.bf16.msra.mxu1 %v8393_v15 }
 0x142   : > { %4490 = vmatprep.subr.bf16.mxu0 %v8394_v60  ;;  %4682 = vmatprep.subr.bf16.mxu1 %v8395_v13 }
 0x143   : > { %994 = vmatprep.mubr.f32.mxu0 %v8282_v24  ;;  %1898 = vmatprep.mubr.f32.mxu1 %v8282_v24 }
 0x144   : > { %997 = vmatmul.mubr.f32.gmra.mrb[2].mxu0 %v8396_v28  ;;  %1901 = vmatmul.mubr.f32.gmra.mrb[2].mxu1 %v8396_v28  ;;  %v4709_v28 = vpack.c.bf16 %v8428_v33, %v8426_v4  ;;  %v385_v4 = vld [vmem:[#allocation10 + $0x68] sm:$0xff] }
 0x145   : > { %4492 = vmatpush1.bf16.msra.mxu0 %v8397_v51  ;;  %4684 = vmatpush1.bf16.msra.mxu1 %v8398_v42 }
 0x146   : > { %4494 = vmatprep.subr.bf16.mxu0 %v8399_v22  ;;  %4686 = vmatprep.subr.bf16.mxu1 %v8400_v50 }
 0x147   : > { %1099 = vmatprep.mubr.f32.mxu0 %v8282_v24  ;;  %2003 = vmatprep.mubr.f32.mxu1 %v8282_v24 }
 0x149   : > { %4496 = vmatpush1.bf16.msra.mxu0 %v8401_v9  ;;  %4688 = vmatpush1.bf16.msra.mxu1 %v8402_v11 }
 0x14a   : > { %4498 = vmatprep.subr.bf16.mxu0 %v8403_v56  ;;  %4690 = vmatprep.subr.bf16.mxu1 %v8404_v19 }
 0x14d   : > { %4500 = vmatpush1.bf16.msra.mxu0 %v8405_v36  ;;  %4692 = vmatpush1.bf16.msra.mxu1 %v8406_v53 }
 0x14e   : > { %4502 = vmatprep.subr.bf16.mxu0 %v8407_v49  ;;  %4694 = vmatprep.subr.bf16.mxu1 %v8408_v54 }
 0x151   : > { %4504 = vmatpush1.bf16.msra.mxu0 %v8409_v32  ;;  %4696 = vmatpush1.bf16.msra.mxu1 %v8410_v57 }
 0x152   : > { %4506 = vmatprep.subr.bf16.mxu0 %v8411_v10  ;;  %4698 = vmatprep.subr.bf16.mxu1 %v8412_v35  ;;  %v386_v35 = vld [vmem:[#allocation10 + $0x70] sm:$0xff] }
 0x155   : > { %4508 = vmatpush1.bf16.msra.mxu0 %v8413_v34  ;;  %4700 = vmatpush1.bf16.msra.mxu1 %v8414_v39  ;;  %v8432_v39 = vld [vmem:[#allocation29_spill] sm:$0xff] }
 0x156   : > { %4510 = vmatprep.subr.bf16.mxu0 %v8415_v62  ;;  %4702 = vmatprep.subr.bf16.mxu1 %v8416_v41  ;;  %v8429_v62 = vld [vmem:[#allocation83_spill] sm:$0xff]  ;;  %v8430_v41 = vld [vmem:[#allocation28_spill] sm:$0xff] }
 0x159   : > { %4512 = vmatpush1.bf16.msra.mxu0 %v8417_v55  ;;  %4704 = vmatpush1.bf16.msra.mxu1 %v8418_v18  ;;  %v8431_v55 = vand.u32 4294901760, %v8430_v41  ;;  %v8433_v18 = vand.u32 4294901760, %v8432_v39  ;;  %v8440_v39 = vld [vmem:[#allocation68_spill] sm:$0xff] }
 0x15a   : > { %4514 = vmatprep.subr.bf16.mxu0 %v8419_v26  ;;  %4706 = vmatprep.subr.bf16.mxu1 %v8424_v48  ;;  %v8434_v26 = vld [vmem:[#allocation85_spill] sm:$0xff]  ;;  %v4711_v48 = vpack.c.bf16 %v8438_v17, %v8436_v61  ;;  %v3220_v17 = vand.u32 4294901760, %v383_v43 }
 0x15b   : > { %v4519_v34 = vpack.c.bf16 %v8433_v18, %v8431_v55  ;;  %v374_v55 = vld [vmem:[#allocation10 + $0x10] sm:$0xff] }
 0x15c   : > { %v378_v18 = vld [vmem:[#allocation10 + $0x30] sm:$0xff] }
 0x15d   : > { %4516 = vmatpush1.bf16.msra.mxu0 %v8429_v62  ;;  %4708 = vmatpush1.bf16.msra.mxu1 %v8434_v26  ;;  %v3218_v33 = vand.u32 4294901760, %v378_v18  ;;  %v382_v62 = vld [vmem:[#allocation10 + $0x50] sm:$0xff] }
 0x15e   : > { %4518 = vmatprep.subr.bf16.mxu0 %v4517_v25  ;;  %4710 = vmatprep.subr.bf16.mxu1 %v4709_v28  ;;  %v381_v25 = vld [vmem:[#allocation10 + $0x48] sm:$0xff] }
 0x15f   : > { %v2316_v28 = vand.u32 4294901760, %v381_v25 }
 0x160   : > { %1103 = vmatmul.mubr.f32.vlgmr.msra.gmra.mrb[0].mxu0 %v8439_v14  ;;  %2007 = vmatmul.mubr.f32.vlgmr.msra.gmra.mrb[0].mxu1 %v8439_v14  ;;  %v380_v14 = vld [vmem:[#allocation10 + $0x40] sm:$0xff] }
 0x161   : > { %4520 = vmatpush1.bf16.msra.mxu0 %v4519_v34  ;;  %4712 = vmatpush1.bf16.msra.mxu1 %v4711_v48  ;;  %v379_v34 = vld [vmem:[#allocation10 + $0x38] sm:$0xff] }
 0x162   : > { %4522 = vmatprep.subr.bf16.mxu0 %v6477_v52  ;;  %4714 = vmatprep.subr.bf16.mxu1 %v6483_v37  ;;  %v373_v37 = vld [vmem:[#allocation10 + $0x8] sm:$0xff]  ;;  %v3216_v48 = vand.u32 4294901760, %v379_v34 }
 0x163   : > { %1108 = vmatprep.mubr.f32.mxu0 %v8282_v24  ;;  %2012 = vmatprep.mubr.f32.mxu1 %v8282_v24  ;;  %v377_v52 = vld [vmem:[#allocation10 + $0x28] sm:$0xff]  ;;  %v2308_v41 = vand.u32 4294901760, %v373_v37 }
 0x164   : > { %1112 = vmatmul.mubr.f32.gmra.mrb[2].mxu0 %v8440_v39  ;;  %2016 = vmatmul.mubr.f32.gmra.mrb[2].mxu1 %v8440_v39  ;;  %v384_v39 = vld [vmem:[#allocation10 + $0x60] sm:$0xff] }
 0x165   : > { %4524 = vmatpush1.bf16.msra.mxu0 %v6489_v31  ;;  %4716 = vmatpush1.bf16.msra.mxu1 %v6495_v30  ;;  %v375_v31 = vld [vmem:[#allocation10 + $0x18] sm:$0xff]  ;;  %v372_v30 = vld [vmem:[#allocation10] sm:$0xff]  ;;  %v6751_v44 = vsub.f32 %v373_v37, %v2308_v41 }
 0x166   : > { %4526 = vmatprep.subr.bf16.mxu0 %v6501_v21  ;;  %4718 = vmatprep.subr.bf16.mxu1 %v6507_v2  ;;  %v376_v21 = vld [vmem:[#allocation10 + $0x20] sm:$0xff]  ;;  %v2312_v2 = vand.u32 4294901760, %v377_v52 }
 0x167   : > { %1278 = vmatprep.mubr.f32.mxu0 %v8282_v24  ;;  %2182 = vmatprep.mubr.f32.mxu1 %v8282_v24  ;;  %8442 = vst [vmem:[#allocation49_spill] sm:$0xff] %v6751_v44 }
 0x168   : > { %v6749_v61 = vpack.c.bf16 %v2312_v2, %v2308_v41 }
 0x169   : > { %4528 = vmatpush1.bf16.msra.mxu0 %v6514_v29  ;;  %4720 = vmatpush1.bf16.msra.mxu1 %v6520_v7  ;;  %v3212_v29 = vand.u32 4294901760, %v375_v31  ;;  %v2310_v7 = vand.u32 4294901760, %v372_v30 }
 0x16a   : > { %4530 = vmatprep.subr.bf16.mxu0 %v6526_v38  ;;  %4722 = vmatprep.subr.bf16.mxu1 %v6533_v47  ;;  %v2314_v38 = vand.u32 4294901760, %v376_v21  ;;  %v3214_v47 = vand.u32 4294901760, %v374_v55  ;;  %8441 = vst [vmem:[#allocation47_spill] sm:$0xff] %v6749_v61 }
 0x16b   : > { %v6758_v26 = vsub.f32 %v375_v31, %v3212_v29  ;;  %v6766_v41 = vsub.f32 %v372_v30, %v2310_v7  ;;  %v3222_v30 = vand.u32 4294901760, %v382_v62 }
 0x16c   : > { %v6764_v37 = vpack.c.bf16 %v2314_v38, %v2310_v7  ;;  %v6768_v61 = vsub.f32 %v376_v21, %v2314_v38  ;;  %v6771_v31 = vpack.c.bf16 %v3218_v33, %v3214_v47  ;;  %v3226_v21 = vand.u32 4294901760, %v386_v35 }
 0x16d   : > { %4532 = vmatpush1.bf16.msra.mxu0 %v6539_v12  ;;  %4724 = vmatpush1.bf16.msra.mxu1 %v6545_v27  ;;  %v2320_v12 = vand.u32 4294901760, %v385_v4  ;;  %v6754_v27 = vsub.f32 %v377_v52, %v2312_v2  ;;  %8445 = vst [vmem:[#allocation55_spill] sm:$0xff] %v6758_v26  ;;  %8448 = vst [vmem:[#allocation59_spill] sm:$0xff] %v6766_v41  ;;  %v389_v52 = vld [vmem:[#allocation10 + $0x88] sm:$0xff]  ;;  %v6780_v7 = vsub.f32 %v381_v25, %v2316_v28  ;;  %v390_v41 = vld [vmem:[#allocation10 + $0x90] sm:$0xff] }
 0x16e   : > { %4534 = vmatprep.subr.bf16.mxu0 %v6551_v46  ;;  %4726 = vmatprep.subr.bf16.mxu1 %v6557_v1  ;;  %v6756_v46 = vpack.c.bf16 %v3216_v48, %v3212_v29  ;;  %v6760_v1 = vsub.f32 %v379_v34, %v3216_v48  ;;  %8447 = vst [vmem:[#allocation58_spill] sm:$0xff] %v6764_v37  ;;  %8449 = vst [vmem:[#allocation61_spill] sm:$0xff] %v6768_v61  ;;  %v393_v2 = vld [vmem:[#allocation10 + $0xa8] sm:$0xff]  ;;  %v2318_v29 = vand.u32 4294901760, %v380_v14  ;;  %v8457_v61 = vld [vmem:[#allocation71_spill] sm:$0xff] }
 0x16f   : > { %8443 = vst [vmem:[#allocation50_spill] sm:$0xff] %v6754_v27  ;;  %8450 = vst [vmem:[#allocation62_spill] sm:$0xff] %v6771_v31  ;;  %v6773_v34 = vsub.f32 %v374_v55, %v3214_v47  ;;  %v2322_v48 = vand.u32 4294901760, %v384_v39  ;;  %v6777_v37 = vpack.c.bf16 %v2320_v12, %v2316_v28  ;;  %v6782_v38 = vsub.f32 %v385_v4, %v2320_v12  ;;  %v388_v55 = vld [vmem:[#allocation10 + $0x80] sm:$0xff]  ;;  %v8460_v25 = vld [vmem:[#allocation73_spill] sm:$0xff] }
 0x170   : > { %8444 = vst [vmem:[#allocation51_spill] sm:$0xff] %v6756_v46  ;;  %8446 = vst [vmem:[#allocation56_spill] sm:$0xff] %v6760_v1  ;;  %v395_v46 = vld [vmem:[#allocation10 + $0xb8] sm:$0xff]  ;;  %v2328_v31 = vand.u32 4294901760, %v393_v2  ;;  %v392_v47 = vld [vmem:[#allocation10 + $0xa0] sm:$0xff]  ;;  %v6795_v12 = vsub.f32 %v380_v14, %v2318_v29  ;;  %v3230_v14 = vand.u32 4294901760, %v390_v41 }
 0x171   : > { %4536 = vmatpush1.bf16.msra.mxu0 %v6563_v20  ;;  %4728 = vmatpush1.bf16.msra.mxu1 %v6569_v45  ;;  %v3224_v20 = vand.u32 4294901760, %v387_v8  ;;  %8451 = vst [vmem:[#allocation63_spill] sm:$0xff] %v6773_v34  ;;  %v391_v45 = vld [vmem:[#allocation10 + $0x98] sm:$0xff]  ;;  %8453 = vst [vmem:[#allocation74_spill] sm:$0xff] %v6777_v37  ;;  %v6793_v28 = vpack.c.bf16 %v2322_v48, %v2318_v29  ;;  %v8467_v26 = vld [vmem:[#allocation44_spill] sm:$0xff] }
 0x172   : > { %4538 = vmatprep.subr.bf16.mxu0 %v6575_v16  ;;  %4730 = vmatprep.subr.bf16.mxu1 %v6581_v40  ;;  %v6775_v16 = vsub.f32 %v378_v18, %v3218_v33  ;;  %8454 = vst [vmem:[#allocation75_spill] sm:$0xff] %v6780_v7  ;;  %8455 = vst [vmem:[#allocation80_spill] sm:$0xff] %v6782_v38  ;;  %v2324_v40 = vand.u32 4294901760, %v389_v52  ;;  %v8456_v34 = vld [vmem:[#allocation70_spill] sm:$0xff]  ;;  %v6788_v33 = vsub.f32 %v383_v43, %v3220_v17 }
 0x173   : > { %v6786_v18 = vpack.c.bf16 %v3224_v20, %v3220_v17  ;;  %v3228_v37 = vand.u32 4294901760, %v391_v45  ;;  %v6791_v4 = vsub.f32 %v387_v8, %v3224_v20  ;;  %8462 = vst [vmem:[#allocation87_spill] sm:$0xff] %v6793_v28  ;;  %8463 = vst [vmem:[#allocation21_spill] sm:$0xff] %v6795_v12  ;;  %v6797_v38 = vsub.f32 %v384_v39, %v2322_v48  ;;  %v399_v7 = vld [vmem:[#allocation10 + $0xd8] sm:$0xff]  ;;  %v398_v28 = vld [vmem:[#allocation10 + $0xd0] sm:$0xff] }
 0x174   : > { %8452 = vst [vmem:[#allocation65_spill] sm:$0xff] %v6775_v16  ;;  %8459 = vst [vmem:[#allocation84_spill] sm:$0xff] %v6788_v33  ;;  %v3232_v16 = vand.u32 4294901760, %v395_v46  ;;  %v2326_v43 = vand.u32 4294901760, %v388_v55  ;;  %v2330_v17 = vand.u32 4294901760, %v392_v47  ;;  %v401_v33 = vld [vmem:[#allocation10 + $0xe8] sm:$0xff]  ;;  %v6804_v8 = vsub.f32 %v386_v35, %v3226_v21 }
 0x175   : > { %4540 = vmatpush1.bf16.msra.mxu0 %v6587_v58  ;;  %4732 = vmatpush1.bf16.msra.mxu1 %v8456_v34  ;;  %8458 = vst [vmem:[#allocation81_spill] sm:$0xff] %v6786_v18  ;;  %v394_v58 = vld [vmem:[#allocation10 + $0xb0] sm:$0xff]  ;;  %8461 = vst [vmem:[#allocation86_spill] sm:$0xff] %v6791_v4  ;;  %v397_v34 = vld [vmem:[#allocation10 + $0xc8] sm:$0xff]  ;;  %v6801_v18 = vsub.f32 %v382_v62, %v3222_v30  ;;  %v6806_v20 = vpack.c.bf16 %v2328_v31, %v2324_v40 }
 0x176   : > { %4542 = vmatprep.subr.bf16.mxu0 %v8457_v61  ;;  %4734 = vmatprep.subr.bf16.mxu1 %v8460_v25  ;;  %8464 = vst [vmem:[#allocation25_spill] sm:$0xff] %v6797_v38  ;;  %v6799_v61 = vpack.c.bf16 %v3226_v21, %v3222_v30  ;;  %v403_v1 = vld [vmem:[#allocation10 + $0xf8] sm:$0xff]  ;;  %8468 = vst [vmem:[#allocation30_spill] sm:$0xff] %v6804_v8  ;;  %v3234_v29 = vand.u32 4294901760, %v394_v58  ;;  %v6810_v48 = vsub.f32 %v389_v52, %v2324_v40  ;;  %v396_v25 = vld [vmem:[#allocation10 + $0xc0] sm:$0xff] }
 0x177   : > { %8466 = vst [vmem:[#allocation27_spill] sm:$0xff] %v6801_v18  ;;  %8469 = vst [vmem:[#allocation33_spill] sm:$0xff] %v6806_v20  ;;  %v8470_v39 = vld [vmem:[#allocation46_spill] sm:$0xff]  ;;  %v6812_v62 = vsub.f32 %v393_v2, %v2328_v31  ;;  %v6814_v30 = vpack.c.bf16 %v3232_v16, %v3228_v37  ;;  %v2332_v35 = vand.u32 4294901760, %v397_v34  ;;  %v3236_v21 = vand.u32 4294901760, %v399_v7  ;;  %v402_v8 = vld [vmem:[#allocation10 + $0xf0] sm:$0xff] }
 0x178   : > { %8465 = vst [vmem:[#allocation89_spill] sm:$0xff] %v6799_v61  ;;  %8471 = vst [vmem:[#allocation34_spill] sm:$0xff] %v6810_v48  ;;  %v400_v61 = vld [vmem:[#allocation10 + $0xe0] sm:$0xff]  ;;  %v3240_v20 = vand.u32 4294901760, %v403_v1  ;;  %v6817_v18 = vsub.f32 %v391_v45, %v3228_v37  ;;  %v6823_v52 = vsub.f32 %v388_v55, %v2326_v43  ;;  %v6826_v2 = vsub.f32 %v392_v47, %v2330_v17  ;;  %v407_v55 = vld [vmem:[#allocation10 + $0x118] sm:$0xff] }
 0x179   : > { %4544 = vmatpush1.bf16.msra.mxu0 %v8467_v26  ;;  %4736 = vmatpush1.bf16.msra.mxu1 %v8470_v39  ;;  %8472 = vst [vmem:[#allocation67_spill] sm:$0xff] %v6812_v62  ;;  %8473 = vst [vmem:[#allocation35_spill] sm:$0xff] %v6814_v30  ;;  %v2336_v26 = vand.u32 4294901760, %v401_v33  ;;  %v6819_v39 = vsub.f32 %v395_v46, %v3232_v16  ;;  %v6828_v31 = vpack.c.bf16 %v3234_v29, %v3230_v14  ;;  %v405_v30 = vld [vmem:[#allocation10 + $0x108] sm:$0xff] }
 0x17a   : > { %4546 = vmatprep.subr.bf16.mxu0 %v6623_v5  ;;  %4738 = vmatprep.subr.bf16.mxu1 %v6629_v63  ;;  %8474 = vst [vmem:[#allocation36_spill] sm:$0xff] %v6817_v18  ;;  %v6821_v5 = vpack.c.bf16 %v2330_v17, %v2326_v43  ;;  %8477 = vst [vmem:[#allocation39_spill] sm:$0xff] %v6823_v52  ;;  %v2334_v63 = vand.u32 4294901760, %v396_v25  ;;  %v2338_v40 = vand.u32 4294901760, %v400_v61  ;;  %v409_v62 = vld [vmem:[#allocation10 + $0x128] sm:$0xff]  ;;  %v3238_v45 = vand.u32 4294901760, %v398_v28 }
 0x17b   : > { %8475 = vst [vmem:[#allocation37_spill] sm:$0xff] %v6819_v39  ;;  %8478 = vst [vmem:[#allocation40_spill] sm:$0xff] %v6826_v2  ;;  %v6832_v46 = vsub.f32 %v390_v41, %v3230_v14  ;;  %v6834_v37 = vsub.f32 %v394_v58, %v3234_v29  ;;  %v3242_v16 = vand.u32 4294901760, %v402_v8  ;;  %v6837_v47 = vpack.c.bf16 %v2336_v26, %v2332_v35 }
 0x17c   : > { %8476 = vst [vmem:[#allocation38_spill] sm:$0xff] %v6821_v5  ;;  %8479 = vst [vmem:[#allocation41_spill] sm:$0xff] %v6828_v31  ;;  %v6839_v43 = vsub.f32 %v397_v34, %v2332_v35  ;;  %v6841_v17 = vsub.f32 %v401_v33, %v2336_v26  ;;  %v6843_v31 = vpack.c.bf16 %v3240_v20, %v3236_v21  ;;  %v2340_v14 = vand.u32 4294901760, %v405_v30 }
 0x17d   : > { %4548 = vmatpush1.bf16.msra.mxu0 %v6635_v3  ;;  %4740 = vmatpush1.bf16.msra.mxu1 %v6641_v0  ;;  %8480 = vst [vmem:[#allocation42_spill] sm:$0xff] %v6832_v46  ;;  %8481 = vst [vmem:[#allocation43_spill] sm:$0xff] %v6834_v37  ;;  %v411_v3 = vld [vmem:[#allocation10 + $0x138] sm:$0xff]  ;;  %v404_v0 = vld [vmem:[#allocation10 + $0x100] sm:$0xff]  ;;  %v6846_v41 = vsub.f32 %v399_v7, %v3236_v21  ;;  %v6848_v58 = vsub.f32 %v403_v1, %v3240_v20  ;;  %v2344_v29 = vand.u32 4294901760, %v409_v62 }
 0x17e   : > { %4550 = vmatprep.subr.bf16.mxu0 %v8389_v59  ;;  %4742 = vmatprep.subr.bf16.mxu1 %v8390_v6  ;;  %8482 = vst [vmem:[#allocation45_spill] sm:$0xff] %v6837_v47  ;;  %8483 = vst [vmem:[#allocation48_spill] sm:$0xff] %v6839_v43  ;;  %v8486_v59 = vld [vmem:[#allocation88_spill] sm:$0xff]  ;;  %v408_v37 = vld [vmem:[#allocation10 + $0x120] sm:$0xff]  ;;  %v6852_v33 = vpack.c.bf16 %v2338_v40, %v2334_v63  ;;  %v6854_v34 = vsub.f32 %v396_v25, %v2334_v63  ;;  %v3244_v35 = vand.u32 4294901760, %v407_v55 }
 0x17f   : > { %8484 = vst [vmem:[#allocation52_spill] sm:$0xff] %v6841_v17  ;;  %8485 = vst [vmem:[#allocation54_spill] sm:$0xff] %v6843_v31  ;;  %v406_v46 = vld [vmem:[#allocation10 + $0x110] sm:$0xff]  ;;  %v3248_v26 = vand.u32 4294901760, %v411_v3  ;;  %v413_v17 = vld [vmem:[#allocation10 + $0x148] sm:$0xff]  ;;  %v6858_v1 = vsub.f32 %v400_v61, %v2338_v40  ;;  %v6860_v20 = vpack.c.bf16 %v3242_v16, %v3238_v45  ;;  %v6862_v21 = vsub.f32 %v398_v28, %v3238_v45 }
 0x180   : > { %1280 = vmatmul.mubr.f32.vlgmr.msra.gmra.mrb[0].mxu0 %v8486_v59  ;;  %8487 = vst [vmem:[#allocation57_spill] sm:$0xff] %v6846_v41  ;;  %8488 = vst [vmem:[#allocation60_spill] sm:$0xff] %v6848_v58  ;;  %v410_v6 = vld [vmem:[#allocation10 + $0x130] sm:$0xff]  ;;  %2184 = vmatmul.mubr.f32.vlgmr.msra.gmra.mrb[0].mxu1 %v8486_v59  ;;  %v417_v7 = vld [vmem:[#allocation10 + $0x168] sm:$0xff]  ;;  %v6866_v25 = vsub.f32 %v402_v8, %v3242_v16  ;;  %v2346_v63 = vand.u32 4294901760, %v408_v37  ;;  %v3246_v43 = vand.u32 4294901760, %v406_v46 }
 0x181   : > { %4552 = vmatpush1.bf16.msra.mxu0 %v8392_v23  ;;  %8489 = vst [vmem:[#allocation22_spill] sm:$0xff] %v6852_v33  ;;  %8490 = vst [vmem:[#allocation23_spill] sm:$0xff] %v6854_v34  ;;  %4744 = vmatpush1.bf16.msra.mxu1 %v8393_v15  ;;  %v2342_v23 = vand.u32 4294901760, %v404_v0  ;;  %v3250_v33 = vand.u32 4294901760, %v410_v6  ;;  %v415_v31 = vld [vmem:[#allocation10 + $0x158] sm:$0xff]  ;;  %v6870_v61 = vpack.c.bf16 %v2344_v29, %v2340_v14  ;;  %v2348_v40 = vand.u32 4294901760, %v413_v17 }
 0x182   : > { %4554 = vmatprep.subr.bf16.mxu0 %v8394_v60  ;;  %8491 = vst [vmem:[#allocation24_spill] sm:$0xff] %v6860_v20  ;;  %8492 = vst [vmem:[#allocation26_spill] sm:$0xff] %v6862_v21  ;;  %4746 = vmatprep.subr.bf16.mxu1 %v8395_v13  ;;  %v419_v15 = vld [vmem:[#allocation10 + $0x178] sm:$0xff]  ;;  %v8494_v60 = vld [vmem:[#allocation53_spill] sm:$0xff]  ;;  %v6872_v28 = vsub.f32 %v405_v30, %v2340_v14  ;;  %v2352_v45 = vand.u32 4294901760, %v417_v7  ;;  %v6876_v8 = vsub.f32 %v409_v62, %v2344_v29 }
 0x183   : > { %1285 = vmatprep.mubr.f32.mxu0 %v8282_v24  ;;  %8493 = vst [vmem:[#allocation28_spill] sm:$0xff] %v6866_v25  ;;  %2189 = vmatprep.mubr.f32.mxu1 %v8282_v24  ;;  %8495 = vst [vmem:[#allocation29_spill] sm:$0xff] %v6870_v61  ;;  %v412_v13 = vld [vmem:[#allocation10 + $0x140] sm:$0xff]  ;;  %v6878_v16 = vpack.c.bf16 %v3248_v26, %v3244_v35  ;;  %v6880_v20 = vsub.f32 %v407_v55, %v3244_v35  ;;  %v3252_v61 = vand.u32 4294901760, %v415_v31  ;;  %v418_v21 = vld [vmem:[#allocation10 + $0x170] sm:$0xff] }
 0x184   : > { %1287 = vmatmul.mubr.f32.gmra.mrb[2].mxu0 %v8494_v60  ;;  %8496 = vst [vmem:[#allocation31_spill] sm:$0xff] %v6872_v28  ;;  %2191 = vmatmul.mubr.f32.gmra.mrb[2].mxu1 %v8494_v60  ;;  %v416_v25 = vld [vmem:[#allocation10 + $0x160] sm:$0xff]  ;;  %v6884_v30 = vsub.f32 %v411_v3, %v3248_v26  ;;  %v6886_v14 = vsub.f32 %v404_v0, %v2342_v23  ;;  %v3256_v28 = vand.u32 4294901760, %v419_v15  ;;  %v425_v3 = vld [vmem:[#allocation10 + $0x1a8] sm:$0xff]  ;;  %v423_v35 = vld [vmem:[#allocation10 + $0x198] sm:$0xff] }
 0x185   : > { %4556 = vmatpush1.bf16.msra.mxu0 %v8397_v51  ;;  %8497 = vst [vmem:[#allocation32_spill] sm:$0xff] %v6878_v16  ;;  %4748 = vmatpush1.bf16.msra.mxu1 %v8398_v42  ;;  %v414_v51 = vld [vmem:[#allocation10 + $0x150] sm:$0xff]  ;;  %v6890_v62 = vpack.c.bf16 %v2346_v63, %v2342_v23  ;;  %v6892_v55 = vsub.f32 %v408_v37, %v2346_v63  ;;  %v2350_v42 = vand.u32 4294901760, %v412_v13  ;;  %v420_v23 = vld [vmem:[#allocation10 + $0x180] sm:$0xff] }
 0x186   : > { %4558 = vmatprep.subr.bf16.mxu0 %v8399_v22  ;;  %8498 = vst [vmem:[#allocation90_spill] sm:$0xff] %v6886_v14  ;;  %4750 = vmatprep.subr.bf16.mxu1 %v8400_v50  ;;  %v6894_v29 = vpack.c.bf16 %v3250_v33, %v3246_v43  ;;  %v421_v22 = vld [vmem:[#allocation10 + $0x188] sm:$0xff]  ;;  %v6897_v0 = vsub.f32 %v406_v46, %v3246_v43  ;;  %v2354_v50 = vand.u32 4294901760, %v416_v25  ;;  %v427_v14 = vld [vmem:[#allocation10 + $0x1b8] sm:$0xff] }
 0x187   : > { %1389 = vmatprep.mubr.f32.mxu0 %v8282_v24  ;;  %8499 = vst [vmem:[#allocation68_spill] sm:$0xff] %v6890_v62  ;;  %8500 = vst [vmem:[#allocation70_spill] sm:$0xff] %v6892_v55  ;;  %2293 = vmatprep.mubr.f32.mxu1 %v8282_v24  ;;  %v6899_v26 = vsub.f32 %v410_v6, %v3250_v33  ;;  %v6901_v16 = vpack.c.bf16 %v2352_v45, %v2348_v40  ;;  %v424_v62 = vld [vmem:[#allocation10 + $0x1a0] sm:$0xff]  ;;  %v3258_v55 = vand.u32 4294901760, %v418_v21 }
 0x188   : > { %8501 = vst [vmem:[#allocation71_spill] sm:$0xff] %v6894_v29  ;;  %v6904_v37 = vsub.f32 %v413_v17, %v2348_v40  ;;  %v6906_v63 = vsub.f32 %v417_v7, %v2352_v45  ;;  %v3254_v29 = vand.u32 4294901760, %v414_v51  ;;  %v6910_v46 = vpack.c.bf16 %v3256_v28, %v3252_v61  ;;  %v422_v7 = vld [vmem:[#allocation10 + $0x190] sm:$0xff] }
 0x189   : > { %8502 = vst [vmem:[#allocation73_spill] sm:$0xff] %v6899_v26  ;;  %8503 = vst [vmem:[#allocation44_spill] sm:$0xff] %v6901_v16  ;;  %4560 = vmatpush1.bf16.msra.mxu0 %v8401_v9  ;;  %4752 = vmatpush1.bf16.msra.mxu1 %v8402_v11  ;;  %v6912_v43 = vsub.f32 %v415_v31, %v3252_v61  ;;  %v2356_v6 = vand.u32 4294901760, %v421_v22  ;;  %v2360_v33 = vand.u32 4294901760, %v425_v3  ;;  %v3260_v16 = vand.u32 4294901760, %v423_v35  ;;  %v426_v45 = vld [vmem:[#allocation10 + $0x1b0] sm:$0xff] }
 0x18a   : > { %8504 = vst [vmem:[#allocation46_spill] sm:$0xff] %v6904_v37  ;;  %8505 = vst [vmem:[#allocation88_spill] sm:$0xff] %v6906_v63  ;;  %4562 = vmatprep.subr.bf16.mxu0 %v8403_v56  ;;  %4754 = vmatprep.subr.bf16.mxu1 %v8404_v19  ;;  %v3264_v9 = vand.u32 4294901760, %v427_v14  ;;  %v2358_v17 = vand.u32 4294901760, %v420_v23  ;;  %v2362_v40 = vand.u32 4294901760, %v424_v62  ;;  %v6915_v63 = vsub.f32 %v419_v15, %v3256_v28  ;;  %v433_v26 = vld [vmem:[#allocation10 + $0x1e8] sm:$0xff] }
 0x18b   : > { %8506 = vst [vmem:[#allocation53_spill] sm:$0xff] %v6910_v46  ;;  %8507 = vst [vmem:[#allocation91_spill] sm:$0xff] %v6912_v43  ;;  %v6917_v37 = vpack.c.bf16 %v2354_v50, %v2350_v42  ;;  %v6919_v11 = vsub.f32 %v412_v13, %v2350_v42  ;;  %v6921_v56 = vsub.f32 %v416_v25, %v2354_v50  ;;  %v429_v43 = vld [vmem:[#allocation10 + $0x1c8] sm:$0xff]  ;;  %v3262_v28 = vand.u32 4294901760, %v422_v7  ;;  %v431_v13 = vld [vmem:[#allocation10 + $0x1d8] sm:$0xff] }
 0x18c   : > { %v6924_v31 = vpack.c.bf16 %v3258_v55, %v3254_v29  ;;  %v6926_v61 = vsub.f32 %v414_v51, %v3254_v29  ;;  %v6928_v19 = vsub.f32 %v418_v21, %v3258_v55  ;;  %v6930_v46 = vsub.f32 %v421_v22, %v2356_v6  ;;  %v435_v42 = vld [vmem:[#allocation10 + $0x1f8] sm:$0xff]  ;;  %v428_v51 = vld [vmem:[#allocation10 + $0x1c0] sm:$0xff] }
 0x18d   : > { %8508 = vst [vmem:[#allocation92_spill] sm:$0xff] %v6917_v37  ;;  %4564 = vmatpush1.bf16.msra.mxu0 %v8405_v36  ;;  %4756 = vmatpush1.bf16.msra.mxu1 %v8406_v53  ;;  %v6934_v15 = vpack.c.bf16 %v2360_v33, %v2356_v6  ;;  %v6936_v25 = vsub.f32 %v425_v3, %v2360_v33  ;;  %v3266_v36 = vand.u32 4294901760, %v426_v45  ;;  %v2364_v50 = vand.u32 4294901760, %v429_v43  ;;  %v430_v33 = vld [vmem:[#allocation10 + $0x1d0] sm:$0xff] }
 0x18e   : > { %8509 = vst [vmem:[#allocation93_spill] sm:$0xff] %v6924_v31  ;;  %4566 = vmatprep.subr.bf16.mxu0 %v8407_v49  ;;  %4758 = vmatprep.subr.bf16.mxu1 %v8408_v54  ;;  %v6939_v21 = vpack.c.bf16 %v3264_v9, %v3260_v16  ;;  %v6941_v55 = vsub.f32 %v423_v35, %v3260_v16  ;;  %v432_v49 = vld [vmem:[#allocation10 + $0x1e0] sm:$0xff]  ;;  %v2368_v6 = vand.u32 4294901760, %v433_v26  ;;  %v3272_v16 = vand.u32 4294901760, %v435_v42 }
 0x18f   : > { %8510 = vst [vmem:[#allocation94_spill] sm:$0xff] %v6934_v15  ;;  %8511 = vst [vmem:[#allocation95_spill] sm:$0xff] %v6936_v25  ;;  %v6943_v29 = vsub.f32 %v427_v14, %v3264_v9  ;;  %v6945_v53 = vpack.c.bf16 %v2362_v40, %v2358_v17  ;;  %v6947_v22 = vsub.f32 %v420_v23, %v2358_v17  ;;  %v434_v15 = vld [vmem:[#allocation10 + $0x1f0] sm:$0xff]  ;;  %v2366_v35 = vand.u32 4294901760, %v428_v51 }
 0x190   : > { %8512 = vst [vmem:[#allocation96_spill] sm:$0xff] %v6939_v21  ;;  %v6949_v3 = vsub.f32 %v424_v62, %v2362_v40  ;;  %v6952_v54 = vsub.f32 %v422_v7, %v3262_v28  ;;  %v3268_v21 = vand.u32 4294901760, %v431_v13  ;;  %v366_v14 = vld [vmem:[%s5907_s16] sm:$0xff]  ;;  %v6957_v23 = vpack.c.bf16 %v3266_v36, %v3262_v28  ;;  %v8521_v40 = vld [vmem:[#allocation64_spill] sm:$0xff] }
 0x191   : > { %8513 = vst [vmem:[#allocation97_spill] sm:$0xff] %v6943_v29  ;;  %8514 = vst [vmem:[#allocation98_spill] sm:$0xff] %v6945_v53  ;;  %4568 = vmatpush1.bf16.msra.mxu0 %v8409_v32  ;;  %4760 = vmatpush1.bf16.msra.mxu1 %v8410_v57  ;;  %v6959_v62 = vsub.f32 %v426_v45, %v3266_v36  ;;  %v6961_v9 = vsub.f32 %v429_v43, %v2364_v50  ;;  %v2370_v17 = vand.u32 4294901760, %v432_v49  ;;  %v8526_v45 = vld [vmem:[#allocation66_spill] sm:$0xff] }
 0x192   : > { %8515 = vst [vmem:[#allocation99_spill] sm:$0xff] %v6947_v22  ;;  %8516 = vst [vmem:[#allocation100_spill] sm:$0xff] %v6949_v3  ;;  %4570 = vmatprep.subr.bf16.mxu0 %v8411_v10  ;;  %4762 = vmatprep.subr.bf16.mxu1 %v8521_v40  ;;  %v3270_v32 = vand.u32 4294901760, %v430_v33  ;;  %v3274_v7 = vand.u32 4294901760, %v434_v15  ;;  %v6966_v31 = vpack.c.bf16 %v2368_v6, %v2364_v50  ;;  %v8524_v10 = vld [vmem:[#allocation55_spill] sm:$0xff]  ;;  %v8532_v50 = vld [vmem:[#allocation72_spill] sm:$0xff] }
 0x193   : > { %8517 = vst [vmem:[#allocation101_spill] sm:$0xff] %v6952_v54  ;;  %8518 = vst [vmem:[#allocation102_spill] sm:$0xff] %v6957_v23  ;;  %v6968_v57 = vsub.f32 %v433_v26, %v2368_v6  ;;  %v6971_v23 = vand.u32 4294901760, %v366_v14  ;;  %v6974_v43 = vpack.c.bf16 %v3272_v16, %v3268_v21  ;;  %v6976_v36 = vsub.f32 %v431_v13, %v3268_v21  ;;  %v8536_v54 = vld [vmem:[#allocation59_spill] sm:$0xff] }
 0x194   : > { %8519 = vst [vmem:[#allocation103_spill] sm:$0xff] %v6959_v62  ;;  %8520 = vst [vmem:[#allocation104_spill] sm:$0xff] %v6961_v9  ;;  %v6978_v40 = vsub.f32 %v435_v42, %v3272_v16  ;;  %v8530_v9 = vld [vmem:[#allocation56_spill] sm:$0xff]  ;;  %v8531_v62 = vld [vmem:[#allocation69_spill] sm:$0xff]  ;;  %v6983_v26 = vpack.c.bf16 %v2370_v17, %v2366_v35  ;;  %v6985_v6 = vsub.f32 %v428_v51, %v2366_v35  ;;  %v8540_v21 = vand.u32 4294901760, %v6751_v44 }
 0x195   : > { %8522 = vst [vmem:[#allocation64_spill] sm:$0xff] %v6966_v31  ;;  %8523 = vst [vmem:[#allocation105_spill] sm:$0xff] %v6968_v57  ;;  %4572 = vmatpush1.bf16.msra.mxu0 %v8526_v45  ;;  %v8115_v53 = vand.u32 4294901760, %v8530_v9  ;;  %4764 = vmatpush1.bf16.msra.mxu1 %v8531_v62  ;;  %v6987_v28 = vsub.f32 %v432_v49, %v2370_v17  ;;  %v8537_v31 = vld [vmem:[#allocation76_spill] sm:$0xff]  ;;  %v6991_v13 = vpack.c.bf16 %v3274_v7, %v3270_v32  ;;  %v8546_v45 = vld [vmem:[#allocation77_spill] sm:$0xff] }
 0x196   : > { %8525 = vst [vmem:[#allocation106_spill] sm:$0xff] %v6971_v23  ;;  %8527 = vst [vmem:[#allocation66_spill] sm:$0xff] %v6974_v43  ;;  %4574 = vmatprep.subr.bf16.mxu0 %v8532_v50  ;;  %4766 = vmatprep.subr.bf16.mxu1 %v8537_v31  ;;  %v6993_v42 = vsub.f32 %v430_v33, %v3270_v32  ;;  %v6998_v16 = vsub.f32 %v6751_v44, %v8540_v21  ;;  %v8541_v62 = vand.u32 4294901760, %v6754_v27  ;;  %v8544_v33 = vld [vmem:[#allocation61_spill] sm:$0xff]  ;;  %v8545_v32 = vld [vmem:[#allocation63_spill] sm:$0xff] }
 0x197   : > { %8528 = vst [vmem:[#allocation107_spill] sm:$0xff] %v6976_v36  ;;  %8529 = vst [vmem:[#allocation108_spill] sm:$0xff] %v6978_v40  ;;  %v8542_v49 = vand.u32 4294901760, %v8524_v10  ;;  %v7011_v31 = vsub.f32 %v366_v14, %v6971_v23  ;;  %v3346_v21 = vsub.f32 %v8530_v9, %v8115_v53  ;;  %v8548_v44 = vld [vmem:[#allocation75_spill] sm:$0xff]  ;;  %v7024_v23 = vsub.f32 %v434_v15, %v3274_v7  ;;  %v8554_v17 = vld [vmem:[#allocation84_spill] sm:$0xff] }
 0x198   : > { %8533 = vst [vmem:[#allocation69_spill] sm:$0xff] %v6983_v26  ;;  %8534 = vst [vmem:[#allocation72_spill] sm:$0xff] %v6985_v6  ;;  %v7003_v51 = vsub.f32 %v6754_v27, %v8541_v62  ;;  %v8547_v62 = vld [vmem:[#allocation65_spill] sm:$0xff]  ;;  %v8549_v26 = vld [vmem:[#allocation80_spill] sm:$0xff]  ;;  %v8553_v50 = vand.u32 4294901760, %v8536_v54  ;;  %v8558_v53 = vand.u32 4294901760, %v8545_v32 }
 0x199   : > { %8535 = vst [vmem:[#allocation109_spill] sm:$0xff] %v6987_v28  ;;  %8538 = vst [vmem:[#allocation76_spill] sm:$0xff] %v6991_v13  ;;  %v7008_v35 = vsub.f32 %v8524_v10, %v8542_v49  ;;  %4576 = vmatpush1.bf16.msra.mxu0 %v8546_v45  ;;  %v8121_v27 = vand.u32 4294901760, %v8547_v62  ;;  %v8550_v10 = vld [vmem:[#allocation78_spill] sm:$0xff]  ;;  %v8551_v14 = vld [vmem:[#allocation79_spill] sm:$0xff]  ;;  %v2431_v13 = vand.u32 4294901760, %v6998_v16 }
 0x19a   : > { %8539 = vst [vmem:[#allocation110_spill] sm:$0xff] %v6993_v42  ;;  %8543 = vst [vmem:[#allocation111_spill] sm:$0xff] %v7011_v31  ;;  %4768 = vmatpush1.bf16.msra.mxu1 %v8550_v10  ;;  %4578 = vmatprep.subr.bf16.mxu0 %v8551_v14  ;;  %v2436_v45 = vsub.f32 %v8536_v54, %v8553_v50  ;;  %v8555_v9 = vld [vmem:[#allocation82_spill] sm:$0xff]  ;;  %v2443_v49 = vand.u32 4294901760, %v7003_v51  ;;  %v7038_v7 = vand.u32 4294901760, %v7011_v31  ;;  %v8557_v50 = vand.u32 4294901760, %v8544_v33 }
 0x19b   : > { %8552 = vst [vmem:[#allocation77_spill] sm:$0xff] %v7024_v23  ;;  %4770 = vmatprep.subr.bf16.mxu1 %v8555_v9  ;;  %v3335_v15 = vand.u32 4294901760, %v7008_v35  ;;  %v3340_v9 = vsub.f32 %v8545_v32, %v8558_v53  ;;  %v8559_v16 = vld [vmem:[#allocation83_spill] sm:$0xff]  ;;  %v3347_v51 = vand.u32 4294901760, %v3346_v21  ;;  %v3352_v14 = vsub.f32 %v8547_v62, %v8121_v27 }
 0x19c   : > { %8556 = vst [vmem:[#allocation78_spill] sm:$0xff] %v7038_v7  ;;  %v2448_v43 = vsub.f32 %v8544_v33, %v8557_v50  ;;  %v8560_v35 = vand.u32 4294901760, %v8548_v44  ;;  %v8561_v54 = vand.u32 4294901760, %v8549_v26  ;;  %v8562_v50 = vld [vmem:[#allocation85_spill] sm:$0xff]  ;;  %v8563_v33 = vld [vmem:[#allocation47_spill] sm:$0xff]  ;;  %v2437_v53 = vand.u32 4294901760, %v2436_v45 }
 0x19d   : > { %4580 = vmatpush1.bf16.msra.mxu0 %v8559_v16  ;;  %v8564_v16 = vand.u32 4294901760, %v8554_v17  ;;  %v8565_v32 = vand.u32 4294901760, %v6791_v4  ;;  %v8566_v62 = vld [vmem:[#allocation27_spill] sm:$0xff] }
 0x19e   : > { %v2454_v10 = vsub.f32 %v8548_v44, %v8560_v35  ;;  %v2466_v23 = vsub.f32 %v8549_v26, %v8561_v54  ;;  %4772 = vmatpush1.bf16.msra.mxu1 %v8562_v50  ;;  %4774 = vmatprep.subr.bf16.mxu0 %v8563_v33  ;;  %v8567_v35 = vld [vmem:[#allocation51_spill] sm:$0xff]  ;;  %v8568_v44 = vand.u32 4294901760, %v6795_v12  ;;  %v8569_v50 = vand.u32 4294901760, %v6797_v38  ;;  %v8570_v33 = vld [vmem:[#allocation30_spill] sm:$0xff] }
 0x19f   : > { %v3358_v21 = vsub.f32 %v8554_v17, %v8564_v16  ;;  %v3370_v27 = vsub.f32 %v6791_v4, %v8565_v32  ;;  %4966 = vmatprep.subr.bf16.mxu1 %v8567_v35  ;;  %v2408_v32 = vsub.f32 %v7011_v31, %v7038_v7  ;;  %v2449_v42 = vand.u32 4294901760, %v2448_v43  ;;  %v8571_v35 = vld [vmem:[#allocation67_spill] sm:$0xff]  ;;  %v8574_v16 = vld [vmem:[#allocation74_spill] sm:$0xff]  ;;  %v8576_v17 = vld [vmem:[#allocation81_spill] sm:$0xff] }
 0x1a0   : > { %v2460_v54 = vsub.f32 %v6795_v12, %v8568_v44  ;;  %v2472_v45 = vsub.f32 %v6797_v38, %v8569_v50  ;;  %1391 = vmatmul.mubr.f32.vlgmr.msra.gmra.mrb[0].mxu0 %v8486_v59  ;;  %v3341_v4 = vand.u32 4294901760, %v3340_v9  ;;  %v8572_v44 = vld [vmem:[#allocation58_spill] sm:$0xff]  ;;  %v3353_v12 = vand.u32 4294901760, %v3352_v14  ;;  %v8580_v7 = vld [vmem:[#allocation87_spill] sm:$0xff] }
 0x1a1   : > { %2295 = vmatmul.mubr.f32.vlgmr.msra.gmra.mrb[0].mxu1 %v8486_v59  ;;  %4776 = vmatpush1.bf16.msra.mxu0 %v8572_v44  ;;  %v2455_v28 = vand.u32 4294901760, %v2454_v10  ;;  %v2467_v50 = vand.u32 4294901760, %v2466_v23  ;;  %v8573_v38 = vld [vmem:[#allocation62_spill] sm:$0xff]  ;;  %v3359_v6 = vand.u32 4294901760, %v3358_v21  ;;  %v3371_v40 = vand.u32 4294901760, %v3370_v27 }
 0x1a2   : > { %4968 = vmatpush1.bf16.msra.mxu1 %v8573_v38  ;;  %4778 = vmatprep.subr.bf16.mxu0 %v8574_v16  ;;  %v8575_v43 = vand.u32 4294901760, %v8566_v62  ;;  %v2461_v23 = vand.u32 4294901760, %v2460_v54  ;;  %v2473_v10 = vand.u32 4294901760, %v2472_v45  ;;  %v8577_v14 = vand.u32 4294901760, %v8570_v33 }
 0x1a3   : > { %4970 = vmatprep.subr.bf16.mxu1 %v8576_v17  ;;  %1396 = vmatprep.mubr.f32.mxu0 %v8282_v24  ;;  %v8578_v27 = vand.u32 4294901760, %v6810_v48  ;;  %v7105_v59 = vpack.c.bf16 %v3347_v51, %v3335_v15  ;;  %v8579_v54 = vand.u32 4294901760, %v8571_v35  ;;  %v7117_v17 = vpack.c.bf16 %v2449_v42, %v2437_v53  ;;  %v8582_v15 = vld [vmem:[#allocation89_spill] sm:$0xff] }
 0x1a4   : > { %v7086_v9 = vsub.f32 %v8566_v62, %v8575_v43  ;;  %v7094_v26 = vsub.f32 %v8570_v33, %v8577_v14  ;;  %2300 = vmatprep.mubr.f32.mxu1 %v8282_v24  ;;  %1398 = vmatmul.mubr.f32.gmra.mrb[2].mxu0 %v8494_v60  ;;  %v7103_v43 = vpack.c.bf16 %v2443_v49, %v2431_v13  ;;  %v8581_v13 = vand.u32 4294901760, %v6817_v18  ;;  %v8583_v51 = vld [vmem:[#allocation33_spill] sm:$0xff]  ;;  %v8633_v62 = vld [vmem:[#allocation44_spill] sm:$0xff] }
 0x1a5   : > { %v7099_v21 = vsub.f32 %v6810_v48, %v8578_v27  ;;  %v7110_v45 = vsub.f32 %v8571_v35, %v8579_v54  ;;  %4780 = vmatpush1.bf16.msra.mxu0 %v8580_v7  ;;  %2302 = vmatmul.mubr.f32.gmra.mrb[2].mxu1 %v8494_v60  ;;  %v7115_v27 = vand.u32 4294901760, %v2408_v32  ;;  %v7119_v16 = vpack.c.bf16 %v3353_v12, %v3341_v4  ;;  %v8585_v12 = vld [vmem:[#allocation35_spill] sm:$0xff]  ;;  %v8595_v60 = vld [vmem:[#allocation54_spill] sm:$0xff]  ;;  %v8621_v35 = vld [vmem:[#allocation88_spill] sm:$0xff] }
 0x1a6   : > { %v7124_v49 = vsub.f32 %v6817_v18, %v8581_v13  ;;  %4972 = vmatpush1.bf16.msra.mxu1 %v8582_v15  ;;  %4782 = vmatprep.subr.bf16.mxu0 %v8583_v51  ;;  %v7128_v54 = vpack.c.bf16 %v2467_v50, %v2455_v28  ;;  %v7130_v14 = vpack.c.bf16 %v3371_v40, %v3359_v6  ;;  %v8584_v42 = vand.u32 4294901760, %v6819_v39  ;;  %v8588_v28 = vld [vmem:[#allocation42_spill] sm:$0xff]  ;;  %v8589_v6 = vld [vmem:[#allocation41_spill] sm:$0xff]  ;;  %v8591_v51 = vld [vmem:[#allocation28_spill] sm:$0xff] }
 0x1a7   : > { %4974 = vmatprep.subr.bf16.mxu1 %v8585_v12  ;;  %2404 = vmatprep.mubr.f32.mxu0 %v8282_v24  ;;  %v7140_v53 = vpack.c.bf16 %v2473_v10, %v2461_v23  ;;  %v8587_v50 = vand.u32 4294901760, %v6823_v52  ;;  %v8590_v12 = vld [vmem:[#allocation26_spill] sm:$0xff]  ;;  %v8593_v10 = vand.u32 4294901760, %v6848_v58  ;;  %v8596_v40 = vand.u32 4294901760, %v6826_v2  ;;  %v8598_v15 = vld [vmem:[#allocation31_spill] sm:$0xff] }
 0x1a8   : > { %v7136_v4 = vsub.f32 %v6819_v39, %v8584_v42  ;;  %3308 = vmatprep.mubr.f32.mxu1 %v8282_v24  ;;  %v8599_v23 = vand.u32 4294901760, %v6854_v34  ;;  %v8600_v7 = vand.u32 4294901760, %v6858_v1  ;;  %v8606_v31 = vand.u32 4294901760, %v8588_v28  ;;  %v8620_v18 = vld [vmem:[#allocation46_spill] sm:$0xff] }
 0x1a9   : > { %8586 = vst [vmem:[#allocation79_spill] sm:$0xff] %v7140_v53  ;;  %v7150_v13 = vsub.f32 %v6823_v52, %v8587_v50  ;;  %4784 = vmatpush1.bf16.msra.mxu0 %v6821_v5  ;;  %v8592_v5 = vand.u32 4294901760, %v6846_v41  ;;  %v8605_v50 = vld [vmem:[#allocation22_spill] sm:$0xff]  ;;  %v8610_v52 = vld [vmem:[#allocation29_spill] sm:$0xff]  ;;  %v8612_v42 = vand.u32 4294901760, %v8598_v15  ;;  %v8638_v53 = vand.u32 4294901760, %v6915_v63 }
 0x1aa   : > { %4976 = vmatpush1.bf16.msra.mxu1 %v8589_v6  ;;  %4786 = vmatprep.subr.bf16.mxu0 %v6837_v47  ;;  %v7174_v6 = vsub.f32 %v6826_v2, %v8596_v40  ;;  %v8597_v47 = vld [vmem:[#allocation43_spill] sm:$0xff]  ;;  %v7182_v38 = vpack.c.bf16 %v8600_v7, %v8599_v23  ;;  %v8603_v40 = vand.u32 4294901760, %v8591_v51  ;;  %v7198_v7 = vsub.f32 %v8588_v28, %v8606_v31  ;;  %v8607_v23 = vld [vmem:[#allocation90_spill] sm:$0xff]  ;;  %v8609_v2 = vld [vmem:[#allocation24_spill] sm:$0xff] }
 0x1ab   : > { %v7168_v32 = vpack.c.bf16 %v8593_v10, %v8592_v5  ;;  %4978 = vmatprep.subr.bf16.mxu1 %v8595_v60  ;;  %v8602_v60 = vand.u32 4294901760, %v8590_v12  ;;  %v8608_v10 = vld [vmem:[#allocation70_spill] sm:$0xff]  ;;  %v8615_v31 = vand.u32 4294901760, %v6880_v20  ;;  %v8616_v5 = vand.u32 4294901760, %v6884_v30  ;;  %v8618_v28 = vld [vmem:[#allocation32_spill] sm:$0xff] }
 0x1ac   : > { %8601 = vst [vmem:[#allocation83_spill] sm:$0xff] %v7182_v38  ;;  %v8622_v48 = vand.u32 4294901760, %v8607_v23  ;;  %v8623_v33 = vand.u32 4294901760, %v8608_v10 }
 0x1ad   : > { %8594 = vst [vmem:[#allocation82_spill] sm:$0xff] %v7168_v32  ;;  %v7191_v44 = vpack.c.bf16 %v8603_v40, %v8602_v60  ;;  %4788 = vmatpush1.bf16.msra.mxu0 %v8605_v50  ;;  %v367_v32 = vld [vmem:[%s5907_s16 + $0x8] sm:$0xff]  ;;  %v8611_v40 = vld [vmem:[#allocation73_spill] sm:$0xff]  ;;  %v8613_v50 = vand.u32 4294901760, %v6876_v8  ;;  %v7217_v38 = vpack.c.bf16 %v8616_v5, %v8615_v31  ;;  %v8627_v31 = vand.u32 4294901760, %v6897_v0 }
 0x1ae   : > { %4980 = vmatpush1.bf16.msra.mxu1 %v8609_v2  ;;  %4790 = vmatprep.subr.bf16.mxu0 %v8610_v52  ;;  %v8619_v2 = vld [vmem:[#allocation48_spill] sm:$0xff]  ;;  %v7231_v5 = vand.u32 4294901760, %v367_v32  ;;  %v8628_v52 = vand.u32 4294901760, %v8611_v40 }
 0x1af   : > { %8604 = vst [vmem:[#allocation85_spill] sm:$0xff] %v7191_v44  ;;  %v7211_v39 = vpack.c.bf16 %v8613_v50, %v8612_v42  ;;  %8617 = vst [vmem:[#allocation28_spill] sm:$0xff] %v7217_v38  ;;  %4982 = vmatprep.subr.bf16.mxu1 %v8618_v28  ;;  %v7227_v42 = vpack.c.bf16 %v8623_v33, %v8622_v48  ;;  %v8625_v50 = vld [vmem:[#allocation91_spill] sm:$0xff]  ;;  %v8630_v60 = vld [vmem:[#allocation68_spill] sm:$0xff]  ;;  %v2497_v44 = vand.u32 4294901760, %v7174_v6 }
 0x1b0   : > { %8626 = vst [vmem:[#allocation90_spill] sm:$0xff] %v7231_v5  ;;  %v7237_v38 = vpack.c.bf16 %v8628_v52, %v8627_v31  ;;  %v8631_v28 = vld [vmem:[#allocation52_spill] sm:$0xff]  ;;  %v8634_v52 = vand.u32 4294901760, %v8620_v18  ;;  %v8635_v31 = vand.u32 4294901760, %v8621_v35  ;;  %v8637_v6 = vand.u32 4294901760, %v8625_v50  ;;  %v8640_v33 = vld [vmem:[#allocation53_spill] sm:$0xff] }
 0x1b1   : > { %8614 = vst [vmem:[#allocation26_spill] sm:$0xff] %v7211_v39  ;;  %8624 = vst [vmem:[#allocation31_spill] sm:$0xff] %v7227_v42  ;;  %4792 = vmatpush1.bf16.msra.mxu0 %v8630_v60  ;;  %v8632_v39 = vld [vmem:[#allocation71_spill] sm:$0xff] }
 0x1b2   : > { %8629 = vst [vmem:[#allocation70_spill] sm:$0xff] %v7237_v38  ;;  %4984 = vmatpush1.bf16.msra.mxu1 %v8632_v39  ;;  %4794 = vmatprep.subr.bf16.mxu0 %v8633_v62  ;;  %v7252_v38 = vpack.c.bf16 %v8635_v31, %v8634_v52  ;;  %v7258_v48 = vpack.c.bf16 %v8638_v53, %v8637_v6  ;;  %v8641_v62 = vand.u32 4294901760, %v8597_v47  ;;  %v8642_v52 = vand.u32 4294901760, %v6919_v11  ;;  %v8661_v53 = vld [vmem:[#allocation96_spill] sm:$0xff] }
 0x1b3   : > { %4986 = vmatprep.subr.bf16.mxu1 %v8640_v33  ;;  %v8643_v31 = vand.u32 4294901760, %v6921_v56  ;;  %v8647_v33 = vand.u32 4294901760, %v6928_v19  ;;  %v8649_v39 = vand.u32 4294901760, %v8619_v2 }
 0x1b4   : > { %8636 = vst [vmem:[#allocation73_spill] sm:$0xff] %v7252_v38  ;;  %8639 = vst [vmem:[#allocation46_spill] sm:$0xff] %v7258_v48  ;;  %v7264_v42 = vsub.f32 %v8597_v47, %v8641_v62  ;;  %v7277_v48 = vsub.f32 %v367_v32, %v7231_v5  ;;  %v8646_v62 = vand.u32 4294901760, %v6926_v61  ;;  %v8659_v32 = vand.u32 4294901760, %v6943_v29  ;;  %v8672_v5 = vld [vmem:[#allocation98_spill] sm:$0xff] }
 0x1b5   : > { %v7272_v38 = vpack.c.bf16 %v8643_v31, %v8642_v52  ;;  %4796 = vmatpush1.bf16.msra.mxu0 %v6917_v37  ;;  %v7289_v52 = vsub.f32 %v8619_v2, %v8649_v39  ;;  %v8650_v31 = vand.u32 4294901760, %v8631_v28  ;;  %v8654_v37 = vld [vmem:[#allocation103_spill] sm:$0xff]  ;;  %v8655_v39 = vand.u32 4294901760, %v6930_v46  ;;  %v8677_v29 = vld [vmem:[#allocation102_spill] sm:$0xff] }
 0x1b6   : > { %8645 = vst [vmem:[#allocation91_spill] sm:$0xff] %v7277_v48  ;;  %v7283_v24 = vpack.c.bf16 %v8647_v33, %v8646_v62  ;;  %v8652_v33 = vld [vmem:[#allocation94_spill] sm:$0xff]  ;;  %v8653_v62 = vld [vmem:[#allocation101_spill] sm:$0xff]  ;;  %v8656_v2 = vand.u32 4294901760, %v6936_v25  ;;  %v8664_v25 = vand.u32 4294901760, %v6947_v22 }
 0x1b7   : > { %8644 = vst [vmem:[#allocation88_spill] sm:$0xff] %v7272_v38  ;;  %v7294_v6 = vsub.f32 %v8631_v28, %v8650_v31  ;;  %v8651_v38 = vld [vmem:[#allocation93_spill] sm:$0xff]  ;;  %4798 = vmatprep.subr.bf16.mxu0 %v8652_v33  ;;  %v8658_v31 = vand.u32 4294901760, %v6941_v55  ;;  %v8662_v33 = vand.u32 4294901760, %v6846_v41  ;;  %v8687_v22 = vld [vmem:[#allocation66_spill] sm:$0xff] }
 0x1b8   : > { %8648 = vst [vmem:[#allocation112_spill] sm:$0xff] %v7283_v24  ;;  %4988 = vmatpush1.bf16.msra.mxu1 %v8651_v38  ;;  %v7306_v47 = vpack.c.bf16 %v8656_v2, %v8655_v39  ;;  %v8663_v38 = vld [vmem:[#allocation104_spill] sm:$0xff]  ;;  %v8665_v2 = vand.u32 4294901760, %v6949_v3  ;;  %v8676_v3 = vld [vmem:[#allocation109_spill] sm:$0xff] }
 0x1b9   : > { %v7312_v28 = vpack.c.bf16 %v8659_v32, %v8658_v31  ;;  %4990 = vmatprep.subr.bf16.mxu1 %v8661_v53  ;;  %v3406_v24 = vsub.f32 %v6846_v41, %v8662_v33  ;;  %v8667_v32 = vld [vmem:[#allocation108_spill] sm:$0xff]  ;;  %v8669_v53 = vand.u32 4294901760, %v8653_v62  ;;  %v8670_v33 = vand.u32 4294901760, %v8654_v37  ;;  %4800 = vmatpush1.bf16.msra.mxu0 %v8672_v5 }
 0x1ba   : > { %8657 = vst [vmem:[#allocation113_spill] sm:$0xff] %v7306_v47  ;;  %v7324_v39 = vpack.c.bf16 %v8665_v2, %v8664_v25  ;;  %v8673_v41 = vand.u32 4294901760, %v6848_v58  ;;  %v8674_v2 = vand.u32 4294901760, %v6854_v34  ;;  %v8675_v31 = vld [vmem:[#allocation72_spill] sm:$0xff]  ;;  %v8681_v37 = vand.u32 4294901760, %v8663_v38 }
 0x1bb   : > { %8660 = vst [vmem:[#allocation114_spill] sm:$0xff] %v7312_v28  ;;  %v7329_v28 = vand.u32 4294901760, %v7277_v48  ;;  %v7335_v60 = vpack.c.bf16 %v8670_v33, %v8669_v53  ;;  %v8678_v62 = vld [vmem:[#allocation64_spill] sm:$0xff]  ;;  %v8679_v53 = vld [vmem:[#allocation110_spill] sm:$0xff]  ;;  %v8689_v33 = vand.u32 4294901760, %v7094_v26  ;;  %v8690_v5 = vand.u32 4294901760, %v7099_v21 }
 0x1bc   : > { %8666 = vst [vmem:[#allocation115_spill] sm:$0xff] %v7324_v39  ;;  %v3418_v25 = vsub.f32 %v6848_v58, %v8673_v41  ;;  %v2508_v47 = vsub.f32 %v6854_v34, %v8674_v2  ;;  %4992 = vmatpush1.bf16.msra.mxu1 %v8677_v29  ;;  %4802 = vmatprep.subr.bf16.mxu0 %v8678_v62  ;;  %v8682_v41 = vand.u32 4294901760, %v6968_v57  ;;  %v8684_v2 = vand.u32 4294901760, %v6976_v36 }
 0x1bd   : > { %8668 = vst [vmem:[#allocation108_spill] sm:$0xff] %v7329_v28  ;;  %8671 = vst [vmem:[#allocation116_spill] sm:$0xff] %v7335_v60  ;;  %v8680_v60 = vld [vmem:[#allocation77_spill] sm:$0xff]  ;;  %v8685_v39 = vand.u32 4294901760, %v8667_v32  ;;  %4994 = vmatprep.subr.bf16.mxu1 %v8687_v22  ;;  %v8688_v62 = vand.u32 4294901760, %v7086_v9  ;;  %v8691_v38 = vand.u32 4294901760, %v7110_v45 }
 0x1be   : > { %v7354_v58 = vpack.c.bf16 %v8682_v41, %v8681_v37  ;;  %v8692_v37 = vand.u32 4294901760, %v6858_v1  ;;  %v8696_v9 = vand.u32 4294901760, %v7124_v49  ;;  %v8697_v26 = vand.u32 4294901760, %v7136_v4 }
 0x1bf   : > { %v7360_v34 = vpack.c.bf16 %v8685_v39, %v8684_v2  ;;  %v5003_v29 = vpack.c.bf16 %v8689_v33, %v8688_v62  ;;  %v4813_v57 = vpack.c.bf16 %v8691_v38, %v8690_v5  ;;  %v8694_v39 = vand.u32 4294901760, %v8676_v3 }
 0x1c0   : > { %8683 = vst [vmem:[#allocation72_spill] sm:$0xff] %v7354_v58  ;;  %v2520_v41 = vsub.f32 %v6858_v1, %v8692_v37  ;;  %v8693_v58 = vand.u32 4294901760, %v8675_v31  ;;  %v5005_v62 = vpack.c.bf16 %v8697_v26, %v8696_v9  ;;  %v3389_v21 = vand.u32 4294901760, %v7198_v7  ;;  %v8701_v37 = vld [vmem:[#allocation69_spill] sm:$0xff]  ;;  %v8703_v9 = vld [vmem:[#allocation76_spill] sm:$0xff] }
 0x1c1   : > { %8686 = vst [vmem:[#allocation109_spill] sm:$0xff] %v7360_v34  ;;  %v2419_v38 = vsub.f32 %v7277_v48, %v7329_v28  ;;  %v8698_v45 = vand.u32 4294901760, %v8679_v53  ;;  %v8699_v5 = vand.u32 4294901760, %v8680_v60  ;;  %4804 = vmatpush1.bf16.msra.mxu0 %v8701_v37  ;;  %v3401_v49 = vand.u32 4294901760, %v7264_v42  ;;  %4996 = vmatpush1.bf16.msra.mxu1 %v8703_v9  ;;  %v8728_v48 = vld [vmem:[#allocation97_spill] sm:$0xff] }
 0x1c2   : > { %v7378_v2 = vpack.c.bf16 %v8694_v39, %v8693_v58  ;;  %v8702_v58 = vand.u32 4294901760, %v7150_v13  ;;  %v2503_v4 = vand.u32 4294901760, %v7289_v52  ;;  %v2515_v7 = vand.u32 4294901760, %v7294_v6  ;;  %4806 = vmatprep.subr.bf16.mxu0 %v7103_v43  ;;  %4998 = vmatprep.subr.bf16.mxu1 %v7105_v59 }
 0x1c3   : > { %v7391_v33 = vpack.c.bf16 %v8699_v5, %v8698_v45  ;;  %v3407_v26 = vand.u32 4294901760, %v3406_v24  ;;  %v2509_v45 = vand.u32 4294901760, %v2508_v47  ;;  %v8704_v5 = vand.u32 4294901760, %v8590_v12 }
 0x1c4   : > { %8695 = vst [vmem:[#allocation110_spill] sm:$0xff] %v7378_v2  ;;  %v7396_v39 = vpack.c.bf16 %v2497_v44, %v8702_v58  ;;  %v3419_v2 = vand.u32 4294901760, %v3418_v25  ;;  %v2521_v44 = vand.u32 4294901760, %v2520_v41  ;;  %v8705_v13 = vand.u32 4294901760, %v8591_v51  ;;  %2410 = vmatmul.mubr.f32.vlgmr.msra.gmra.mrb[0].mxu0 %v7115_v27  ;;  %3314 = vmatmul.mubr.f32.vlgmr.msra.gmra.mrb[0].mxu1 %v7115_v27 }
 0x1c5   : > { %8700 = vst [vmem:[#allocation77_spill] sm:$0xff] %v7391_v33  ;;  %v3412_v33 = vsub.f32 %v8590_v12, %v8704_v5  ;;  %v8706_v6 = vand.u32 4294901760, %v8598_v15  ;;  %v8707_v43 = vand.u32 4294901760, %v6876_v8  ;;  %v8708_v47 = vand.u32 4294901760, %v6880_v20  ;;  %4808 = vmatpush1.bf16.msra.mxu0 %v7117_v17  ;;  %5000 = vmatpush1.bf16.msra.mxu1 %v7119_v16 }
 0x1c6   : > { %v3424_v42 = vsub.f32 %v8591_v51, %v8705_v13  ;;  %v8709_v59 = vand.u32 4294901760, %v6884_v30  ;;  %v8710_v58 = vand.u32 4294901760, %v8607_v23  ;;  %v2420_v13 = vand.u32 4294901760, %v2419_v38  ;;  %4810 = vmatprep.subr.bf16.mxu0 %v7128_v54  ;;  %5002 = vmatprep.subr.bf16.mxu1 %v7130_v14 }
 0x1c7   : > { %v2526_v52 = vsub.f32 %v8598_v15, %v8706_v6  ;;  %v2538_v24 = vsub.f32 %v6876_v8, %v8707_v43  ;;  %v3430_v25 = vsub.f32 %v6880_v20, %v8708_v47  ;;  %v5007_v6 = vpack.c.bf16 %v3401_v49, %v3389_v21 }
 0x1c8   : > { %v3442_v41 = vsub.f32 %v6884_v30, %v8709_v59  ;;  %v2532_v5 = vsub.f32 %v8607_v23, %v8710_v58  ;;  %v4817_v43 = vpack.c.bf16 %v2515_v7, %v2503_v4  ;;  %v8711_v34 = vand.u32 4294901760, %v8608_v10 }
 0x1c9   : > { %v5009_v47 = vpack.c.bf16 %v3419_v2, %v3407_v26  ;;  %v3413_v59 = vand.u32 4294901760, %v3412_v33  ;;  %v8712_v9 = vand.u32 4294901760, %v6897_v0  ;;  %v8713_v17 = vand.u32 4294901760, %v8611_v40  ;;  %5004 = vmatpush1.bf16.msra.mxu1 %v5003_v29 }
 0x1ca   : > { %v2544_v28 = vsub.f32 %v8608_v10, %v8711_v34  ;;  %v4819_v21 = vpack.c.bf16 %v2521_v44, %v2509_v45  ;;  %v3425_v49 = vand.u32 4294901760, %v3424_v42  ;;  %v2527_v4 = vand.u32 4294901760, %v2526_v52  ;;  %5006 = vmatprep.subr.bf16.mxu1 %v5005_v62 }
 0x1cb   : > { %v3436_v38 = vsub.f32 %v6897_v0, %v8712_v9  ;;  %v3448_v27 = vsub.f32 %v8611_v40, %v8713_v17  ;;  %v2539_v34 = vand.u32 4294901760, %v2538_v24  ;;  %v8714_v7 = vmov 0.0   ;;  %v8716_v9 = vld [vmem:[#allocation79_spill] sm:$0xff] }
 0x1cc   : > { %2415 = vmatprep.mubr.f32.mxu0 %v8714_v7  ;;  %v3431_v16 = vand.u32 4294901760, %v3430_v25  ;;  %v3443_v54 = vand.u32 4294901760, %v3442_v41  ;;  %v2533_v2 = vand.u32 4294901760, %v2532_v5  ;;  %v8715_v33 = vand.u32 4294901760, %v8620_v18  ;;  %3319 = vmatprep.mubr.f32.mxu1 %v8714_v7 }
 0x1cd   : > { %2421 = vmatmul.mubr.f32.gmra.mrb[2].mxu0 %v2420_v13  ;;  %v2545_v58 = vand.u32 4294901760, %v2544_v28  ;;  %v8717_v14 = vand.u32 4294901760, %v8621_v35  ;;  %v8718_v44 = vand.u32 4294901760, %v8625_v50  ;;  %v8719_v52 = vand.u32 4294901760, %v6915_v63  ;;  %3325 = vmatmul.mubr.f32.gmra.mrb[2].mxu1 %v2420_v13 }
 0x1ce   : > { %v2550_v26 = vsub.f32 %v8620_v18, %v8715_v33  ;;  %4812 = vmatpush1.bf16.msra.mxu0 %v8716_v9  ;;  %v3437_v25 = vand.u32 4294901760, %v3436_v38  ;;  %v3449_v41 = vand.u32 4294901760, %v3448_v27  ;;  %v8720_v5 = vand.u32 4294901760, %v6919_v11  ;;  %2651 = vmatprep.mubr.f32.mxu0 %v8714_v7 }
 0x1cf   : > { %v2562_v45 = vsub.f32 %v8621_v35, %v8717_v14  ;;  %v3454_v42 = vsub.f32 %v8625_v50, %v8718_v44  ;;  %v3466_v24 = vsub.f32 %v6915_v63, %v8719_v52  ;;  %4814 = vmatprep.subr.bf16.mxu0 %v4813_v57  ;;  %v8721_v17 = vand.u32 4294901760, %v6921_v56  ;;  %3555 = vmatprep.mubr.f32.mxu1 %v8714_v7 }
 0x1d0   : > { %v2556_v28 = vsub.f32 %v6919_v11, %v8720_v5  ;;  %v5011_v9 = vpack.c.bf16 %v3425_v49, %v3413_v59  ;;  %v8722_v14 = vand.u32 4294901760, %v6926_v61  ;;  %v8723_v13 = vand.u32 4294901760, %v6928_v19  ;;  %v8725_v5 = vld [vmem:[#allocation95_spill] sm:$0xff]  ;;  %5008 = vmatpush1.bf16.msra.mxu1 %v5007_v6 }
 0x1d1   : > { %v2568_v33 = vsub.f32 %v6921_v56, %v8721_v17  ;;  %v4821_v57 = vpack.c.bf16 %v2539_v34, %v2527_v4  ;;  %v5013_v38 = vpack.c.bf16 %v3443_v54, %v3431_v16  ;;  %v8724_v27 = vand.u32 4294901760, %v6930_v46  ;;  %5010 = vmatprep.subr.bf16.mxu1 %v5009_v47 }
 0x1d2   : > { %v3460_v44 = vsub.f32 %v6926_v61, %v8722_v14  ;;  %v3472_v29 = vsub.f32 %v6928_v19, %v8723_v13  ;;  %v8726_v17 = vand.u32 4294901760, %v8725_v5  ;;  %4816 = vmatpush1.bf16.msra.mxu0 %v7396_v39  ;;  %v2551_v59 = vand.u32 4294901760, %v2550_v26 }
 0x1d3   : > { %v2574_v52 = vsub.f32 %v6930_v46, %v8724_v27  ;;  %v2563_v49 = vand.u32 4294901760, %v2562_v45  ;;  %v3455_v14 = vand.u32 4294901760, %v3454_v42  ;;  %v3467_v13 = vand.u32 4294901760, %v3466_v24  ;;  %4818 = vmatprep.subr.bf16.mxu0 %v4817_v43  ;;  %v8730_v42 = vld [vmem:[#allocation99_spill] sm:$0xff] }
 0x1d4   : > { %v2586_v62 = vsub.f32 %v8725_v5, %v8726_v17  ;;  %v4823_v4 = vpack.c.bf16 %v2545_v58, %v2533_v2  ;;  %v5015_v34 = vpack.c.bf16 %v3449_v41, %v3437_v25  ;;  %v2557_v16 = vand.u32 4294901760, %v2556_v28  ;;  %v8732_v2 = vld [vmem:[#allocation100_spill] sm:$0xff]  ;;  %v8734_v41 = vld [vmem:[#allocation101_spill] sm:$0xff]  ;;  %5012 = vmatpush1.bf16.msra.mxu1 %v5011_v9 }
 0x1d5   : > { %v2569_v54 = vand.u32 4294901760, %v2568_v33  ;;  %v3461_v27 = vand.u32 4294901760, %v3460_v44  ;;  %v3473_v37 = vand.u32 4294901760, %v3472_v29  ;;  %v8727_v22 = vand.u32 4294901760, %v6941_v55  ;;  %v8736_v33 = vld [vmem:[#allocation103_spill] sm:$0xff]  ;;  %5014 = vmatprep.subr.bf16.mxu1 %v5013_v38 }
 0x1d6   : > { %v8729_v5 = vand.u32 4294901760, %v8728_v48  ;;  %v2575_v26 = vand.u32 4294901760, %v2574_v52  ;;  %v2587_v45 = vand.u32 4294901760, %v2586_v62  ;;  %v8731_v6 = vand.u32 4294901760, %v8730_v42  ;;  %4820 = vmatpush1.bf16.msra.mxu0 %v4819_v21 }
 0x1d7   : > { %v3478_v17 = vsub.f32 %v6941_v55, %v8727_v22  ;;  %v8733_v58 = vand.u32 4294901760, %v8732_v2  ;;  %v4825_v24 = vpack.c.bf16 %v2563_v49, %v2551_v59  ;;  %v5017_v25 = vpack.c.bf16 %v3467_v13, %v3455_v14  ;;  %4822 = vmatprep.subr.bf16.mxu0 %v4821_v57 }
 0x1d8   : > { %v3490_v39 = vsub.f32 %v8728_v48, %v8729_v5  ;;  %v2580_v43 = vsub.f32 %v8730_v42, %v8731_v6  ;;  %v8735_v28 = vand.u32 4294901760, %v8734_v41  ;;  %v8737_v44 = vand.u32 4294901760, %v8736_v33  ;;  %v8738_v5 = vld [vmem:[#allocation104_spill] sm:$0xff]  ;;  %v8740_v42 = vld [vmem:[#allocation105_spill] sm:$0xff]  ;;  %5016 = vmatpush1.bf16.msra.mxu1 %v5015_v34 }
 0x1d9   : > { %v2592_v47 = vsub.f32 %v8732_v2, %v8733_v58  ;;  %v4827_v52 = vpack.c.bf16 %v2569_v54, %v2557_v16  ;;  %v8739_v62 = vand.u32 4294901760, %v8738_v5  ;;  %v8741_v58 = vand.u32 4294901760, %v8740_v42  ;;  %5018 = vmatprep.subr.bf16.mxu1 %v5017_v25 }
 0x1da   : > { %v3484_v22 = vsub.f32 %v8734_v41, %v8735_v28  ;;  %v3496_v29 = vsub.f32 %v8736_v33, %v8737_v44  ;;  %v3479_v59 = vand.u32 4294901760, %v3478_v17  ;;  %v3491_v49 = vand.u32 4294901760, %v3490_v39  ;;  %4824 = vmatpush1.bf16.msra.mxu0 %v4823_v4 }
 0x1db   : > { %v2598_v6 = vsub.f32 %v8738_v5, %v8739_v62  ;;  %v2610_v21 = vsub.f32 %v8740_v42, %v8741_v58  ;;  %v8742_v14 = vand.u32 4294901760, %v6976_v36  ;;  %v8743_v28 = vand.u32 4294901760, %v8667_v32  ;;  %4826 = vmatprep.subr.bf16.mxu0 %v4825_v24 }
 0x1dc   : > { %v5019_v57 = vpack.c.bf16 %v3473_v37, %v3461_v27  ;;  %v4829_v16 = vpack.c.bf16 %v2587_v45, %v2575_v26  ;;  %v2581_v54 = vand.u32 4294901760, %v2580_v43  ;;  %v2593_v44 = vand.u32 4294901760, %v2592_v47 }
 0x1dd   : > { %v3502_v13 = vsub.f32 %v6976_v36, %v8742_v14  ;;  %v3514_v9 = vsub.f32 %v8667_v32, %v8743_v28  ;;  %v3485_v62 = vand.u32 4294901760, %v3484_v22  ;;  %v3497_v5 = vand.u32 4294901760, %v3496_v29 }
 0x1de   : > { %v8744_v58 = vand.u32 4294901760, %v8675_v31  ;;  %v8745_v17 = vand.u32 4294901760, %v8676_v3  ;;  %v2599_v14 = vand.u32 4294901760, %v2598_v6  ;;  %v2611_v36 = vand.u32 4294901760, %v2610_v21  ;;  %4828 = vmatpush1.bf16.msra.mxu0 %v4827_v52  ;;  %5020 = vmatpush1.bf16.msra.mxu1 %v5019_v57  ;;  %v8750_v52 = vld [vmem:[#allocation55_spill] sm:$0xff] }
 0x1df   : > { %v8746_v37 = vand.u32 4294901760, %v8679_v53  ;;  %v8747_v4 = vand.u32 4294901760, %v8680_v60  ;;  %v5021_v45 = vpack.c.bf16 %v3491_v49, %v3479_v59  ;;  %v3503_v43 = vand.u32 4294901760, %v3502_v13  ;;  %4830 = vmatprep.subr.bf16.mxu0 %v4829_v16  ;;  %v8748_v59 = vld [vmem:[#allocation49_spill] sm:$0xff]  ;;  %v8749_v49 = vld [vmem:[#allocation50_spill] sm:$0xff]  ;;  %v8752_v57 = vld [vmem:[#allocation59_spill] sm:$0xff] }
 0x1e0   : > { %v2604_v38 = vsub.f32 %v8675_v31, %v8744_v58  ;;  %v2616_v39 = vsub.f32 %v8676_v3, %v8745_v17  ;;  %v3515_v47 = vand.u32 4294901760, %v3514_v9  ;;  %v4831_v22 = vpack.c.bf16 %v2593_v44, %v2581_v54  ;;  %v8751_v9 = vld [vmem:[#allocation56_spill] sm:$0xff]  ;;  %v8754_v16 = vld [vmem:[#allocation63_spill] sm:$0xff]  ;;  %v8755_v44 = vld [vmem:[#allocation65_spill] sm:$0xff] }
 0x1e1   : > { %v3508_v27 = vsub.f32 %v8679_v53, %v8746_v37  ;;  %v3520_v26 = vsub.f32 %v8680_v60, %v8747_v4  ;;  %v5023_v34 = vpack.c.bf16 %v3497_v5, %v3485_v62  ;;  %v4833_v24 = vpack.c.bf16 %v2611_v36, %v2599_v14  ;;  %5022 = vmatprep.subr.bf16.mxu1 %v5021_v45  ;;  %v8753_v5 = vld [vmem:[#allocation61_spill] sm:$0xff]  ;;  %v8758_v37 = vld [vmem:[#allocation84_spill] sm:$0xff] }
 0x1e2   : > { %v2605_v29 = vand.u32 4294901760, %v2604_v38  ;;  %v2617_v28 = vand.u32 4294901760, %v2616_v39  ;;  %v5025_v58 = vpack.c.bf16 %v3515_v47, %v3503_v43  ;;  %4832 = vmatpush1.bf16.msra.mxu0 %v4831_v22  ;;  %v4837_v13 = vpack.c.bf16 %v8749_v49, %v8748_v59  ;;  %v8756_v38 = vld [vmem:[#allocation75_spill] sm:$0xff]  ;;  %v8757_v39 = vld [vmem:[#allocation80_spill] sm:$0xff]  ;;  %v8761_v45 = vld [vmem:[#allocation21_spill] sm:$0xff] }
 0x1e3   : > { %v3509_v6 = vand.u32 4294901760, %v3508_v27  ;;  %v3521_v21 = vand.u32 4294901760, %v3520_v26  ;;  %5024 = vmatpush1.bf16.msra.mxu1 %v5023_v34  ;;  %4834 = vmatprep.subr.bf16.mxu0 %v4833_v24  ;;  %v5029_v54 = vpack.c.bf16 %v8751_v9, %v8750_v52  ;;  %v4839_v36 = vpack.c.bf16 %v8753_v5, %v8752_v57  ;;  %v8759_v27 = vld [vmem:[#allocation86_spill] sm:$0xff]  ;;  %v8762_v43 = vld [vmem:[#allocation25_spill] sm:$0xff]  ;;  %v8763_v22 = vld [vmem:[#allocation27_spill] sm:$0xff] }
 0x1e4   : > { %v4835_v17 = vpack.c.bf16 %v2617_v28, %v2605_v29  ;;  %5026 = vmatprep.subr.bf16.mxu1 %v5025_v58  ;;  %v5031_v62 = vpack.c.bf16 %v8755_v44, %v8754_v16  ;;  %v4841_v14 = vpack.c.bf16 %v8757_v39, %v8756_v38  ;;  %v5033_v4 = vpack.c.bf16 %v8759_v27, %v8758_v37  ;;  %v8760_v26 = vld [vmem:[#allocation106_spill] sm:$0xff]  ;;  %v8766_v24 = vld [vmem:[#allocation67_spill] sm:$0xff]  ;;  %v8768_v58 = vld [vmem:[#allocation37_spill] sm:$0xff] }
 0x1e5   : > { %v5027_v25 = vpack.c.bf16 %v3521_v21, %v3509_v6  ;;  %v4843_v47 = vpack.c.bf16 %v8762_v43, %v8761_v45  ;;  %v8764_v29 = vld [vmem:[#allocation30_spill] sm:$0xff]  ;;  %v8767_v21 = vld [vmem:[#allocation36_spill] sm:$0xff] }
 0x1e6   : > { %4836 = vmatpush1.bf16.msra.mxu0 %v4835_v17  ;;  %v5035_v28 = vpack.c.bf16 %v8764_v29, %v8763_v22  ;;  %v8765_v34 = vld [vmem:[#allocation34_spill] sm:$0xff]  ;;  %v5037_v17 = vpack.c.bf16 %v8768_v58, %v8767_v21  ;;  %v8776_v21 = vld [vmem:[#allocation57_spill] sm:$0xff] }
 0x1e7   : > { %5028 = vmatpush1.bf16.msra.mxu1 %v5027_v25  ;;  %4838 = vmatprep.subr.bf16.mxu0 %v4837_v13  ;;  %v4845_v6 = vpack.c.bf16 %v8766_v24, %v8765_v34  ;;  %v8769_v25 = vld [vmem:[#allocation90_spill] sm:$0xff]  ;;  %v8770_v13 = vld [vmem:[#allocation39_spill] sm:$0xff]  ;;  %v8775_v24 = vld [vmem:[#allocation52_spill] sm:$0xff] }
 0x1e8   : > { %5030 = vmatprep.subr.bf16.mxu1 %v5029_v54  ;;  %v8771_v54 = vld [vmem:[#allocation40_spill] sm:$0xff] }
 0x1e9   : > { %2653 = vmatmul.mubr.f32.vlgmr.msra.gmra.mrb[0].mxu0 %v8760_v26  ;;  %v8777_v34 = vld [vmem:[#allocation60_spill] sm:$0xff] }
 0x1ea   : > { %4840 = vmatpush1.bf16.msra.mxu0 %v4839_v36  ;;  %3557 = vmatmul.mubr.f32.vlgmr.msra.gmra.mrb[0].mxu1 %v8760_v26  ;;  %v4847_v36 = vpack.c.bf16 %v8771_v54, %v8770_v13  ;;  %v8774_v26 = vld [vmem:[#allocation48_spill] sm:$0xff]  ;;  %v5041_v29 = vpack.c.bf16 %v8777_v34, %v8776_v21  ;;  %v5045_v34 = vpack.c.bf16 %v6884_v30, %v6880_v20 }
 0x1eb   : > { %5032 = vmatpush1.bf16.msra.mxu1 %v5031_v62  ;;  %4842 = vmatprep.subr.bf16.mxu0 %v4841_v14  ;;  %v8772_v62 = vld [vmem:[#allocation42_spill] sm:$0xff]  ;;  %v8773_v14 = vld [vmem:[#allocation43_spill] sm:$0xff]  ;;  %v4849_v58 = vpack.c.bf16 %v8775_v24, %v8774_v26  ;;  %v4855_v21 = vpack.c.bf16 %v8608_v10, %v8607_v23  ;;  %v4859_v20 = vpack.c.bf16 %v6921_v56, %v6919_v11  ;;  %v8781_v56 = vld [vmem:[#allocation104_spill] sm:$0xff] }
 0x1ec   : > { %5034 = vmatprep.subr.bf16.mxu1 %v5033_v4  ;;  %2658 = vmatprep.mubr.f32.mxu0 %v8714_v7  ;;  %v5039_v4 = vpack.c.bf16 %v8773_v14, %v8772_v62  ;;  %v5051_v30 = vpack.c.bf16 %v6928_v19, %v6926_v61  ;;  %v5055_v11 = vpack.c.bf16 %v8736_v33, %v8734_v41  ;;  %v8782_v61 = vld [vmem:[#allocation107_spill] sm:$0xff]  ;;  %v8796_v41 = vld [vmem:[#allocation41_spill] sm:$0xff] }
 0x1ed   : > { %3562 = vmatprep.mubr.f32.mxu1 %v8714_v7  ;;  %2660 = vmatmul.mubr.f32.gmra.mrb[2].mxu0 %v8769_v25  ;;  %v4867_v19 = vpack.c.bf16 %v8676_v3, %v8675_v31  ;;  %v8784_v10 = vld [vmem:[#allocation51_spill] sm:$0xff]  ;;  %v8788_v3 = vld [vmem:[#allocation74_spill] sm:$0xff]  ;;  %v8792_v31 = vld [vmem:[#allocation89_spill] sm:$0xff] }
 0x1ee   : > { %4844 = vmatpush1.bf16.msra.mxu0 %v4843_v47  ;;  %3564 = vmatmul.mubr.f32.gmra.mrb[2].mxu1 %v8769_v25  ;;  %v8778_v47 = vld [vmem:[#allocation23_spill] sm:$0xff]  ;;  %v8797_v33 = vld [vmem:[#allocation45_spill] sm:$0xff] }
 0x1ef   : > { %5036 = vmatpush1.bf16.msra.mxu1 %v5035_v28  ;;  %4846 = vmatprep.subr.bf16.mxu0 %v4845_v6  ;;  %v4851_v25 = vpack.c.bf16 %v6858_v1, %v8778_v47  ;;  %v5043_v28 = vpack.c.bf16 %v8591_v51, %v8590_v12  ;;  %v4853_v6 = vpack.c.bf16 %v6876_v8, %v8598_v15  ;;  %v8779_v15 = vld [vmem:[#allocation95_spill] sm:$0xff]  ;;  %v8803_v47 = vld [vmem:[#allocation68_spill] sm:$0xff] }
 0x1f0   : > { %5038 = vmatprep.subr.bf16.mxu1 %v5037_v17  ;;  %2794 = vmatprep.mubr.f32.mxu0 %v8714_v7  ;;  %v5047_v1 = vpack.c.bf16 %v8611_v40, %v6897_v0  ;;  %v5049_v8 = vpack.c.bf16 %v6915_v63, %v8625_v50  ;;  %v4861_v51 = vpack.c.bf16 %v8779_v15, %v6930_v46  ;;  %v8780_v0 = vld [vmem:[#allocation99_spill] sm:$0xff]  ;;  %v8786_v40 = vld [vmem:[#allocation58_spill] sm:$0xff]  ;;  %v8813_v15 = vld [vmem:[#allocation64_spill] sm:$0xff] }
 0x1f1   : > { %3698 = vmatprep.mubr.f32.mxu1 %v8714_v7  ;;  %v4863_v63 = vpack.c.bf16 %v8732_v2, %v8780_v0  ;;  %v5057_v46 = vpack.c.bf16 %v8667_v32, %v8782_v61  ;;  %v8783_v12 = vld [vmem:[#allocation47_spill] sm:$0xff]  ;;  %v8787_v50 = vld [vmem:[#allocation62_spill] sm:$0xff]  ;;  %v8819_v61 = vld [vmem:[#allocation69_spill] sm:$0xff] }
 0x1f2   : > { %4848 = vmatpush1.bf16.msra.mxu0 %v4847_v36  ;;  %v8785_v23 = vld [vmem:[#allocation111_spill] sm:$0xff]  ;;  %v8795_v2 = vld [vmem:[#allocation38_spill] sm:$0xff]  ;;  %v8801_v36 = vld [vmem:[#allocation29_spill] sm:$0xff] }
 0x1f3   : > { %5040 = vmatpush1.bf16.msra.mxu1 %v5039_v4  ;;  %4850 = vmatprep.subr.bf16.mxu0 %v4849_v58  ;;  %v4857_v58 = vpack.c.bf16 %v8621_v35, %v8620_v18  ;;  %v5053_v18 = vpack.c.bf16 %v8728_v48, %v6941_v55  ;;  %v4865_v35 = vpack.c.bf16 %v8740_v42, %v8781_v56  ;;  %v8789_v48 = vld [vmem:[#allocation81_spill] sm:$0xff]  ;;  %v8791_v32 = vld [vmem:[#allocation87_spill] sm:$0xff]  ;;  %v8799_v17 = vld [vmem:[#allocation22_spill] sm:$0xff]  ;;  %v8818_v56 = vand.u32 4294901760, %v8751_v9 }
 0x1f4   : > { %5042 = vmatprep.subr.bf16.mxu1 %v5041_v29  ;;  %v5059_v55 = vpack.c.bf16 %v8680_v60, %v8679_v53  ;;  %v8790_v60 = vld [vmem:[#allocation91_spill] sm:$0xff]  ;;  %v8793_v53 = vld [vmem:[#allocation33_spill] sm:$0xff]  ;;  %v8798_v29 = vld [vmem:[#allocation54_spill] sm:$0xff]  ;;  %v8826_v9 = vand.u32 4294901760, %v8757_v39 }
 0x1f5   : > { %v8794_v42 = vld [vmem:[#allocation35_spill] sm:$0xff]  ;;  %v8802_v4 = vld [vmem:[#allocation32_spill] sm:$0xff]  ;;  %v8833_v39 = vld [vmem:[#allocation30_spill] sm:$0xff] }
 0x1f6   : > { %4852 = vmatpush1.bf16.msra.mxu0 %v4851_v25  ;;  %v8800_v25 = vld [vmem:[#allocation24_spill] sm:$0xff] }
 0x1f7   : > { %5044 = vmatpush1.bf16.msra.mxu1 %v5043_v28  ;;  %4854 = vmatprep.subr.bf16.mxu0 %v4853_v6  ;;  %v8804_v28 = vld [vmem:[#allocation71_spill] sm:$0xff]  ;;  %v8805_v6 = vld [vmem:[#allocation44_spill] sm:$0xff] }
 0x1f8   : > { %5046 = vmatprep.subr.bf16.mxu1 %v5045_v34  ;;  %v8806_v34 = vld [vmem:[#allocation53_spill] sm:$0xff] }
 0x1fa   : > { %4856 = vmatpush1.bf16.msra.mxu0 %v4855_v21  ;;  %v8807_v21 = vld [vmem:[#allocation92_spill] sm:$0xff] }
 0x1fb   : > { %5048 = vmatpush1.bf16.msra.mxu1 %v5047_v1  ;;  %4858 = vmatprep.subr.bf16.mxu0 %v4857_v58  ;;  %v8808_v1 = vld [vmem:[#allocation93_spill] sm:$0xff]  ;;  %v8809_v58 = vld [vmem:[#allocation94_spill] sm:$0xff] }
 0x1fc   : > { %5050 = vmatprep.subr.bf16.mxu1 %v5049_v8  ;;  %v8810_v8 = vld [vmem:[#allocation96_spill] sm:$0xff] }
 0x1fe   : > { %4860 = vmatpush1.bf16.msra.mxu0 %v4859_v20  ;;  %v8811_v20 = vld [vmem:[#allocation98_spill] sm:$0xff] }
 0x1ff   : > { %5052 = vmatpush1.bf16.msra.mxu1 %v5051_v30  ;;  %4862 = vmatprep.subr.bf16.mxu0 %v4861_v51  ;;  %v8812_v30 = vld [vmem:[#allocation102_spill] sm:$0xff]  ;;  %v8814_v51 = vand.u32 4294901760, %v8748_v59  ;;  %v8823_v59 = vand.u32 4294901760, %v8754_v16  ;;  %v8830_v16 = vand.u32 4294901760, %v8761_v45 }
 0x200   : > { %5054 = vmatprep.subr.bf16.mxu1 %v5053_v18  ;;  %v8815_v18 = vand.u32 4294901760, %v8749_v49  ;;  %v8824_v49 = vand.u32 4294901760, %v8755_v44  ;;  %v8831_v44 = vand.u32 4294901760, %v8762_v43  ;;  %v8843_v43 = vld [vmem:[#allocation108_spill] sm:$0xff] }
 0x202   : > { %4864 = vmatpush1.bf16.msra.mxu0 %v4863_v63  ;;  %v4901_v0 = vpack.c.bf16 %v8815_v18, %v8814_v51  ;;  %v8816_v63 = vld [vmem:[#allocation66_spill] sm:$0xff]  ;;  %v8827_v18 = vand.u32 4294901760, %v8758_v37 }
 0x203   : > { %5056 = vmatpush1.bf16.msra.mxu1 %v5055_v11  ;;  %4866 = vmatprep.subr.bf16.mxu0 %v4865_v35  ;;  %v8817_v11 = vand.u32 4294901760, %v8750_v52  ;;  %v8825_v52 = vand.u32 4294901760, %v8756_v38  ;;  %v8832_v38 = vand.u32 4294901760, %v8763_v22  ;;  %v8844_v22 = vand.u32 4294901760, %v8770_v13  ;;  %v8850_v13 = vld [vmem:[#allocation82_spill] sm:$0xff] }
 0x204   : > { %5058 = vmatprep.subr.bf16.mxu1 %v5057_v46  ;;  %v8820_v46 = vand.u32 4294901760, %v8752_v57  ;;  %v8828_v57 = vand.u32 4294901760, %v8759_v27 }
 0x205   : > { %v5093_v35 = vpack.c.bf16 %v8818_v56, %v8817_v11  ;;  %v4905_v51 = vpack.c.bf16 %v8826_v9, %v8825_v52  ;;  %v8829_v11 = vld [vmem:[#allocation78_spill] sm:$0xff]  ;;  %v8834_v56 = vand.u32 4294901760, %v8833_v39  ;;  %v8841_v52 = vld [vmem:[#allocation37_spill] sm:$0xff] }
 0x206   : > { %4868 = vmatpush1.bf16.msra.mxu0 %v4867_v19  ;;  %v8821_v19 = vand.u32 4294901760, %v8753_v5  ;;  %v5097_v5 = vpack.c.bf16 %v8828_v57, %v8827_v18  ;;  %v8842_v45 = vand.u32 4294901760, %v8841_v52  ;;  %v8846_v18 = vand.u32 4294901760, %v8772_v62  ;;  %v8852_v62 = vld [vmem:[#allocation85_spill] sm:$0xff]  ;;  %v8858_v39 = vld [vmem:[#allocation46_spill] sm:$0xff] }
 0x207   : > { %5060 = vmatpush1.bf16.msra.mxu1 %v5059_v55  ;;  %4870 = vmatprep.subr.bf16.mxu0 %v8783_v12  ;;  %v5099_v37 = vpack.c.bf16 %v8834_v56, %v8832_v38  ;;  %v8847_v57 = vand.u32 4294901760, %v8773_v14  ;;  %v8853_v14 = vld [vmem:[#allocation26_spill] sm:$0xff]  ;;  %v8857_v38 = vld [vmem:[#allocation73_spill] sm:$0xff]  ;;  %v8859_v56 = vld [vmem:[#allocation88_spill] sm:$0xff] }
 0x208   : > { %5062 = vmatprep.subr.bf16.mxu1 %v8784_v10  ;;  %v4903_v55 = vpack.c.bf16 %v8821_v19, %v8820_v46  ;;  %v8837_v46 = vld [vmem:[#allocation67_spill] sm:$0xff]  ;;  %v8868_v52 = vld [vmem:[#allocation77_spill] sm:$0xff] }
 0x209   : > { %2797 = vmatmul.mubr.f32.vlgmr.msra.gmra.mrb[0].mxu0 %v8785_v23  ;;  %v8838_v19 = vand.u32 4294901760, %v8837_v46  ;;  %v8863_v46 = vld [vmem:[#allocation115_spill] sm:$0xff] }
 0x20a   : > { %4872 = vmatpush1.bf16.msra.mxu0 %v8786_v40  ;;  %3701 = vmatmul.mubr.f32.vlgmr.msra.gmra.mrb[0].mxu1 %v8785_v23  ;;  %v8822_v23 = vld [vmem:[#allocation76_spill] sm:$0xff] }
 0x20b   : > { %5064 = vmatpush1.bf16.msra.mxu1 %v8787_v50  ;;  %4874 = vmatprep.subr.bf16.mxu0 %v8788_v3 }
 0x20c   : > { %5066 = vmatprep.subr.bf16.mxu1 %v8789_v48  ;;  %2802 = vmatprep.mubr.f32.mxu0 %v8714_v7 }
 0x20d   : > { %3706 = vmatprep.mubr.f32.mxu1 %v8714_v7  ;;  %2805 = vmatmul.mubr.f32.gmra.mrb[2].mxu0 %v8790_v60 }
 0x20e   : > { %4876 = vmatpush1.bf16.msra.mxu0 %v8791_v32  ;;  %3709 = vmatmul.mubr.f32.gmra.mrb[2].mxu1 %v8790_v60  ;;  %v5095_v60 = vpack.c.bf16 %v8824_v49, %v8823_v59 }
 0x20f   : > { %5068 = vmatpush1.bf16.msra.mxu1 %v8792_v31  ;;  %4878 = vmatprep.subr.bf16.mxu0 %v8793_v53 }
 0x210   : > { %5070 = vmatprep.subr.bf16.mxu1 %v8794_v42  ;;  %2907 = vmatprep.mubr.f32.mxu0 %v8714_v7 }
 0x211   : > { %3811 = vmatprep.mubr.f32.mxu1 %v8714_v7 }
 0x212   : > { %4880 = vmatpush1.bf16.msra.mxu0 %v8795_v2 }
 0x213   : > { %5072 = vmatpush1.bf16.msra.mxu1 %v8796_v41  ;;  %4882 = vmatprep.subr.bf16.mxu0 %v8797_v33 }
 0x214   : > { %5074 = vmatprep.subr.bf16.mxu1 %v8798_v29 }
 0x216   : > { %4884 = vmatpush1.bf16.msra.mxu0 %v8799_v17 }
 0x217   : > { %5076 = vmatpush1.bf16.msra.mxu1 %v8800_v25  ;;  %4886 = vmatprep.subr.bf16.mxu0 %v8801_v36 }
 0x218   : > { %5078 = vmatprep.subr.bf16.mxu1 %v8802_v4 }
 0x21a   : > { %4888 = vmatpush1.bf16.msra.mxu0 %v8803_v47 }
 0x21b   : > { %5080 = vmatpush1.bf16.msra.mxu1 %v8804_v28  ;;  %4890 = vmatprep.subr.bf16.mxu0 %v8805_v6 }
 0x21c   : > { %5082 = vmatprep.subr.bf16.mxu1 %v8806_v34 }
 0x21e   : > { %4892 = vmatpush1.bf16.msra.mxu0 %v8807_v21 }
 0x21f   : > { %5084 = vmatpush1.bf16.msra.mxu1 %v8808_v1  ;;  %4894 = vmatprep.subr.bf16.mxu0 %v8809_v58 }
 0x220   : > { %5086 = vmatprep.subr.bf16.mxu1 %v8810_v8 }
 0x222   : > { %4896 = vmatpush1.bf16.msra.mxu0 %v8811_v20 }
 0x223   : > { %5088 = vmatpush1.bf16.msra.mxu1 %v8812_v30  ;;  %4898 = vmatprep.subr.bf16.mxu0 %v8813_v15 }
 0x224   : > { %5090 = vmatprep.subr.bf16.mxu1 %v8816_v63 }
 0x226   : > { %4900 = vmatpush1.bf16.msra.mxu0 %v8819_v61 }
 0x227   : > { %5092 = vmatpush1.bf16.msra.mxu1 %v8822_v23  ;;  %4902 = vmatprep.subr.bf16.mxu0 %v4901_v0  ;;  %v4907_v0 = vpack.c.bf16 %v8831_v44, %v8830_v16  ;;  %v8849_v16 = vand.u32 4294901760, %v8775_v24  ;;  %v8855_v24 = vld [vmem:[#allocation31_spill] sm:$0xff] }
 0x228   : > { %5094 = vmatprep.subr.bf16.mxu1 %v5093_v35  ;;  %v8835_v35 = vld [vmem:[#allocation34_spill] sm:$0xff] }
 0x229   : > { %2911 = vmatmul.mubr.f32.vlgmr.msra.gmra.mrb[0].mxu0 %v8829_v11  ;;  %v8836_v27 = vand.u32 4294901760, %v8835_v35  ;;  %v8861_v35 = vld [vmem:[#allocation113_spill] sm:$0xff] }
 0x22a   : > { %4904 = vmatpush1.bf16.msra.mxu0 %v4903_v55  ;;  %3815 = vmatmul.mubr.f32.vlgmr.msra.gmra.mrb[0].mxu1 %v8829_v11  ;;  %v8839_v55 = vld [vmem:[#allocation36_spill] sm:$0xff]  ;;  %v8848_v11 = vand.u32 4294901760, %v8774_v26 }
 0x22b   : > { %5096 = vmatpush1.bf16.msra.mxu1 %v5095_v60  ;;  %4906 = vmatprep.subr.bf16.mxu0 %v4905_v51  ;;  %v4909_v59 = vpack.c.bf16 %v8838_v19, %v8836_v27  ;;  %v8840_v49 = vand.u32 4294901760, %v8839_v55  ;;  %v8845_v60 = vand.u32 4294901760, %v8771_v54  ;;  %v8851_v54 = vld [vmem:[#allocation83_spill] sm:$0xff]  ;;  %v8854_v26 = vld [vmem:[#allocation28_spill] sm:$0xff]  ;;  %v8862_v27 = vld [vmem:[#allocation114_spill] sm:$0xff] }
 0x22c   : > { %5098 = vmatprep.subr.bf16.mxu1 %v5097_v5  ;;  %2916 = vmatprep.mubr.f32.mxu0 %v8714_v7  ;;  %v5103_v5 = vpack.c.bf16 %v8847_v57, %v8846_v18  ;;  %v4913_v44 = vpack.c.bf16 %v8849_v16, %v8848_v11  ;;  %v8864_v19 = vld [vmem:[#allocation116_spill] sm:$0xff]  ;;  %v8866_v55 = vld [vmem:[#allocation109_spill] sm:$0xff] }
 0x22d   : > { %v5101_v9 = vpack.c.bf16 %v8842_v45, %v8840_v49  ;;  %3820 = vmatprep.mubr.f32.mxu1 %v8714_v7  ;;  %2920 = vmatmul.mubr.f32.gmra.mrb[2].mxu0 %v8843_v43  ;;  %v4911_v51 = vpack.c.bf16 %v8845_v60, %v8844_v22  ;;  %v8867_v49 = vld [vmem:[#allocation110_spill] sm:$0xff] }
 0x22e   : > { %4908 = vmatpush1.bf16.msra.mxu0 %v4907_v0  ;;  %3824 = vmatmul.mubr.f32.gmra.mrb[2].mxu1 %v8843_v43  ;;  %v8856_v0 = vld [vmem:[#allocation70_spill] sm:$0xff] }
 0x22f   : > { %5100 = vmatpush1.bf16.msra.mxu1 %v5099_v37  ;;  %4910 = vmatprep.subr.bf16.mxu0 %v4909_v59  ;;  %v8860_v37 = vld [vmem:[#allocation112_spill] sm:$0xff]  ;;  %v8869_v45 = vld [vmem:[#allocation106_spill] sm:$0xff] }
 0x230   : > { %5102 = vmatprep.subr.bf16.mxu1 %v5101_v9  ;;  %3086 = vmatprep.mubr.f32.mxu0 %v8714_v7  ;;  %v8865_v59 = vld [vmem:[#allocation72_spill] sm:$0xff]  ;;  %v8870_v9 = vld [vmem:[#allocation90_spill] sm:$0xff] }
 0x231   : > { %3990 = vmatprep.mubr.f32.mxu1 %v8714_v7 }
 0x232   : > { %4912 = vmatpush1.bf16.msra.mxu0 %v4911_v51 }
 0x233   : > { %5104 = vmatpush1.bf16.msra.mxu1 %v5103_v5  ;;  %4914 = vmatprep.subr.bf16.mxu0 %v4913_v44 }
 0x234   : > { %5106 = vmatprep.subr.bf16.mxu1 %v8850_v13  ;;  %v370_v13 = vld [vmem:[#allocation3] sm:$0xff] }
 0x236   : > { %4916 = vmatpush1.bf16.msra.mxu0 %v8851_v54 }
 0x237   : > { %5108 = vmatpush1.bf16.msra.mxu1 %v8852_v62  ;;  %4918 = vmatprep.subr.bf16.mxu0 %v8853_v14 }
 0x238   : > { %5110 = vmatprep.subr.bf16.mxu1 %v8854_v26 }
 0x23a   : > { %4920 = vmatpush1.bf16.msra.mxu0 %v8855_v24 }
 0x23b   : > { %5112 = vmatpush1.bf16.msra.mxu1 %v8856_v0  ;;  %4922 = vmatprep.subr.bf16.mxu0 %v8857_v38 }
 0x23c   : > { %5114 = vmatprep.subr.bf16.mxu1 %v8858_v39  ;;  %v371_v39 = vld [vmem:[#allocation3 + $0x8] sm:$0xff] }
 0x23e   : > { %4924 = vmatpush1.bf16.msra.mxu0 %v8859_v56 }
 0x23f   : > { %5116 = vmatpush1.bf16.msra.mxu1 %v8860_v37  ;;  %4926 = vmatprep.subr.bf16.mxu0 %v8861_v35 }
 0x240   : > { %5118 = vmatprep.subr.bf16.mxu1 %v8862_v27 }
 0x242   : > { %4928 = vmatpush1.bf16.msra.mxu0 %v8863_v46 }
 0x243   : > { %5120 = vmatpush1.bf16.msra.mxu1 %v8864_v19  ;;  %4930 = vmatprep.subr.bf16.mxu0 %v8865_v59 }
 0x244   : > { %5122 = vmatprep.subr.bf16.mxu1 %v8866_v55 }
 0x246   : > { %4932 = vmatpush1.bf16.msra.mxu0 %v8867_v49 }
 0x247   : > { %5124 = vmatpush1.bf16.msra.mxu1 %v8868_v52  ;;  %4934 = vmatprep.subr.bf16.mxu0 %v8783_v12  ;;  %v4118_v12 = vlaneseq }
 0x248   : > { %5126 = vmatprep.subr.bf16.mxu1 %v8784_v10 }
 0x249   : > { %3088 = vmatmul.mubr.f32.vlgmr.msra.gmra.mrb[0].mxu0 %v8869_v45  ;;  %v4119_v10 = vshrl.u32 %v4118_v12, 7 }
 0x24a   : > { %4936 = vmatpush1.bf16.msra.mxu0 %v8786_v40  ;;  %3992 = vmatmul.mubr.f32.vlgmr.msra.gmra.mrb[0].mxu1 %v8869_v45 }
 0x24b   : > { %5128 = vmatpush1.bf16.msra.mxu1 %v8787_v50  ;;  %4938 = vmatprep.subr.bf16.mxu0 %v8788_v3  ;;  %v4120_v40 = vsub.s32 0, %v4119_v10  ;;  %v4116_v50 = vld [vmem:[%s7838_s5] sm:$0xf]  ;;  %v4124_v3 = vsub.s32 1, %v4119_v10 }
 0x24c   : > { %5130 = vmatprep.subr.bf16.mxu1 %v8789_v48  ;;  %3093 = vmatprep.mubr.f32.mxu0 %v8714_v7 }
 0x24d   : > { %3997 = vmatprep.mubr.f32.mxu1 %v8714_v7  ;;  %3095 = vmatmul.mubr.f32.gmra.mrb[2].mxu0 %v8870_v9  ;;  %v4121_v48 = vrot.slane %v4116_v50, %v4120_v40 }
 0x24e   : > { %4940 = vmatpush1.bf16.msra.mxu0 %v8791_v32  ;;  %3999 = vmatmul.mubr.f32.gmra.mrb[2].mxu1 %v8870_v9  ;;  %v4125_v32 = vrot.slane %v4116_v50, %v4124_v3 }
 0x24f   : > { %5132 = vmatpush1.bf16.msra.mxu1 %v8792_v31  ;;  %4942 = vmatprep.subr.bf16.mxu0 %v8793_v53  ;;  %v4132_v53 = vsub.s32 3, %v4119_v10 }
 0x250   : > { %5134 = vmatprep.subr.bf16.mxu1 %v8794_v42  ;;  %3197 = vmatprep.mubr.f32.mxu0 %v8714_v7 }
 0x251   : > { %4101 = vmatprep.mubr.f32.mxu1 %v8714_v7 }
 0x252   : > { %4944 = vmatpush1.bf16.msra.mxu0 %v8795_v2 }
 0x253   : > { %5136 = vmatpush1.bf16.msra.mxu1 %v8796_v41  ;;  %4946 = vmatprep.subr.bf16.mxu0 %v8797_v33 }
 0x254   : > { %5138 = vmatprep.subr.bf16.mxu1 %v8798_v29 }
 0x256   : > { %4948 = vmatpush1.bf16.msra.mxu0 %v8799_v17 }
 0x257   : > { %5140 = vmatpush1.bf16.msra.mxu1 %v8800_v25  ;;  %4950 = vmatprep.subr.bf16.mxu0 %v8801_v36  ;;  %v4133_v25 = vrot.slane %v4116_v50, %v4132_v53 }
 0x258   : > { %5142 = vmatprep.subr.bf16.mxu1 %v8802_v4  ;;  %v4128_v4 = vsub.s32 2, %v4119_v10 }
 0x25a   : > { %4952 = vmatpush1.bf16.msra.mxu0 %v8803_v47 }
 0x25b   : > { %5144 = vmatpush1.bf16.msra.mxu1 %v8804_v28  ;;  %4954 = vmatprep.subr.bf16.mxu0 %v8805_v6 }
 0x25c   : > { %5146 = vmatprep.subr.bf16.mxu1 %v8806_v34 }
 0x25e   : > { %4956 = vmatpush1.bf16.msra.mxu0 %v8807_v21 }
 0x25f   : > { %5148 = vmatpush1.bf16.msra.mxu1 %v8808_v1  ;;  %4958 = vmatprep.subr.bf16.mxu0 %v8809_v58 }
 0x260   : > { %5150 = vmatprep.subr.bf16.mxu1 %v8810_v8 }
 0x262   : > { %4960 = vmatpush1.bf16.msra.mxu0 %v8811_v20  ;;  %v4129_v20 = vrot.slane %v4116_v50, %v4128_v4 }
 0x263   : > { %5152 = vmatpush1.bf16.msra.mxu1 %v8812_v30  ;;  %4962 = vmatprep.subr.bf16.mxu0 %v8813_v15 }
 0x264   : > { %5154 = vmatprep.subr.bf16.mxu1 %v8816_v63 }
 0x266   : > { %4964 = vmatpush1.bf16.msra.mxu0 %v8819_v61 }
 0x267   : > { %5156 = vmatpush1.bf16.msra.mxu1 %v8822_v23 }
 0x269   : > { %3199 = vmatmul.mubr.f32.vlgmr.msra.gmra.mrb[0].mxu0 %v8869_v45 }
 0x26a   : > { %4103 = vmatmul.mubr.f32.vlgmr.msra.gmra.mrb[0].mxu1 %v8869_v45  ;;  %3204 = vmatprep.mubr.f32.mxu0 %v8714_v7 }
 0x26b   : > { %4108 = vmatprep.mubr.f32.mxu1 %v8714_v7 }
 0x26d   : > { %3206 = vmatmul.mubr.f32.gmra.mrb[2].mxu0 %v8870_v9 }
 0x26e   : > { %4110 = vmatmul.mubr.f32.gmra.mrb[2].mxu1 %v8870_v9 }
 0x33c   : > { %v3200_v31 = vpop.f32.mrb[0].mxu0 }
 0x33d   : > { %v4138_v42 = vadd.f32 %v4121_v48, %v3200_v31  ;;  %v4104_v2 = vpop.f32.mrb[0].mxu1  ;;  %v3202_v41 = vpop.f32.mrb[1].mxu0 }
 0x33e   : > { %v4139_v7 = vadd.f32 %v4125_v32, %v3202_v41  ;;  %v4106_v33 = vpop.f32.mrb[1].mxu1  ;;  %v4140_v63 = vadd.f32 %v4129_v20, %v4104_v2 }
 0x33f   : > { %v4373_v29 = vmul.f32 -1.442695, %v4138_v42  ;;  %v4141_v58 = vadd.f32 %v4133_v25, %v4106_v33 }
 0x340   : > { %v4375_v17 = vmul.f32 -1.442695, %v4139_v7  ;;  %v3207_v36 = vpop.f32.mrb[2].mxu0 }
 0x341   : > { %5346 = vpow2.f32 %v4373_v29  ;;  %v4142_v47 = vadd.f32 %v4121_v48, %v3207_v36  ;;  %v4111_v28 = vpop.f32.mrb[2].mxu1  ;;  %v3209_v6 = vpop.f32.mrb[3].mxu0  ;;  %v4377_v30 = vmul.f32 -1.442695, %v4141_v58 }
 0x342   : > { %5348 = vpow2.f32 %v4375_v17  ;;  %v4143_v34 = vadd.f32 %v4125_v32, %v3209_v6  ;;  %v4113_v21 = vpop.f32.mrb[3].mxu1  ;;  %v4144_v51 = vadd.f32 %v4129_v20, %v4111_v28 }
 0x343   : > { %v4374_v1 = vmul.f32 -1.442695, %v4142_v47  ;;  %v4145_v15 = vadd.f32 %v4133_v25, %v4113_v21 }
 0x344   : > { %v4376_v8 = vmul.f32 -1.442695, %v4143_v34 }
 0x345   : > { %5350 = vpow2.f32 %v4374_v1  ;;  %v4378_v22 = vmul.f32 -1.442695, %v4145_v15 }
 0x346   : > { %5352 = vpow2.f32 %v4376_v8 }
 0x347   : > { %5354 = vpow2.f32 %v4377_v30 }
 0x348   : > { %5356 = vtanh.f32 %v4140_v63 }
 0x34b   : > { %v5347_v61 = vpop.eup %5346 }
 0x34c   : > { %v5349_v23 = vpop.eup %5348  ;;  %v4152_v43 = vadd.f32 1.0, %v5347_v61 }
 0x34d   : > { %v4164_v60 = vadd.f32 1.0, %v5349_v23 }
 0x34e   : > { %5358 = vrcp.f32 %v4152_v43 }
 0x34f   : > { %v5351_v18 = vpop.eup %5350  ;;  %5360 = vrcp.f32 %v4164_v60 }
 0x350   : > { %v5353_v57 = vpop.eup %5352  ;;  %v4153_v5 = vadd.f32 1.0, %v5351_v18  ;;  %5362 = vpow2.f32 %v4378_v22 }
 0x351   : > { %5364 = vtanh.f32 %v4144_v51  ;;  %v4165_v11 = vadd.f32 1.0, %v5353_v57  ;;  %v5355_v16 = vpop.eup %5354 }
 0x352   : > { %5366 = vrcp.f32 %v4153_v5  ;;  %v5357_v44 = vpop.eup %5356  ;;  %v4178_v26 = vadd.f32 1.0, %v5355_v16 }
 0x353   : > { %5368 = vrcp.f32 %v4165_v11 }
 0x354   : > { %5370 = vrcp.f32 %v4178_v26 }
 0x358   : > { %v5359_v54 = vpop.eup %5358 }
 0x359   : > { %v5361_v62 = vpop.eup %5360  ;;  %v4186_v14 = vmul.f32 %v5359_v54, %v5357_v44 }
 0x35a   : > { %v5363_v24 = vpop.eup %5362  ;;  %v4184_v0 = vmul.f32 %v5361_v62, %v370_v13 }
 0x35b   : > { %v5365_v38 = vpop.eup %5364  ;;  %v4179_v46 = vadd.f32 1.0, %v5363_v24 }
 0x35c   : > { %v5367_v56 = vpop.eup %5366  ;;  %v4188_v37 = vadd.f32 %v4186_v14, %v4184_v0 }
 0x35d   : > { %v5369_v35 = vpop.eup %5368  ;;  %v4187_v27 = vmul.f32 %v5367_v56, %v5365_v38 }
 0x35e   : > { %5372 = vtanh.f32 %v4188_v37  ;;  %4196 = vst [vmem:[#allocation3] sm:$0xff] %v4188_v37  ;;  %v4185_v19 = vmul.f32 %v5369_v35, %v371_v39  ;;  %v5371_v55 = vpop.eup %5370  ;;  %4204 = vst [vmem:[#allocation14] sm:$0xff] (!%p4379_p9), %v4188_v37 }
 0x35f   : > { %5374 = vrcp.f32 %v4179_v46 }
 0x360   : > { %v4189_v59 = vadd.f32 %v4187_v27, %v4185_v19 }
 0x362   : > { %5376 = vtanh.f32 %v4189_v59  ;;  %4197 = vst [vmem:[#allocation3 + $0x8] sm:$0xff] %v4189_v59  ;;  %4205 = vst [vmem:[#allocation14 + $0x8] sm:$0xff] (!%p4379_p9), %v4189_v59 }
 0x368   : > { %v5373_v49 = vpop.eup %5372 }
 0x369   : > { %v4192_v52 = vmul.f32 %v5373_v49, %v5371_v55  ;;  %v5375_v45 = vpop.eup %5374  ;;  %4203 = sbr.rel (%p4379_p9) target bundleno = 880 (0x370), region = 72 }
 0x36b   : > { %4194 = vst [vmem:[#allocation2] sm:$0xff] %v4192_v52  ;;  %4198 = vst [vmem:[%s5921_s9] sm:$0xff] %v4192_v52 }
 0x36c   : > { %v5377_v9 = vpop.eup %5376 }
 0x36d   : > { %v4193_v12 = vmul.f32 %v5377_v9, %v5375_v45 }
 0x36f   : > { %4195 = vst [vmem:[#allocation2 + $0x8] sm:$0xff] %v4193_v12  ;;  %4199 = vst [vmem:[%s5921_s9 + $0x8] sm:$0xff] %v4193_v12 }
 0x370 PF: > { %s4388_s10 = sshll.u32 %s5701_s28, 8  ;;  %s4220_s20 = sshll.u32 %s5921_s9, 4  ;;  %s7768_s20 = int_to_ptr.vmem [resolvable:$true] %s4220_s20 }
 0x371   : > { %s7765_s29 = scalar_lea.hbm %s7839_s6, %s4388_s10  ;;  %s4207_s14 = scalar_lea.sflag [#allocation6], %s5903_s21 }
 0x372   : > { %s5520_s15 = scalar_lea.vmem %s7768_s20, 256  ;;  %s5636_s17 = smov [#allocation13]  }
 0x373   : > { %p5521_p12 = scmp.ne.s32.totalorder %s7768_s20, %s5520_s15  ;;  %s5524_s22 = sshll.u32 %s5636_s17, 4  ;;  %s5525_s22 = int_to_ptr.vmem [resolvable:$false] %s5524_s22 }
 0x374   : > { %s5526_s13 = scalar_lea.vmem %s5525_s22, 512  ;;  %p5527_p10 = scmp.lt.s32.totalorder %s7768_s20, %s5525_s22 }
 0x375   : > { %p5522_p3 = pnand %p5521_p12, %p5851_p8  ;;  %p5528_p13 = scmp.lt.s32.totalorder %s5526_s13, %s5520_s15 }
 0x377   : > { %p5523_p7 = pneg %p5522_p3  ;;  %p5529_p0 = por %p5528_p13, %p5527_p10 }
 0x379   : > { %p5530_p5 = pnand %p5529_p0, %p5523_p7 }
 0x37b   : > { %5533 = shalt.err (!%p5530_p5)
}
 0x37c   : > { %s5534_s16 = scalar_lea.hbm %s7765_s29, 256  ;;  %s5538_s1 = scalar_lea.hbm %s7839_s6, 2048 }
 0x37d   : > { %p5535_p11 = scmp.ne.s32.totalorder %s7765_s29, %s5534_s16  ;;  %p5539_p4 = scmp.lt.u32.totalorder %s7765_s29, %s7839_s6 }
 0x37e   : > { %p5540_p6 = scmp.lt.u32.totalorder %s5538_s1, %s5534_s16  ;;  %p5542_p12 = scmp.lt.u32.totalorder %s5534_s16, %s7765_s29 }
 0x37f   : > { %p5536_p1 = pnand %p5535_p11, %p5851_p8 }
 0x380   : > { %p5541_p9 = por %p5540_p6, %p5539_p4 }
 0x381   : > { %p5537_p2 = pneg %p5536_p1 }
 0x382   : > { %p5543_p3 = por %p5542_p12, %p5541_p9 }
 0x384   : > { %p5544_p7 = pnand %p5543_p3, %p5537_p2 }
 0x386   : > { %5547 = shalt.err (!%p5544_p7)
}
 0x387   : > { %s5637_s18 = smov 128   ;;  %s5638_s15 = smov 8  }
 0x388   : > { %5263 = dma.vmem_to_hbm [thread:$0]  (%p5851_p8), %s7768_s20, 256, %s7765_s29, %s4207_s14, %s5637_s18, %s5637_s18, %s5638_s15  }
 0x389   : > { %s5639_s17 = smov [#allocation14]   ;;  %p8871_p13 = scmp.eq.s32.totalorder %s5701_s28, 7 }
 0x38a   : > { %s4233_s22 = sshll.u32 %s5639_s17, 4  ;;  %s4234_s22 = int_to_ptr.vmem [resolvable:$true] %s4233_s22 }
 0x38b   : > { %s5548_s13 = scalar_lea.vmem %s4234_s22, 256  ;;  %p5555_p11 = scmp.lt.s32.totalorder %s4234_s22, %s4234_s22 }
 0x38c   : > { %p5549_p10 = scmp.ne.s32.totalorder %s4234_s22, %s5548_s13  ;;  %p5556_p1 = scmp.lt.s32.totalorder %s5548_s13, %s5548_s13 }
 0x38e   : > { %p5550_p0 = pnand %p5549_p10, %p8871_p13  ;;  %p5557_p2 = por %p5556_p1, %p5555_p11 }
 0x390   : > { %p5551_p5 = pneg %p5550_p0 }
 0x392   : > { %p5558_p4 = pnand %p5557_p2, %p5551_p5 }
 0x394   : > { %5561 = shalt.err (!%p5558_p4)
}
 0x395   : > { %s5562_s11 = scalar_lea.hbm %s7840_s7, 256  ;;  %p8872_p6 = pmov %p8871_p13 }
 0x396   : > { %p5563_p8 = scmp.ne.s32.totalorder %s7840_s7, %s5562_s11  ;;  %p5568_p3 = scmp.lt.u32.totalorder %s5562_s11, %s7840_s7 }
 0x398   : > { %p5564_p9 = pnand %p5563_p8, %p8872_p6 }
 0x39a   : > { %p5565_p12 = pneg %p5564_p9 }
 0x39c   : > { %p5570_p7 = pnand %p5568_p3, %p5565_p12 }
 0x39e   : > { %5573 = shalt.err (!%p5570_p7)
}
 0x39f   : > { %p8873_p10 = pmov %p8872_p6  ;;  %p8874_p13 = pmov %p8872_p6 }
 0x3a1   : > { %5265 = dma.vmem_to_hbm [thread:$0]  (%p8873_p10), %s4234_s22, 256, %s7840_s7, [#allocation15], %s5637_s18, %s5637_s18, %s5638_s15  }
 0x3a2   : > { %5603 = dma.done.wait (%p8874_p13), [#allocation15], 256   ;;  %p8875_p0 = pmov %p8872_p6 }
 0x3a4   : > { %5605 = vsyncadd (%p8875_p0), [#allocation15], 4294967040 }
 0x3a5 PF: > { %p5301_p5 = scmp.ge.s32.totalorder %s5624_s27, 2  ;;  %s4252_s10 = sand.u32 1, %s5612_s24  }
 0x3a6   : > { %p8876_p11 = scmp.ne.s32.totalorder %s8194_s8, 0  ;;  %s4253_s19 = scalar_lea.sflag [#allocation6], %s4252_s10 }
 0x3a8   : > { %p5287_p1 = pnand %p5301_p5, %p8876_p11 }
 0x3aa   : > { %5607 = dma.done.wait (!%p5287_p1), %s4253_s19, 256  }
 0x3ab   : > { %5609 = vsyncadd (!%p5287_p1), %s4253_s19, 4294967040  ;;  %p24_p2 = scmp.ge.s32.totalorder %s5838_s12, 10   ;;  %s8877_s24 = smov %s5616_s25 }
 0x3ac   : > { %s8878_s25 = smov %s5620_s26  ;;  %s8879_s26 = smov %s5847_s23 }
 0x3ad   : > { %s8880_s27 = smov %s5838_s12  ;;  %26 = sbr.rel (!%p24_p2) target bundleno = 10 (0xa), region = 121 }
 0x3b4   :  { %4258 = vsyncpa [#allocation5], 1 }
 0x3b5   :  { %4260 = vsyncpa [#allocation5 + $0x1], 1 }
 0x3b6   :  { %4261 = vsyncpa [#allocation8], 1 }
 0x3b7   :  { %4262 = vsyncpa [#allocation11], 1 }
 0x3b8   :  { %4263 = vsyncpa [#allocation6], 1 }
 0x3b9   :  { %4265 = vsyncpa [#allocation6 + $0x1], 1 }
 0x3ba   :  { %4266 = vsyncpa [#allocation15], 1 }

</bundles_post_ra>
